<compile_context>
chip_gen: v5e
topology: v5e:2x2
jax: 0.10.0
libtpu: 0.0.40
codegen_flags: <defaults>
</compile_context>

<pallas_src>
import math
import numpy as np
import jax
import jax.numpy as jnp
from jax.experimental import pallas as pl
from jax.experimental.pallas import tpu as pltpu

EPS = 1e-5
_VMEM = pl.BlockSpec(memory_space=pltpu.MemorySpace.VMEM)


def _round8(x):
    return ((x + 7) // 8) * 8


def _wp_layout(C):
    """Row offsets of the packed parameter array (8-aligned sections)."""
    o_w1 = 0                          # conv1 weight, tap-major (9C, C)
    o_w2 = _round8(o_w1 + 9 * C)      # conv2 weight, tap-major (9C, C)
    o_bn = _round8(o_w2 + 9 * C)      # 4 rows: bn1_g, bn1_b, bn2_g, bn2_b
    o_wl = _round8(o_bn + 4)          # C rows: 1x1-head weight^T in lanes 0:2
    o_bias = _round8(o_wl + C)        # 1 row : head bias in lanes 0:2
    rows = _round8(o_bias + 1)
    return o_w1, o_w2, o_bn, o_wl, o_bias, rows


# ----------------------------------------------------------------------------
# Single fused kernel: maxpool -> conv1/BN/ReLU -> conv2(s2)/BN/ReLU
#                      -> global avgpool -> 1x1 head -> softmax/log-softmax
# ----------------------------------------------------------------------------
def _make_softgate_kernel(*, B, C, Np, Wp, cnt1, cnt2, training, layout):
    o_w1, o_w2, o_bn, o_wl, o_bias, _ = layout
    MG = _round8(Wp + 1)              # zero margin so conv1 taps stay in-bounds
    MB = _round8(2 * Wp + 2)          # zero tail so conv2 taps stay in-bounds
    offs1 = [MG + dy * Wp + dx for dy in (-1, 0, 1) for dx in (-1, 0, 1)]
    offs2 = [dy * Wp + dx for dy in (0, 1, 2) for dx in (0, 1, 2)]
    inv1, inv2 = 1.0 / cnt1, 1.0 / cnt2

    def kernel(xq_ref, aux_ref, ind_ref, wp_ref, out_ref, pbuf, abuf):
        f32 = jnp.float32
        m1 = aux_ref[:, 0:1]          # valid conv1 output rows (interior)
        m2 = aux_ref[:, 1:2]          # conv2 (stride-2) output anchor rows

        # ---- MaxPool2d(2): elementwise max of the 4 pre-shifted window slabs
        pool = jnp.maximum(
            jnp.maximum(xq_ref[0 * Np:1 * Np, :], xq_ref[1 * Np:2 * Np, :]),
            jnp.maximum(xq_ref[2 * Np:3 * Np, :], xq_ref[3 * Np:4 * Np, :]))

        # Pooled grid with zero halo; clear ONLY the shift margins.
        pbuf[0:MG, :] = jnp.zeros((MG, C), f32)
        pbuf[MG + Np:MG + Np + MG, :] = jnp.zeros((MG, C), f32)
        pbuf[MG:MG + Np, :] = pool

        # ---- conv1 3x3 (pad 1): ONE (Np, 9C) x (9C, C) MXU matmul -----------
        lhs1 = jnp.concatenate([pbuf[o:o + Np, :] for o in offs1], axis=1)
        acc1 = jnp.dot(lhs1, wp_ref[o_w1:o_w1 + 9 * C, :],
                       preferred_element_type=f32)

        # BN1: training-mode batch stats over valid rows, centered variance.
        g1 = wp_ref[o_bn + 0:o_bn + 1, :]
        b1 = wp_ref[o_bn + 1:o_bn + 2, :]
        mu1 = jnp.sum(acc1 * m1, axis=0, keepdims=True) * inv1
        d1 = (acc1 - mu1) * m1
        var1 = jnp.sum(d1 * d1, axis=0, keepdims=True) * inv1
        a1 = jnp.maximum((acc1 - mu1) * jax.lax.rsqrt(var1 + EPS) * g1 + b1,
                         0.0) * m1                 # zero halo = conv2 padding

        # ---- conv2 3x3 stride 2 (pad 1): same single-matmul formulation -----
        abuf[Np:Np + MB, :] = jnp.zeros((MB, C), f32)
        abuf[0:Np, :] = a1
        lhs2 = jnp.concatenate([abuf[o:o + Np, :] for o in offs2], axis=1)
        acc2 = jnp.dot(lhs2, wp_ref[o_w2:o_w2 + 9 * C, :],
                       preferred_element_type=f32)

        g2 = wp_ref[o_bn + 2:o_bn + 3, :]
        b2 = wp_ref[o_bn + 3:o_bn + 4, :]
        mu2 = jnp.sum(acc2 * m2, axis=0, keepdims=True) * inv2
        d2 = (acc2 - mu2) * m2
        var2 = jnp.sum(d2 * d2, axis=0, keepdims=True) * inv2
        a2 = jnp.maximum((acc2 - mu2) * jax.lax.rsqrt(var2 + EPS) * g2 + b2,
                         0.0)

        # ---- global AvgPool2d + Conv2d(C,2,1) head (fused) -------------------
        pooled = jnp.dot(ind_ref[...], a2, preferred_element_type=f32)  # (B,C)
        logits = (jnp.dot(pooled, wp_ref[o_wl:o_wl + C, 0:2],
                          preferred_element_type=f32)
                  + wp_ref[o_bias:o_bias + 1, 0:2])                      # (B,2)

        # ---- Softmax / LogSoftmax over the 2 gate classes --------------------
        z = logits - jnp.max(logits, axis=1, keepdims=True)
        ez = jnp.exp(z)
        se = jnp.sum(ez, axis=1, keepdims=True)
        logp = z - jnp.log(se)
        p1 = ez[:, 1:2] * pl.reciprocal(se, approx=True)   # softmax[:, 1]
        if not training:                                    # eval: discrete gate
            p1 = (p1 > 0.5).astype(f32)
        out_ref[...] = jnp.concatenate([p1, logp, se], axis=1)   # (B, 4)

    return kernel, MG, MB


# ----------------------------------------------------------------------------
# Wrapper: builds the compact padded pooled-grid layout + static masks, then
# dispatches the single fused kernel.
# ----------------------------------------------------------------------------
def make_soft_gate_forward(batch, channel, pool_size, training=True):
    B, C = batch, channel
    H0 = W0 = pool_size
    H1, W1 = H0 // 2, W0 // 2                       # after MaxPool2d(2)
    H2, W2 = (H1 - 1) // 2 + 1, (W1 - 1) // 2 + 1   # after conv2 stride 2
    # AvgPool kernel size exactly as computed in SoftGateI.__init__; it is a
    # global pool for the intended usage (input spatial == pool_size).
    k = math.floor(math.floor(pool_size / 2) / 2 + 0.5)
    assert k == H2 == W2, "SoftGateI avg pool is global only when spatial == pool_size"

    Hp, Wp = H1 + 2, W1 + 2                         # pooled grid + conv halo
    Np = B * Hp * Wp                                # compact flat grid rows
    layout = _wp_layout(C)

    # Static masks / per-image pre-scaled avg-pool indicator (trace-time consts).
    aux = np.zeros((Np, 2), np.float32)
    ind = np.zeros((B, Np), np.float32)
    for b in range(B):
        base = b * Hp * Wp
        for i in range(H1):
            for j in range(W1):
                aux[base + (i + 1) * Wp + (j + 1), 0] = 1.0        # conv1 outputs
        for i2 in range(H2):
            for j2 in range(W2):
                r = base + 2 * i2 * Wp + 2 * j2                    # conv2 anchors
                aux[r, 1] = 1.0
                ind[b, r] = 1.0 / (H2 * W2)

    kernel, MG, MB = _make_softgate_kernel(
        B=B, C=C, Np=Np, Wp=Wp,
        cnt1=float(B * H1 * W1), cnt2=float(B * H2 * W2),
        training=training, layout=layout)

    call = pl.pallas_call(
        kernel,
        out_shape=jax.ShapeDtypeStruct((B, 4), jnp.float32),
        in_specs=[_VMEM] * 4,
        out_specs=_VMEM,
        scratch_shapes=[pltpu.VMEM((Np + 2 * MG, C), jnp.float32),
                        pltpu.VMEM((Np + MB, C), jnp.float32)],
    )

    aux_j = jnp.asarray(aux)
    ind_j = jnp.asarray(ind)

    def forward(params, x_nchw):
        x = jnp.transpose(x_nchw, (0, 2, 3, 1)).astype(jnp.float32)  # NCHW->NHWC
        x = x[:, :2 * H1, :2 * W1, :]                                # MaxPool floor
        # The 2x2 window values as 4 slabs on the padded pooled grid
        # (wrapper-side layout plumbing only; the max itself runs in-kernel).
        xv = x.reshape(B, H1, 2, W1, 2, C)
        xv = jnp.transpose(xv, (2, 4, 0, 1, 3, 5)).reshape(4, B, H1, W1, C)
        xq = jnp.pad(xv, ((0, 0), (0, 0), (1, 1), (1, 1), (0, 0)))   # zero halo
        xq = xq.reshape(4 * Np, C)
        out = call(xq, aux_j, ind_j, params['wp'])
        gate = out[:, 0:1].reshape(B, 1, 1, 1)       # softmax[:,1].view(B,1,1,1)
        logp = out[:, 1:3]
        return gate, logp

    return jax.jit(forward)


# ----------------------------------------------------------------------------
# Parameter construction (deterministic; mirrors module layer shapes)
# ----------------------------------------------------------------------------
def pack_conv3x3_weight(w_oihw):
    """PyTorch (Cout, Cin, 3, 3) -> tap-major (9*Cin, Cout) matmul weight."""
    cout, cin = w_oihw.shape[0], w_oihw.shape[1]
    return jnp.transpose(w_oihw, (2, 3, 1, 0)).reshape(9 * cin, cout)


def build_params(key, channel):
    C = channel
    o_w1, o_w2, o_bn, o_wl, o_bias, rows = _wp_layout(C)
    k1, k2, k3, k4 = jax.random.split(key, 4)
    w1 = jax.random.normal(k1, (C, C, 3, 3), jnp.float32) * math.sqrt(2.0 / (9 * C))
    w2 = jax.random.normal(k2, (C, C, 3, 3), jnp.float32) * math.sqrt(2.0 / (9 * C))
    wl = jax.random.normal(k3, (2, C), jnp.float32) * math.sqrt(1.0 / C)
    bl = jax.random.uniform(k4, (2,), jnp.float32,
                            -1.0 / math.sqrt(C), 1.0 / math.sqrt(C))

    wp = jnp.zeros((rows, C), jnp.float32)
    wp = wp.at[o_w1:o_w1 + 9 * C].set(pack_conv3x3_weight(w1))
    wp = wp.at[o_w2:o_w2 + 9 * C].set(pack_conv3x3_weight(w2))
    wp = wp.at[o_bn + 0].set(1.0)                       # bn1 gamma (PyTorch init)
    wp = wp.at[o_bn + 2].set(1.0)                       # bn2 gamma
    wp = wp.at[o_wl:o_wl + C, 0:2].set(jnp.transpose(wl))   # 1x1 head weight^T
    wp = wp.at[o_bias, 0:2].set(bl)                     # 1x1 head bias
    return {'wp': wp}


if __name__ == "__main__":
    B, C, POOL = 2, 10, 16          # input spatial == pool_size (gate usage)
    key = jax.random.PRNGKey(0)
    pkey, xkey = jax.random.split(key)

    params = build_params(pkey, C)
    x = jax.random.normal(xkey, (B, C, POOL, POOL), jnp.float32)    # NCHW input

    fwd = make_soft_gate_forward(B, C, POOL, training=True)
    gate, logprob = fwd(params, x)
    jax.block_until_ready(gate)
    jax.block_until_ready(logprob)

    assert gate.shape == (B, 1, 1, 1)
    assert logprob.shape == (B, 2)
    assert bool(jnp.all(jnp.isfinite(gate)))
    assert bool(jnp.all(jnp.isfinite(logprob)))
    print("KERNEL_OK")
</pallas_src>

<mosaic_0001>
module attributes {stable_mosaic.version = 11 : i64} {
  func.func @kernel(%arg0: memref<800x10xf32, #tpu.memory_space<vmem>>, %arg1: memref<200x2xf32, #tpu.memory_space<vmem>>, %arg2: memref<2x200xf32, #tpu.memory_space<vmem>>, %arg3: memref<224x10xf32, #tpu.memory_space<vmem>>, %arg4: memref<2x4xf32, #tpu.memory_space<vmem>>, %arg5: memref<232x10xf32, #tpu.memory_space<vmem>>, %arg6: memref<224x10xf32, #tpu.memory_space<vmem>>) attributes {dimension_semantics = [], scalar_prefetch = 0 : i64, scratch_operands = 2 : i64, tpu.core_type = #tpu.core_type<tc>} {
    %c0 = arith.constant 0 : index
    %c0_0 = arith.constant 0 : index
    %0 = vector.load %arg1[%c0, %c0_0] : memref<200x2xf32, #tpu.memory_space<vmem>>, vector<200x1xf32>
    %c0_1 = arith.constant 0 : index
    %c1 = arith.constant 1 : index
    %1 = vector.load %arg1[%c0_1, %c1] : memref<200x2xf32, #tpu.memory_space<vmem>>, vector<200x1xf32>
    %c0_2 = arith.constant 0 : index
    %c0_3 = arith.constant 0 : index
    %2 = vector.load %arg0[%c0_2, %c0_3] : memref<800x10xf32, #tpu.memory_space<vmem>>, vector<200x10xf32>
    %c200 = arith.constant 200 : index
    %c0_4 = arith.constant 0 : index
    %3 = vector.load %arg0[%c200, %c0_4] : memref<800x10xf32, #tpu.memory_space<vmem>>, vector<200x10xf32>
    %4 = arith.maximumf %2, %3 : vector<200x10xf32>
    %c400 = arith.constant 400 : index
    %c0_5 = arith.constant 0 : index
    %5 = vector.load %arg0[%c400, %c0_5] : memref<800x10xf32, #tpu.memory_space<vmem>>, vector<200x10xf32>
    %c600 = arith.constant 600 : index
    %c0_6 = arith.constant 0 : index
    %6 = vector.load %arg0[%c600, %c0_6] : memref<800x10xf32, #tpu.memory_space<vmem>>, vector<200x10xf32>
    %7 = arith.maximumf %5, %6 : vector<200x10xf32>
    %8 = arith.maximumf %4, %7 : vector<200x10xf32>
    %cst = arith.constant 0.000000e+00 : f32
    %9 = vector.broadcast %cst : f32 to vector<16x10xf32>
    %c0_7 = arith.constant 0 : index
    %c0_8 = arith.constant 0 : index
    %10 = vector.load %arg5[%c0_7, %c0_8] : memref<232x10xf32, #tpu.memory_space<vmem>>, vector<16x10xf32>
    tpu.vector_store %arg5[%c0_7, %c0_8], %9 {strides = array<i32>} : memref<232x10xf32, #tpu.memory_space<vmem>>, vector<16x10xf32>,
    %cst_9 = arith.constant 0.000000e+00 : f32
    %11 = vector.broadcast %cst_9 : f32 to vector<16x10xf32>
    %c216 = arith.constant 216 : index
    %c0_10 = arith.constant 0 : index
    %12 = vector.load %arg5[%c216, %c0_10] : memref<232x10xf32, #tpu.memory_space<vmem>>, vector<16x10xf32>
    tpu.vector_store %arg5[%c216, %c0_10], %11 {strides = array<i32>} : memref<232x10xf32, #tpu.memory_space<vmem>>, vector<16x10xf32>,
    %c16 = arith.constant 16 : index
    %c0_11 = arith.constant 0 : index
    %13 = vector.load %arg5[%c16, %c0_11] : memref<232x10xf32, #tpu.memory_space<vmem>>, vector<200x10xf32>
    tpu.vector_store %arg5[%c16, %c0_11], %8 {strides = array<i32>} : memref<232x10xf32, #tpu.memory_space<vmem>>, vector<200x10xf32>,
    %c5 = arith.constant 5 : index
    %c0_12 = arith.constant 0 : index
    %14 = vector.load %arg5[%c5, %c0_12] : memref<232x10xf32, #tpu.memory_space<vmem>>, vector<200x10xf32>
    %c6 = arith.constant 6 : index
    %c0_13 = arith.constant 0 : index
    %15 = vector.load %arg5[%c6, %c0_13] : memref<232x10xf32, #tpu.memory_space<vmem>>, vector<200x10xf32>
    %c7 = arith.constant 7 : index
    %c0_14 = arith.constant 0 : index
    %16 = vector.load %arg5[%c7, %c0_14] : memref<232x10xf32, #tpu.memory_space<vmem>>, vector<200x10xf32>
    %c15 = arith.constant 15 : index
    %c0_15 = arith.constant 0 : index
    %17 = vector.load %arg5[%c15, %c0_15] : memref<232x10xf32, #tpu.memory_space<vmem>>, vector<200x10xf32>
    %c16_16 = arith.constant 16 : index
    %c0_17 = arith.constant 0 : index
    %18 = vector.load %arg5[%c16_16, %c0_17] : memref<232x10xf32, #tpu.memory_space<vmem>>, vector<200x10xf32>
    %c17 = arith.constant 17 : index
    %c0_18 = arith.constant 0 : index
    %19 = vector.load %arg5[%c17, %c0_18] : memref<232x10xf32, #tpu.memory_space<vmem>>, vector<200x10xf32>
    %c25 = arith.constant 25 : index
    %c0_19 = arith.constant 0 : index
    %20 = vector.load %arg5[%c25, %c0_19] : memref<232x10xf32, #tpu.memory_space<vmem>>, vector<200x10xf32>
    %c26 = arith.constant 26 : index
    %c0_20 = arith.constant 0 : index
    %21 = vector.load %arg5[%c26, %c0_20] : memref<232x10xf32, #tpu.memory_space<vmem>>, vector<200x10xf32>
    %c27 = arith.constant 27 : index
    %c0_21 = arith.constant 0 : index
    %22 = vector.load %arg5[%c27, %c0_21] : memref<232x10xf32, #tpu.memory_space<vmem>>, vector<200x10xf32>
    %23 = tpu.concatenate %14, %15, %16, %17, %18, %19, %20, %21, %22 in 1 : vector<200x10xf32>, vector<200x10xf32>, vector<200x10xf32>, vector<200x10xf32>, vector<200x10xf32>, vector<200x10xf32>, vector<200x10xf32>, vector<200x10xf32>, vector<200x10xf32> -> vector<200x90xf32>
    %c0_22 = arith.constant 0 : index
    %c0_23 = arith.constant 0 : index
    %24 = vector.load %arg3[%c0_22, %c0_23] : memref<224x10xf32, #tpu.memory_space<vmem>>, vector<90x10xf32>
    %cst_24 = arith.constant dense<0.000000e+00> : vector<200x10xf32>
    %25 = tpu.matmul %23, %24, %cst_24 {dimension_numbers = #tpu.dot_dimension_numbers<[1], [0], [0], [1], [0, 0, 1, 1], [], []>} : vector<200x90xf32>, vector<90x10xf32>, vector<200x10xf32> -> vector<200x10xf32>
    %c192 = arith.constant 192 : index
    %c0_25 = arith.constant 0 : index
    %26 = vector.load %arg3[%c192, %c0_25] : memref<224x10xf32, #tpu.memory_space<vmem>>, vector<1x10xf32>
    %c193 = arith.constant 193 : index
    %c0_26 = arith.constant 0 : index
    %27 = vector.load %arg3[%c193, %c0_26] : memref<224x10xf32, #tpu.memory_space<vmem>>, vector<1x10xf32>
    %28 = vector.broadcast %0 : vector<200x1xf32> to vector<200x10xf32>
    %29 = arith.mulf %25, %28 : vector<200x10xf32>
    %cst_27 = arith.constant dense<0.000000e+00> : vector<10xf32>
    %30 = vector.multi_reduction <add>, %29, %cst_27 [0] : vector<200x10xf32> to vector<10xf32>
    %31 = vector.shape_cast %30 : vector<10xf32> to vector<1x10xf32>
    %cst_28 = arith.constant 7.812500e-03 : f32
    %32 = vector.broadcast %cst_28 : f32 to vector<1x10xf32>
    %33 = arith.mulf %31, %32 : vector<1x10xf32>
    %34 = vector.broadcast %33 : vector<1x10xf32> to vector<200x10xf32>
    %35 = arith.subf %25, %34 : vector<200x10xf32>
    %36 = vector.broadcast %0 : vector<200x1xf32> to vector<200x10xf32>
    %37 = arith.mulf %35, %36 : vector<200x10xf32>
    %38 = arith.mulf %37, %37 : vector<200x10xf32>
    %cst_29 = arith.constant dense<0.000000e+00> : vector<10xf32>
    %39 = vector.multi_reduction <add>, %38, %cst_29 [0] : vector<200x10xf32> to vector<10xf32>
    %40 = vector.shape_cast %39 : vector<10xf32> to vector<1x10xf32>
    %cst_30 = arith.constant 7.812500e-03 : f32
    %41 = vector.broadcast %cst_30 : f32 to vector<1x10xf32>
    %42 = arith.mulf %40, %41 : vector<1x10xf32>
    %43 = vector.broadcast %33 : vector<1x10xf32> to vector<200x10xf32>
    %44 = arith.subf %25, %43 : vector<200x10xf32>
    %cst_31 = arith.constant 9.99999974E-6 : f32
    %45 = vector.broadcast %cst_31 : f32 to vector<1x10xf32>
    %46 = arith.addf %42, %45 : vector<1x10xf32>
    %47 = math.rsqrt %46 : vector<1x10xf32>
    %48 = vector.broadcast %47 : vector<1x10xf32> to vector<200x10xf32>
    %49 = arith.mulf %44, %48 : vector<200x10xf32>
    %50 = vector.broadcast %26 : vector<1x10xf32> to vector<200x10xf32>
    %51 = arith.mulf %49, %50 : vector<200x10xf32>
    %52 = vector.broadcast %27 : vector<1x10xf32> to vector<200x10xf32>
    %53 = arith.addf %51, %52 : vector<200x10xf32>
    %cst_32 = arith.constant 0.000000e+00 : f32
    %54 = vector.broadcast %cst_32 : f32 to vector<200x10xf32>
    %55 = arith.maximumf %53, %54 : vector<200x10xf32>
    %56 = vector.broadcast %0 : vector<200x1xf32> to vector<200x10xf32>
    %57 = arith.mulf %55, %56 : vector<200x10xf32>
    %cst_33 = arith.constant 0.000000e+00 : f32
    %58 = vector.broadcast %cst_33 : f32 to vector<24x10xf32>
    %c200_34 = arith.constant 200 : index
    %c0_35 = arith.constant 0 : index
    %59 = vector.load %arg6[%c200_34, %c0_35] : memref<224x10xf32, #tpu.memory_space<vmem>>, vector<24x10xf32>
    tpu.vector_store %arg6[%c200_34, %c0_35], %58 {strides = array<i32>} : memref<224x10xf32, #tpu.memory_space<vmem>>, vector<24x10xf32>,
    %c0_36 = arith.constant 0 : index
    %c0_37 = arith.constant 0 : index
    %60 = vector.load %arg6[%c0_36, %c0_37] : memref<224x10xf32, #tpu.memory_space<vmem>>, vector<200x10xf32>
    tpu.vector_store %arg6[%c0_36, %c0_37], %57 {strides = array<i32>} : memref<224x10xf32, #tpu.memory_space<vmem>>, vector<200x10xf32>,
    %c0_38 = arith.constant 0 : index
    %c0_39 = arith.constant 0 : index
    %61 = vector.load %arg6[%c0_38, %c0_39] : memref<224x10xf32, #tpu.memory_space<vmem>>, vector<200x10xf32>
    %c1_40 = arith.constant 1 : index
    %c0_41 = arith.constant 0 : index
    %62 = vector.load %arg6[%c1_40, %c0_41] : memref<224x10xf32, #tpu.memory_space<vmem>>, vector<200x10xf32>
    %c2 = arith.constant 2 : index
    %c0_42 = arith.constant 0 : index
    %63 = vector.load %arg6[%c2, %c0_42] : memref<224x10xf32, #tpu.memory_space<vmem>>, vector<200x10xf32>
    %c10 = arith.constant 10 : index
    %c0_43 = arith.constant 0 : index
    %64 = vector.load %arg6[%c10, %c0_43] : memref<224x10xf32, #tpu.memory_space<vmem>>, vector<200x10xf32>
    %c11 = arith.constant 11 : index
    %c0_44 = arith.constant 0 : index
    %65 = vector.load %arg6[%c11, %c0_44] : memref<224x10xf32, #tpu.memory_space<vmem>>, vector<200x10xf32>
    %c12 = arith.constant 12 : index
    %c0_45 = arith.constant 0 : index
    %66 = vector.load %arg6[%c12, %c0_45] : memref<224x10xf32, #tpu.memory_space<vmem>>, vector<200x10xf32>
    %c20 = arith.constant 20 : index
    %c0_46 = arith.constant 0 : index
    %67 = vector.load %arg6[%c20, %c0_46] : memref<224x10xf32, #tpu.memory_space<vmem>>, vector<200x10xf32>
    %c21 = arith.constant 21 : index
    %c0_47 = arith.constant 0 : index
    %68 = vector.load %arg6[%c21, %c0_47] : memref<224x10xf32, #tpu.memory_space<vmem>>, vector<200x10xf32>
    %c22 = arith.constant 22 : index
    %c0_48 = arith.constant 0 : index
    %69 = vector.load %arg6[%c22, %c0_48] : memref<224x10xf32, #tpu.memory_space<vmem>>, vector<200x10xf32>
    %70 = tpu.concatenate %61, %62, %63, %64, %65, %66, %67, %68, %69 in 1 : vector<200x10xf32>, vector<200x10xf32>, vector<200x10xf32>, vector<200x10xf32>, vector<200x10xf32>, vector<200x10xf32>, vector<200x10xf32>, vector<200x10xf32>, vector<200x10xf32> -> vector<200x90xf32>
    %c96 = arith.constant 96 : index
    %c0_49 = arith.constant 0 : index
    %71 = vector.load %arg3[%c96, %c0_49] : memref<224x10xf32, #tpu.memory_space<vmem>>, vector<90x10xf32>
    %cst_50 = arith.constant dense<0.000000e+00> : vector<200x10xf32>
    %72 = tpu.matmul %70, %71, %cst_50 {dimension_numbers = #tpu.dot_dimension_numbers<[1], [0], [0], [1], [0, 0, 1, 1], [], []>} : vector<200x90xf32>, vector<90x10xf32>, vector<200x10xf32> -> vector<200x10xf32>
    %c194 = arith.constant 194 : index
    %c0_51 = arith.constant 0 : index
    %73 = vector.load %arg3[%c194, %c0_51] : memref<224x10xf32, #tpu.memory_space<vmem>>, vector<1x10xf32>
    %c195 = arith.constant 195 : index
    %c0_52 = arith.constant 0 : index
    %74 = vector.load %arg3[%c195, %c0_52] : memref<224x10xf32, #tpu.memory_space<vmem>>, vector<1x10xf32>
    %75 = vector.broadcast %1 : vector<200x1xf32> to vector<200x10xf32>
    %76 = arith.mulf %72, %75 : vector<200x10xf32>
    %cst_53 = arith.constant dense<0.000000e+00> : vector<10xf32>
    %77 = vector.multi_reduction <add>, %76, %cst_53 [0] : vector<200x10xf32> to vector<10xf32>
    %78 = vector.shape_cast %77 : vector<10xf32> to vector<1x10xf32>
    %cst_54 = arith.constant 3.125000e-02 : f32
    %79 = vector.broadcast %cst_54 : f32 to vector<1x10xf32>
    %80 = arith.mulf %78, %79 : vector<1x10xf32>
    %81 = vector.broadcast %80 : vector<1x10xf32> to vector<200x10xf32>
    %82 = arith.subf %72, %81 : vector<200x10xf32>
    %83 = vector.broadcast %1 : vector<200x1xf32> to vector<200x10xf32>
    %84 = arith.mulf %82, %83 : vector<200x10xf32>
    %85 = arith.mulf %84, %84 : vector<200x10xf32>
    %cst_55 = arith.constant dense<0.000000e+00> : vector<10xf32>
    %86 = vector.multi_reduction <add>, %85, %cst_55 [0] : vector<200x10xf32> to vector<10xf32>
    %87 = vector.shape_cast %86 : vector<10xf32> to vector<1x10xf32>
    %cst_56 = arith.constant 3.125000e-02 : f32
    %88 = vector.broadcast %cst_56 : f32 to vector<1x10xf32>
    %89 = arith.mulf %87, %88 : vector<1x10xf32>
    %90 = vector.broadcast %80 : vector<1x10xf32> to vector<200x10xf32>
    %91 = arith.subf %72, %90 : vector<200x10xf32>
    %cst_57 = arith.constant 9.99999974E-6 : f32
    %92 = vector.broadcast %cst_57 : f32 to vector<1x10xf32>
    %93 = arith.addf %89, %92 : vector<1x10xf32>
    %94 = math.rsqrt %93 : vector<1x10xf32>
    %95 = vector.broadcast %94 : vector<1x10xf32> to vector<200x10xf32>
    %96 = arith.mulf %91, %95 : vector<200x10xf32>
    %97 = vector.broadcast %73 : vector<1x10xf32> to vector<200x10xf32>
    %98 = arith.mulf %96, %97 : vector<200x10xf32>
    %99 = vector.broadcast %74 : vector<1x10xf32> to vector<200x10xf32>
    %100 = arith.addf %98, %99 : vector<200x10xf32>
    %cst_58 = arith.constant 0.000000e+00 : f32
    %101 = vector.broadcast %cst_58 : f32 to vector<200x10xf32>
    %102 = arith.maximumf %100, %101 : vector<200x10xf32>
    %c0_59 = arith.constant 0 : index
    %c0_60 = arith.constant 0 : index
    %103 = vector.load %arg2[%c0_59, %c0_60] : memref<2x200xf32, #tpu.memory_space<vmem>>, vector<2x200xf32>
    %cst_61 = arith.constant dense<0.000000e+00> : vector<2x10xf32>
    %104 = tpu.matmul %103, %102, %cst_61 {dimension_numbers = #tpu.dot_dimension_numbers<[1], [0], [0], [1], [0, 0, 1, 1], [], []>} : vector<2x200xf32>, vector<200x10xf32>, vector<2x10xf32> -> vector<2x10xf32>
    %c200_62 = arith.constant 200 : index
    %c0_63 = arith.constant 0 : index
    %105 = vector.load %arg3[%c200_62, %c0_63] : memref<224x10xf32, #tpu.memory_space<vmem>>, vector<10x2xf32>
    %cst_64 = arith.constant dense<0.000000e+00> : vector<2x2xf32>
    %106 = tpu.matmul %104, %105, %cst_64 {dimension_numbers = #tpu.dot_dimension_numbers<[1], [0], [0], [1], [0, 0, 1, 1], [], []>} : vector<2x10xf32>, vector<10x2xf32>, vector<2x2xf32> -> vector<2x2xf32>
    %c216_65 = arith.constant 216 : index
    %c0_66 = arith.constant 0 : index
    %107 = vector.load %arg3[%c216_65, %c0_66] : memref<224x10xf32, #tpu.memory_space<vmem>>, vector<1x2xf32>
    %108 = vector.broadcast %107 : vector<1x2xf32> to vector<2x2xf32>
    %109 = arith.addf %106, %108 : vector<2x2xf32>
    %cst_67 = arith.constant dense<0xFF800000> : vector<2xf32>
    %110 = vector.multi_reduction <maximumf>, %109, %cst_67 [1] : vector<2x2xf32> to vector<2xf32>
    %111 = vector.shape_cast %110 : vector<2xf32> to vector<2x1xf32>
    %112 = vector.broadcast %111 : vector<2x1xf32> to vector<2x2xf32>
    %113 = arith.subf %109, %112 : vector<2x2xf32>
    %114 = math.exp %113 : vector<2x2xf32>
    %cst_68 = arith.constant dense<0.000000e+00> : vector<2xf32>
    %115 = vector.multi_reduction <add>, %114, %cst_68 [1] : vector<2x2xf32> to vector<2xf32>
    %116 = vector.shape_cast %115 : vector<2xf32> to vector<2x1xf32>
    %117 = math.log %116 : vector<2x1xf32>
    %118 = vector.broadcast %117 : vector<2x1xf32> to vector<2x2xf32>
    %119 = arith.subf %113, %118 : vector<2x2xf32>
    %120 = vector.extract_strided_slice %114 {offsets = [0, 1], sizes = [2, 1], strides = [1, 1]} : vector<2x2xf32> to vector<2x1xf32>
    %121 = tpu.reciprocal %116 {approx = true} : vector<2x1xf32> -> vector<2x1xf32>
    %122 = arith.mulf %120, %121 : vector<2x1xf32>
    %123 = tpu.concatenate %122, %119, %116 in 1 : vector<2x1xf32>, vector<2x2xf32>, vector<2x1xf32> -> vector<2x4xf32>
    %c0_69 = arith.constant 0 : index
    %c0_70 = arith.constant 0 : index
    %124 = vector.load %arg4[%c0_69, %c0_70] : memref<2x4xf32, #tpu.memory_space<vmem>>, vector<2x4xf32>
    tpu.vector_store %arg4[%c0_69, %c0_70], %123 {strides = array<i32>} : memref<2x4xf32, #tpu.memory_space<vmem>>, vector<2x4xf32>,
    return
  }
}

</mosaic_0001>

<bundles_post_ra>
// kernel: forward.1
= control target key start
LH: loop header
LB: loop body
LE: loop exit
PB: predicated region body
PF: predicated region fallthrough
CT: control target
= control target key end

     0   :  { %vm217_vm0 = vcmask 80896   ;;  %v4061_v0 = vmov 0.0   ;;  %s4062_s15 = smov 10   ;;  %s4063_s5 = smov 20   ;;  %vm1471_vm1 = vcmask 1041408   ;;  %vm1227_vm2 = vcmask 244736   ;;  %s6939_s0 = inlined_call_operand.vmem [shape: f32[800,10], index: 0, kind: input, shape index: {}]   ;;  %s6940_s3 = inlined_call_operand.vmem [shape: f32[224,10], index: 3, kind: input, shape index: {}]   ;;  %s6941_s1 = inlined_call_operand.vmem [shape: f32[200,2], index: 1, kind: input, shape index: {}]   ;;  %s6942_s2 = inlined_call_operand.vmem [shape: f32[2,200], index: 2, kind: input, shape index: {}]   ;;  %s6943_s4 = inlined_call_operand.vmem [shape: f32[2,4], index: 4, kind: output, shape index: {}]  }
   0x1   :  { %218 = vst.msk [vmem:[#allocation2] sm:$0xff] %vm217_vm0, %v4061_v0  ;;  %v44_v1 = vld [vmem:[%s6939_s0 + $0x10] sm:$0xff]  ;;  %v45_v2 = vld [vmem:[%s6939_s0 + $0x18] sm:$0xff]  ;;  %v70_v4 = vld [vmem:[%s6939_s0 + $0xe0] sm:$0xff]  ;;  %s4064_s6 = smov 30   ;;  %s4066_s16 = smov 50  }
   0x2   :  { %v69_v3 = vld [vmem:[%s6939_s0 + $0xd8] sm:$0xff]  ;;  %219 = vst.msk [vmem:[#allocation2 + $0x8] sm:$0xff] %vm217_vm0, %v4061_v0  ;;  %v119_v6 = vld [vmem:[%s6939_s0 + $0x1a0] sm:$0xff]  ;;  %v120_v7 = vld [vmem:[%s6939_s0 + $0x1a8] sm:$0xff]  ;;  %v95_v8 = vmax.f32 %v45_v2, %v70_v4  ;;  %s4067_s17 = smov 60   ;;  %s4068_s18 = smov 80  }
   0x3   :  { %v94_v5 = vmax.f32 %v44_v1, %v69_v3  ;;  %220 = vst.msk [vmem:[#allocation2 + $0xd8] sm:$0xff] %vm217_vm0, %v4061_v0  ;;  %v144_v9 = vld [vmem:[%s6939_s0 + $0x268] sm:$0xff]  ;;  %v145_v10 = vld [vmem:[%s6939_s0 + $0x270] sm:$0xff]  ;;  %v42_v11 = vld [vmem:[%s6939_s0] sm:$0xff]  ;;  %s4069_s19 = smov 70   ;;  %vm1201_vm3 = vcmask 162816  }
   0x4   :  { %221 = vst.msk [vmem:[#allocation2 + $0xe0] sm:$0xff] %vm217_vm0, %v4061_v0  ;;  %v169_v12 = vmax.f32 %v119_v6, %v144_v9  ;;  %v170_v13 = vmax.f32 %v120_v7, %v145_v10  ;;  %v43_v14 = vld [vmem:[%s6939_s0 + $0x8] sm:$0xff]  ;;  %v68_v16 = vld [vmem:[%s6939_s0 + $0xd0] sm:$0xff]  ;;  %v118_v20 = vld [vmem:[%s6939_s0 + $0x198] sm:$0xff]  ;;  %vm1253_vm4 = vcmask 326656   ;;  %vm1279_vm5 = vcmask 408576  }
   0x5   :  { %v67_v15 = vld [vmem:[%s6939_s0 + $0xc8] sm:$0xff]  ;;  %2044 = vst.msk [vmem:[#allocation3 + $0xc8] sm:$0xff] %vm217_vm0, %v4061_v0  ;;  %v93_v18 = vmax.f32 %v43_v14, %v68_v16  ;;  %v117_v19 = vld [vmem:[%s6939_s0 + $0x190] sm:$0xff]  ;;  %v142_v21 = vld [vmem:[%s6939_s0 + $0x258] sm:$0xff]  ;;  %vm1305_vm6 = vcmask 490496   ;;  %vm1331_vm7 = vcmask 572416  }
   0x6   :  { %v92_v17 = vmax.f32 %v42_v11, %v67_v15  ;;  %2045 = vst.msk [vmem:[#allocation3 + $0xd0] sm:$0xff] %vm217_vm0, %v4061_v0  ;;  %v194_v22 = vmax.f32 %v94_v5, %v169_v12  ;;  %v195_v23 = vmax.f32 %v95_v8, %v170_v13  ;;  %v143_v24 = vld [vmem:[%s6939_s0 + $0x260] sm:$0xff]  ;;  %v167_v25 = vmax.f32 %v117_v19, %v142_v21  ;;  %v71_v27 = vld [vmem:[%s6939_s0 + $0xe8] sm:$0xff]  ;;  %v121_v30 = vld [vmem:[%s6939_s0 + $0x1b0] sm:$0xff]  ;;  %s4072_s27 = smov 127  }
   0x7   :  { %v46_v26 = vld [vmem:[%s6939_s0 + $0x20] sm:$0xff]  ;;  %2046 = vst.msk [vmem:[#allocation3 + $0xd8] sm:$0xff] %vm217_vm0, %v4061_v0  ;;  %v168_v28 = vmax.f32 %v118_v20, %v143_v24  ;;  %v146_v31 = vld [vmem:[%s6939_s0 + $0x278] sm:$0xff]  ;;  %v47_v32 = vld [vmem:[%s6939_s0 + $0x28] sm:$0xff]  ;;  %vm1357_vm8 = vcmask 654336   ;;  %vm1395_vm9 = vcmask 736256  }
   0x8   :  { %v96_v29 = vmax.f32 %v46_v26, %v71_v27  ;;  %224 = vst.msk [vmem:[#allocation2 + $0x20] sm:$0xff] %vm217_vm0, %v194_v22  ;;  %v192_v33 = vmax.f32 %v92_v17, %v167_v25  ;;  %v171_v34 = vmax.f32 %v121_v30, %v146_v31  ;;  %v72_v35 = vld [vmem:[%s6939_s0 + $0xf0] sm:$0xff]  ;;  %v122_v36 = vld [vmem:[%s6939_s0 + $0x1b8] sm:$0xff]  ;;  %v147_v37 = vld [vmem:[%s6939_s0 + $0x280] sm:$0xff] }
   0x9   :  { %v272_v38 = vld [vmem:[#allocation2 + $0x6] sm:$0xff]  ;;  %225 = vst.msk [vmem:[#allocation2 + $0x28] sm:$0xff] %vm217_vm0, %v195_v23  ;;  %v193_v39 = vmax.f32 %v93_v18, %v168_v28  ;;  %v97_v40 = vmax.f32 %v47_v32, %v72_v35  ;;  %v172_v41 = vmax.f32 %v122_v36, %v147_v37  ;;  %v49_v43 = vld [vmem:[%s6939_s0 + $0x38] sm:$0xff]  ;;  %v74_v46 = vld [vmem:[%s6939_s0 + $0x100] sm:$0xff] }
   0xa   :  { %v48_v42 = vld [vmem:[%s6939_s0 + $0x30] sm:$0xff]  ;;  %449 = vrot.lane.b32.xlu0 %v272_v38, %s4062_s15  ;;  %222 = vst.msk [vmem:[#allocation2 + $0x10] sm:$0xff] %vm217_vm0, %v192_v33  ;;  %v196_v44 = vmax.f32 %v96_v29, %v171_v34  ;;  %v73_v45 = vld [vmem:[%s6939_s0 + $0xf8] sm:$0xff]  ;;  %v123_v47 = vld [vmem:[%s6939_s0 + $0x1c0] sm:$0xff]  ;;  %v99_v50 = vmax.f32 %v49_v43, %v74_v46 }
   0xb   :  { %223 = vst.msk [vmem:[#allocation2 + $0x18] sm:$0xff] %vm217_vm0, %v193_v39  ;;  %v197_v48 = vmax.f32 %v97_v40, %v172_v41  ;;  %v98_v49 = vmax.f32 %v48_v42, %v73_v45  ;;  %v124_v51 = vld [vmem:[%s6939_s0 + $0x1c8] sm:$0xff]  ;;  %v149_v53 = vld [vmem:[%s6939_s0 + $0x290] sm:$0xff]  ;;  %v50_v56 = vld [vmem:[%s6939_s0 + $0x40] sm:$0xff] }
   0xc   :  { %v148_v52 = vld [vmem:[%s6939_s0 + $0x288] sm:$0xff]  ;;  %226 = vst.msk [vmem:[#allocation2 + $0x30] sm:$0xff] %vm217_vm0, %v196_v44  ;;  %v174_v55 = vmax.f32 %v124_v51, %v149_v53  ;;  %v125_v58 = vld [vmem:[%s6939_s0 + $0x1d0] sm:$0xff]  ;;  %v150_v60 = vld [vmem:[%s6939_s0 + $0x298] sm:$0xff] }
   0xd   :  { %v173_v54 = vmax.f32 %v123_v47, %v148_v52  ;;  %v75_v57 = vld [vmem:[%s6939_s0 + $0x108] sm:$0xff]  ;;  %227 = vst.msk [vmem:[#allocation2 + $0x38] sm:$0xff] %vm217_vm0, %v197_v48  ;;  %v52_v62 = vld [vmem:[%s6939_s0 + $0x50] sm:$0xff]  ;;  %v175_v1 = vmax.f32 %v125_v58, %v150_v60  ;;  %v77_v3 = vld [vmem:[%s6939_s0 + $0x118] sm:$0xff] }
   0xe   :  { %v100_v59 = vmax.f32 %v50_v56, %v75_v57  ;;  %v51_v61 = vld [vmem:[%s6939_s0 + $0x48] sm:$0xff]  ;;  %v199_v0 = vmax.f32 %v99_v50, %v174_v55  ;;  %v76_v2 = vld [vmem:[%s6939_s0 + $0x110] sm:$0xff]  ;;  %v126_v4 = vld [vmem:[%s6939_s0 + $0x1d8] sm:$0xff]  ;;  %v102_v6 = vmax.f32 %v52_v62, %v77_v3 }
   0xf   :  { %v198_v63 = vmax.f32 %v98_v49, %v173_v54  ;;  %v101_v5 = vmax.f32 %v51_v61, %v76_v2  ;;  %v127_v7 = vld [vmem:[%s6939_s0 + $0x1e0] sm:$0xff]  ;;  %v152_v9 = vld [vmem:[%s6939_s0 + $0x2a8] sm:$0xff]  ;;  %v53_v14 = vld [vmem:[%s6939_s0 + $0x58] sm:$0xff] }
  0x10   :  { %v151_v8 = vld [vmem:[%s6939_s0 + $0x2a0] sm:$0xff]  ;;  %v276_v10 = vld [vmem:[#allocation2 + $0x26] sm:$0xff]  ;;  %v200_v11 = vmax.f32 %v100_v59, %v175_v1  ;;  %v177_v13 = vmax.f32 %v127_v7, %v152_v9  ;;  %229 = vst.msk [vmem:[#allocation2 + $0x48] sm:$0xff] %vm217_vm0, %v199_v0  ;;  %v130_v33 = vld [vmem:[%s6939_s0 + $0x1f8] sm:$0xff] }
  0x11   :  { %228 = vst.msk [vmem:[#allocation2 + $0x40] sm:$0xff] %vm217_vm0, %v198_v63  ;;  %v176_v12 = vmax.f32 %v126_v4, %v151_v8  ;;  %v78_v15 = vld [vmem:[%s6939_s0 + $0x120] sm:$0xff]  ;;  %457 = vrot.lane.b32.xlu2 %v276_v10, %s4062_s15  ;;  %v273_v16 = vld [vmem:[#allocation2 + $0xe] sm:$0xff]  ;;  %v128_v18 = vld [vmem:[%s6939_s0 + $0x1e8] sm:$0xff] }
  0x12   :  { %v103_v17 = vmax.f32 %v53_v14, %v78_v15  ;;  %v153_v19 = vld [vmem:[%s6939_s0 + $0x2b0] sm:$0xff]  ;;  %v274_v20 = vld [vmem:[#allocation2 + $0x16] sm:$0xff]  ;;  %451 = vrot.lane.b32.xlu0 %v273_v16, %s4062_s15  ;;  %230 = vst.msk [vmem:[#allocation2 + $0x50] sm:$0xff] %vm217_vm0, %v200_v11  ;;  %v202_v22 = vmax.f32 %v102_v6, %v177_v13  ;;  %v55_v25 = vld [vmem:[%s6939_s0 + $0x68] sm:$0xff] }
  0x13   :  { %v201_v21 = vmax.f32 %v101_v5, %v176_v12  ;;  %v178_v23 = vmax.f32 %v128_v18, %v153_v19  ;;  %v54_v24 = vld [vmem:[%s6939_s0 + $0x60] sm:$0xff]  ;;  %453 = vrot.lane.b32.xlu1 %v274_v20, %s4062_s15  ;;  %v79_v26 = vld [vmem:[%s6939_s0 + $0x128] sm:$0xff]  ;;  %v277_v27 = vld [vmem:[#allocation2 + $0x2e] sm:$0xff] }
  0x14   :  { %v80_v29 = vld [vmem:[%s6939_s0 + $0x130] sm:$0xff]  ;;  %v104_v30 = vmax.f32 %v54_v24, %v79_v26  ;;  %232 = vst.msk [vmem:[#allocation2 + $0x60] sm:$0xff] %vm217_vm0, %v202_v22  ;;  %v154_v34 = vld [vmem:[%s6939_s0 + $0x2b8] sm:$0xff]  ;;  %v155_v35 = vld [vmem:[%s6939_s0 + $0x2c0] sm:$0xff] }
  0x15   :  { %231 = vst.msk [vmem:[#allocation2 + $0x58] sm:$0xff] %vm217_vm0, %v201_v21  ;;  %v203_v28 = vmax.f32 %v103_v17, %v178_v23  ;;  %v129_v31 = vld [vmem:[%s6939_s0 + $0x1f0] sm:$0xff]  ;;  %v105_v32 = vmax.f32 %v55_v25, %v80_v29  ;;  %v180_v37 = vmax.f32 %v130_v33, %v155_v35  ;;  %v81_v39 = vld [vmem:[%s6939_s0 + $0x138] sm:$0xff]  ;;  %v131_v40 = vld [vmem:[%s6939_s0 + $0x200] sm:$0xff] }
  0x16   :  { %v179_v36 = vmax.f32 %v129_v31, %v154_v34  ;;  %v56_v38 = vld [vmem:[%s6939_s0 + $0x70] sm:$0xff]  ;;  %v278_v41 = vld [vmem:[#allocation2 + $0x36] sm:$0xff]  ;;  %v156_v43 = vld [vmem:[%s6939_s0 + $0x2c8] sm:$0xff] }
  0x17   :  { %233 = vst.msk [vmem:[#allocation2 + $0x68] sm:$0xff] %vm217_vm0, %v203_v28  ;;  %v106_v42 = vmax.f32 %v56_v38, %v81_v39  ;;  %v57_v44 = vld [vmem:[%s6939_s0 + $0x78] sm:$0xff]  ;;  %v275_v45 = vld [vmem:[#allocation2 + $0x1e] sm:$0xff]  ;;  %v205_v47 = vmax.f32 %v105_v32, %v180_v37  ;;  %v181_v48 = vmax.f32 %v131_v40, %v156_v43  ;;  %v133_v56 = vld [vmem:[%s6939_s0 + $0x210] sm:$0xff] }
  0x18   :  { %v204_v46 = vmax.f32 %v104_v30, %v179_v36  ;;  %v58_v49 = vld [vmem:[%s6939_s0 + $0x80] sm:$0xff]  ;;  %v83_v51 = vld [vmem:[%s6939_s0 + $0x148] sm:$0xff]  ;;  %v157_v57 = vld [vmem:[%s6939_s0 + $0x2d0] sm:$0xff] }
  0x19   :  { %v82_v50 = vld [vmem:[%s6939_s0 + $0x140] sm:$0xff]  ;;  %459 = vrot.lane.b32.xlu2 %v277_v27, %s4062_s15  ;;  %v132_v53 = vld [vmem:[%s6939_s0 + $0x208] sm:$0xff]  ;;  %v206_v54 = vmax.f32 %v106_v42, %v181_v48  ;;  %v108_v55 = vmax.f32 %v58_v49, %v83_v51  ;;  %v158_v58 = vld [vmem:[%s6939_s0 + $0x2d8] sm:$0xff]  ;;  %235 = vst.msk [vmem:[#allocation2 + $0x78] sm:$0xff] %vm217_vm0, %v205_v47 }
  0x1a   :  { %v107_v52 = vmax.f32 %v57_v44, %v82_v50  ;;  %461 = vrot.lane.b32.xlu0 %v278_v41, %s4062_s15  ;;  %234 = vst.msk [vmem:[#allocation2 + $0x70] sm:$0xff] %vm217_vm0, %v204_v46  ;;  %v182_v59 = vmax.f32 %v132_v53, %v157_v57  ;;  %v183_v60 = vmax.f32 %v133_v56, %v158_v58  ;;  %v59_v61 = vld [vmem:[%s6939_s0 + $0x88] sm:$0xff]  ;;  %v84_v62 = vld [vmem:[%s6939_s0 + $0x150] sm:$0xff]  ;;  %v134_v1 = vld [vmem:[%s6939_s0 + $0x218] sm:$0xff] }
  0x1b   :  { %455 = vrot.lane.b32.xlu1 %v275_v45, %s4062_s15  ;;  %v280_v63 = vld [vmem:[#allocation2 + $0x46] sm:$0xff]  ;;  %236 = vst.msk [vmem:[#allocation2 + $0x80] sm:$0xff] %vm217_vm0, %v206_v54  ;;  %v109_v0 = vmax.f32 %v59_v61, %v84_v62  ;;  %v159_v2 = vld [vmem:[%s6939_s0 + $0x2e0] sm:$0xff]  ;;  %v281_v3 = vld [vmem:[#allocation2 + $0x4e] sm:$0xff] }
  0x1c   :  { %v207_v4 = vmax.f32 %v107_v52, %v182_v59  ;;  %v208_v5 = vmax.f32 %v108_v55, %v183_v60  ;;  %v184_v6 = vmax.f32 %v134_v1, %v159_v2  ;;  %v60_v7 = vld [vmem:[%s6939_s0 + $0x90] sm:$0xff]  ;;  %v61_v8 = vld [vmem:[%s6939_s0 + $0x98] sm:$0xff]  ;;  %v279_v9 = vld [vmem:[#allocation2 + $0x3e] sm:$0xff] }
  0x1d   :  { %v85_v10 = vld [vmem:[%s6939_s0 + $0x158] sm:$0xff]  ;;  %v86_v11 = vld [vmem:[%s6939_s0 + $0x160] sm:$0xff]  ;;  %v136_v16 = vld [vmem:[%s6939_s0 + $0x228] sm:$0xff] }
  0x1e   :  { %v135_v12 = vld [vmem:[%s6939_s0 + $0x220] sm:$0xff]  ;;  %237 = vst.msk [vmem:[#allocation2 + $0x88] sm:$0xff] %vm217_vm0, %v207_v4  ;;  %v209_v13 = vmax.f32 %v109_v0, %v184_v6  ;;  %v110_v14 = vmax.f32 %v60_v7, %v85_v10  ;;  %v111_v15 = vmax.f32 %v61_v8, %v86_v11  ;;  %v160_v17 = vld [vmem:[%s6939_s0 + $0x2e8] sm:$0xff]  ;;  %v161_v18 = vld [vmem:[%s6939_s0 + $0x2f0] sm:$0xff] }
  0x1f   :  { %238 = vst.msk [vmem:[#allocation2 + $0x90] sm:$0xff] %vm217_vm0, %v208_v5  ;;  %v185_v19 = vmax.f32 %v135_v12, %v160_v17  ;;  %v186_v20 = vmax.f32 %v136_v16, %v161_v18  ;;  %v62_v21 = vld [vmem:[%s6939_s0 + $0xa0] sm:$0xff]  ;;  %v87_v22 = vld [vmem:[%s6939_s0 + $0x168] sm:$0xff]  ;;  %v137_v23 = vld [vmem:[%s6939_s0 + $0x230] sm:$0xff] }
  0x20   :  { %239 = vst.msk [vmem:[#allocation2 + $0x98] sm:$0xff] %vm217_vm0, %v209_v13  ;;  %v112_v24 = vmax.f32 %v62_v21, %v87_v22  ;;  %v162_v25 = vld [vmem:[%s6939_s0 + $0x2f8] sm:$0xff]  ;;  %v63_v26 = vld [vmem:[%s6939_s0 + $0xa8] sm:$0xff]  ;;  %v64_v30 = vld [vmem:[%s6939_s0 + $0xb0] sm:$0xff] }
  0x21   :  { %465 = vrot.lane.b32.xlu2 %v280_v63, %s4062_s15  ;;  %v210_v27 = vmax.f32 %v110_v14, %v185_v19  ;;  %v211_v28 = vmax.f32 %v111_v15, %v186_v20  ;;  %v187_v29 = vmax.f32 %v137_v23, %v162_v25  ;;  %v88_v31 = vld [vmem:[%s6939_s0 + $0x170] sm:$0xff]  ;;  %v89_v32 = vld [vmem:[%s6939_s0 + $0x178] sm:$0xff]  ;;  %v139_v37 = vld [vmem:[%s6939_s0 + $0x240] sm:$0xff] }
  0x22   :  { %467 = vrot.lane.b32.xlu0 %v281_v3, %s4062_s15  ;;  %v113_v33 = vmax.f32 %v63_v26, %v88_v31  ;;  %v138_v34 = vld [vmem:[%s6939_s0 + $0x238] sm:$0xff]  ;;  %v114_v36 = vmax.f32 %v64_v30, %v89_v32  ;;  %v163_v38 = vld [vmem:[%s6939_s0 + $0x300] sm:$0xff]  ;;  %v164_v39 = vld [vmem:[%s6939_s0 + $0x308] sm:$0xff] }
  0x23   :  { %463 = vrot.lane.b32.xlu1 %v279_v9, %s4062_s15  ;;  %240 = vst.msk [vmem:[#allocation2 + $0xa0] sm:$0xff] %vm217_vm0, %v210_v27  ;;  %v212_v35 = vmax.f32 %v112_v24, %v187_v29  ;;  %v188_v40 = vmax.f32 %v138_v34, %v163_v38  ;;  %v189_v41 = vmax.f32 %v139_v37, %v164_v39  ;;  %v65_v42 = vld [vmem:[%s6939_s0 + $0xb8] sm:$0xff]  ;;  %v90_v43 = vld [vmem:[%s6939_s0 + $0x180] sm:$0xff]  ;;  %v140_v44 = vld [vmem:[%s6939_s0 + $0x248] sm:$0xff] }
  0x24   :  { %241 = vst.msk [vmem:[#allocation2 + $0xa8] sm:$0xff] %vm217_vm0, %v211_v28  ;;  %v283_v45 = vld [vmem:[#allocation2 + $0x5e] sm:$0xff]  ;;  %v115_v46 = vmax.f32 %v65_v42, %v90_v43  ;;  %v165_v47 = vld [vmem:[%s6939_s0 + $0x310] sm:$0xff]  ;;  %v282_v52 = vld [vmem:[#allocation2 + $0x56] sm:$0xff] }
  0x25   :  { %242 = vst.msk [vmem:[#allocation2 + $0xb0] sm:$0xff] %vm217_vm0, %v212_v35  ;;  %v284_v48 = vld [vmem:[#allocation2 + $0x66] sm:$0xff]  ;;  %v213_v49 = vmax.f32 %v113_v33, %v188_v40  ;;  %v214_v50 = vmax.f32 %v114_v36, %v189_v41  ;;  %v190_v51 = vmax.f32 %v140_v44, %v165_v47  ;;  %v286_v54 = vld [vmem:[#allocation2 + $0x76] sm:$0xff]  ;;  %v287_v55 = vld [vmem:[#allocation2 + $0x7e] sm:$0xff] }
  0x26   :  { %v285_v56 = vld [vmem:[#allocation2 + $0x6e] sm:$0xff]  ;;  %v288_v59 = vld [vmem:[#allocation2 + $0x86] sm:$0xff]  ;;  %v299_v3 = vld [vmem:[#allocation2 + $0x17] sm:$0xff] }
  0x27   :  { %243 = vst.msk [vmem:[#allocation2 + $0xb8] sm:$0xff] %vm217_vm0, %v213_v49  ;;  %v215_v53 = vmax.f32 %v115_v46, %v190_v51  ;;  %v289_v57 = vld [vmem:[#allocation2 + $0x8e] sm:$0xff]  ;;  %v290_v58 = vld [vmem:[#allocation2 + $0x96] sm:$0xff]  ;;  %v300_v7 = vld [vmem:[#allocation2 + $0x1f] sm:$0xff] }
  0x28   :  { %244 = vst.msk [vmem:[#allocation2 + $0xc0] sm:$0xff] %vm217_vm0, %v214_v50  ;;  %v298_v2 = vld [vmem:[#allocation2 + $0xf] sm:$0xff]  ;;  %v297_v4 = vld [vmem:[#allocation2 + $0x7] sm:$0xff]  ;;  %v304_v8 = vld [vmem:[#allocation2 + $0x3f] sm:$0xff] }
  0x29   :  { %471 = vrot.lane.b32.xlu2 %v283_v45, %s4062_s15  ;;  %245 = vst.msk [vmem:[#allocation2 + $0xc8] sm:$0xff] %vm217_vm0, %v215_v53  ;;  %v301_v5 = vld [vmem:[#allocation2 + $0x27] sm:$0xff]  ;;  %v302_v6 = vld [vmem:[#allocation2 + $0x2f] sm:$0xff]  ;;  %v303_v10 = vld [vmem:[#allocation2 + $0x37] sm:$0xff] }
  0x2a   :  { %473 = vrot.lane.b32.xlu0 %v284_v48, %s4062_s15  ;;  %v291_v62 = vld [vmem:[#allocation2 + $0x9e] sm:$0xff]  ;;  %v305_v9 = vld [vmem:[#allocation2 + $0x47] sm:$0xff]  ;;  %v4456_v13 = vld [vmem:[#allocation2 + $0x4f] sm:$0xff] }
  0x2b   :  { %469 = vrot.lane.b32.xlu1 %v282_v52, %s4062_s15  ;;  %v292_v60 = vld [vmem:[#allocation2 + $0xa6] sm:$0xff]  ;;  %v4452_v11 = vld [vmem:[#allocation2 + $0x57] sm:$0xff]  ;;  %v4466_v15 = vld [vmem:[#allocation2 + $0x6f] sm:$0xff] }
  0x2c   :  { %v293_v61 = vld [vmem:[#allocation2 + $0xae] sm:$0xff]  ;;  %v4454_v12 = vld [vmem:[#allocation2 + $0x5f] sm:$0xff]  ;;  %v4468_v16 = vld [vmem:[#allocation2 + $0x77] sm:$0xff] }
  0x2d   :  { %v4470_v17 = vld [vmem:[#allocation2 + $0x67] sm:$0xff]  ;;  %v4482_v20 = vld [vmem:[#allocation2 + $0x8f] sm:$0xff]  ;;  %v4484_v21 = vld [vmem:[#allocation2 + $0x7f] sm:$0xff] }
  0x2e   :  { %v294_v1 = vld [vmem:[#allocation2 + $0xb6] sm:$0xff]  ;;  %v4480_v19 = vld [vmem:[#allocation2 + $0x87] sm:$0xff]  ;;  %v4496_v24 = vld [vmem:[#allocation2 + $0x9f] sm:$0xff] }
  0x2f   :  { %v295_v63 = vld [vmem:[#allocation2 + $0xbe] sm:$0xff]  ;;  %v4498_v25 = vld [vmem:[#allocation2 + $0xa7] sm:$0xff]  ;;  %v318_v32 = vld [vmem:[#allocation2 + $0xaf] sm:$0xff] }
  0x30   :  { %v296_v0 = vld [vmem:[#allocation2 + $0xc6] sm:$0xff]  ;;  %v4500_v26 = vld [vmem:[#allocation2 + $0x97] sm:$0xff] }
  0x31   :  { %477 = vrot.lane.b32.xlu2 %v286_v54, %s4062_s15  ;;  %v319_v30 = vld [vmem:[#allocation2 + $0xb7] sm:$0xff]  ;;  %v320_v31 = vld [vmem:[#allocation2 + $0xbf] sm:$0xff]  ;;  %v4523_v36 = vld [vmem:[#allocation2 + $0xc7] sm:$0xff] }
  0x32   :  { %479 = vrot.lane.b32.xlu0 %v287_v55, %s4062_s15  ;;  %v66_v46 = vld [vmem:[%s6939_s0 + $0xc0] sm:$0xff]  ;;  %v91_v47 = vld [vmem:[%s6939_s0 + $0x188] sm:$0xff]  ;;  %v141_v48 = vld [vmem:[%s6939_s0 + $0x250] sm:$0xff] }
  0x33   :  { %475 = vrot.lane.b32.xlu1 %v285_v56, %s4062_s15  ;;  %v116_v49 = vmax.f32 %v66_v46, %v91_v47  ;;  %v166_v50 = vld [vmem:[%s6939_s0 + $0x318] sm:$0xff]  ;;  %s4065_s0 = smov 40   ;;  %v399_v46 = vld [vmem:[#allocation2 + $0x1b] sm:$0xff] }
  0x34   :  { %v191_v51 = vmax.f32 %v141_v48, %v166_v50  ;;  %v374_v47 = vld [vmem:[#allocation2 + $0x1a] sm:$0xff] }
  0x36   :  { %v216_v52 = vmax.f32 %v116_v49, %v191_v51  ;;  %v375_v51 = vld [vmem:[#allocation2 + $0x22] sm:$0xff] }
  0x38   :  { %246 = vst.msk [vmem:[#allocation2 + $0xd0] sm:$0xff] %vm217_vm0, %v216_v52  ;;  %v400_v52 = vld [vmem:[#allocation2 + $0x23] sm:$0xff] }
  0x39   :  { %483 = vrot.lane.b32.xlu2 %v289_v57, %s4062_s15 }
  0x3a   :  { %485 = vrot.lane.b32.xlu0 %v290_v58, %s4062_s15 }
  0x3b   :  { %481 = vrot.lane.b32.xlu1 %v288_v59, %s4062_s15 }
  0x41   :  { %489 = vrot.lane.b32.xlu2 %v292_v60, %s4062_s15 }
  0x42   :  { %491 = vrot.lane.b32.xlu0 %v293_v61, %s4062_s15 }
  0x43   :  { %487 = vrot.lane.b32.xlu1 %v291_v62, %s4062_s15 }
  0x49   :  { %495 = vrot.lane.b32.xlu2 %v295_v63, %s4062_s15 }
  0x4a   :  { %497 = vrot.lane.b32.xlu0 %v296_v0, %s4062_s15 }
  0x4b   :  { %493 = vrot.lane.b32.xlu1 %v294_v1, %s4062_s15 }
  0x51   :  { %551 = vrot.lane.b32.xlu2 %v298_v2, %s4063_s5 }
  0x52   :  { %553 = vrot.lane.b32.xlu0 %v299_v3, %s4063_s5 }
  0x53   :  { %549 = vrot.lane.b32.xlu1 %v297_v4, %s4063_s5  ;;  %v322_v4 = vld [vmem:[#allocation2 + $0xcf] sm:$0xff] }
  0x59   :  { %557 = vrot.lane.b32.xlu2 %v301_v5, %s4063_s5 }
  0x5a   :  { %559 = vrot.lane.b32.xlu0 %v302_v6, %s4063_s5 }
  0x5b   :  { %555 = vrot.lane.b32.xlu1 %v300_v7, %s4063_s5 }
  0x61   :  { %563 = vrot.lane.b32.xlu2 %v304_v8, %s4063_s5 }
  0x62   :  { %565 = vrot.lane.b32.xlu0 %v305_v9, %s4063_s5 }
  0x63   :  { %561 = vrot.lane.b32.xlu1 %v303_v10, %s4063_s5 }
  0x69   :  { %569 = vrot.lane.b32.xlu2 %v4452_v11, %s4063_s5 }
  0x6a   :  { %571 = vrot.lane.b32.xlu0 %v4454_v12, %s4063_s5 }
  0x6b   :  { %567 = vrot.lane.b32.xlu1 %v4456_v13, %s4063_s5  ;;  %v4464_v14 = vpop.permute.xlu2 %457 }
  0x71   :  { %575 = vrot.lane.b32.xlu2 %v4466_v15, %s4063_s5 }
  0x72   :  { %577 = vrot.lane.b32.xlu0 %v4468_v16, %s4063_s5 }
  0x73   :  { %573 = vrot.lane.b32.xlu1 %v4470_v17, %s4063_s5  ;;  %v4478_v18 = vpop.permute.xlu2 %459 }
  0x79   :  { %581 = vrot.lane.b32.xlu2 %v4480_v19, %s4063_s5 }
  0x7a   :  { %583 = vrot.lane.b32.xlu0 %v4482_v20, %s4063_s5 }
  0x7b   :  { %579 = vrot.lane.b32.xlu1 %v4484_v21, %s4063_s5  ;;  %v4492_v22 = vpop.permute.xlu2 %465 }
  0x7c   :  { %v4494_v23 = vpop.permute.xlu0 %449 }
  0x81   :  { %587 = vrot.lane.b32.xlu2 %v4496_v24, %s4063_s5 }
  0x82   :  { %589 = vrot.lane.b32.xlu0 %v4498_v25, %s4063_s5 }
  0x83   :  { %585 = vrot.lane.b32.xlu1 %v4500_v26, %s4063_s5  ;;  %v4508_v27 = vpop.permute.xlu2 %471 }
  0x84   :  { %6958 = vst [vmem:[#allocation4_spill] sm:$0xff] %v4508_v27  ;;  %v4510_v28 = vpop.permute.xlu0 %451 }
  0x85   :  { %v4512_v29 = vpop.permute.xlu1 %453 }
  0x89   :  { %593 = vrot.lane.b32.xlu2 %v319_v30, %s4063_s5 }
  0x8a   :  { %595 = vrot.lane.b32.xlu0 %v320_v31, %s4063_s5 }
  0x8b   :  { %591 = vrot.lane.b32.xlu1 %v318_v32, %s4063_s5  ;;  %v4517_v33 = vpop.permute.xlu2 %477 }
  0x8c   :  { %v4519_v34 = vpop.permute.xlu0 %461 }
  0x8d   :  { %v4521_v35 = vpop.permute.xlu1 %455 }
  0x91   :  { %625 = vrot.lane.b32.xlu2 %v298_v2, %s4064_s6 }
  0x92   :  { %627 = vrot.lane.b32.xlu0 %v299_v3, %s4064_s6 }
  0x93   :  { %597 = vrot.lane.b32.xlu1 %v4523_v36, %s4063_s5  ;;  %v4529_v37 = vpop.permute.xlu2 %483 }
  0x94   :  { %v4531_v38 = vpop.permute.xlu0 %467 }
  0x95   :  { %6959 = vst [vmem:[#allocation5_spill] sm:$0xff] %v4531_v38  ;;  %v4533_v39 = vpop.permute.xlu1 %463  ;;  %v415_v38 = vld [vmem:[#allocation2 + $0x9b] sm:$0xff] }
  0x99   :  { %631 = vrot.lane.b32.xlu2 %v301_v5, %s4064_s6  ;;  %v323_v5 = vld [vmem:[#allocation2 + $0x10] sm:$0xff] }
  0x9a   :  { %633 = vrot.lane.b32.xlu0 %v302_v6, %s4064_s6 }
  0x9b   :  { %629 = vrot.lane.b32.xlu1 %v300_v7, %s4064_s6  ;;  %v4538_v40 = vpop.permute.xlu2 %489 }
  0x9c   :  { %6960 = vst [vmem:[#allocation6_spill] sm:$0xff] %v4538_v40  ;;  %v4540_v41 = vpop.permute.xlu0 %473 }
  0x9d   :  { %6961 = vst [vmem:[#allocation7_spill] sm:$0xff] %v4540_v41  ;;  %v4542_v42 = vpop.permute.xlu1 %469  ;;  %v404_v41 = vld [vmem:[#allocation2 + $0x43] sm:$0xff] }
  0x9e   :  { %6962 = vst [vmem:[#allocation8_spill] sm:$0xff] %v4542_v42 }
  0xa1   :  { %637 = vrot.lane.b32.xlu2 %v304_v8, %s4064_s6 }
  0xa2   :  { %639 = vrot.lane.b32.xlu0 %v305_v9, %s4064_s6  ;;  %v325_v9 = vld [vmem:[#allocation2 + $0x20] sm:$0xff] }
  0xa3   :  { %635 = vrot.lane.b32.xlu1 %v303_v10, %s4064_s6  ;;  %v4547_v43 = vpop.permute.xlu2 %495  ;;  %v326_v10 = vld [vmem:[#allocation2 + $0x28] sm:$0xff] }
  0xa4   :  { %6963 = vst [vmem:[#allocation9_spill] sm:$0xff] %v4547_v43  ;;  %v4549_v44 = vpop.permute.xlu0 %479  ;;  %v4714_v43 = vld [vmem:[#allocation2 + $0x81] sm:$0xff] }
  0xa5   :  { %v4551_v45 = vpop.permute.xlu1 %475 }
  0xa6   :  { %6964 = vst [vmem:[#allocation10_spill] sm:$0xff] %v4551_v45  ;;  %v379_v45 = vld [vmem:[#allocation2 + $0x42] sm:$0xff] }
  0xa9   :  { %643 = vrot.lane.b32.xlu2 %v4452_v11, %s4064_s6  ;;  %v324_v11 = vld [vmem:[#allocation2 + $0x18] sm:$0xff] }
  0xaa   :  { %645 = vrot.lane.b32.xlu0 %v4454_v12, %s4064_s6 }
  0xab   :  { %641 = vrot.lane.b32.xlu1 %v4456_v13, %s4064_s6  ;;  %v4571_v53 = vpop.permute.xlu2 %551 }
  0xac   :  { %v4573_v54 = vpop.permute.xlu0 %485 }
  0xad   :  { %v4576_v55 = vpop.permute.xlu1 %481 }
  0xb1   :  { %649 = vrot.lane.b32.xlu2 %v4466_v15, %s4064_s6 }
  0xb2   :  { %651 = vrot.lane.b32.xlu0 %v4468_v16, %s4064_s6  ;;  %v328_v16 = vld [vmem:[#allocation2 + $0x38] sm:$0xff] }
  0xb3   :  { %647 = vrot.lane.b32.xlu1 %v4470_v17, %s4064_s6  ;;  %v4584_v56 = vpop.permute.xlu2 %557  ;;  %v329_v17 = vld [vmem:[#allocation2 + $0x40] sm:$0xff] }
  0xb4   :  { %v4586_v57 = vpop.permute.xlu0 %491 }
  0xb5   :  { %6965 = vst [vmem:[#allocation11_spill] sm:$0xff] %v4586_v57  ;;  %v4588_v58 = vpop.permute.xlu1 %487  ;;  %v1392_v57 = vld [vmem:[%s6940_s3 + $0x48] sm:$0xff] }
  0xb6   :  { %6966 = vst [vmem:[#allocation12_spill] sm:$0xff] %v4588_v58  ;;  %v339_v58 = vld [vmem:[#allocation2 + $0x90] sm:$0xff] }
  0xb9   :  { %655 = vrot.lane.b32.xlu2 %v4480_v19, %s4064_s6  ;;  %v327_v19 = vld [vmem:[#allocation2 + $0x30] sm:$0xff] }
  0xba   :  { %657 = vrot.lane.b32.xlu0 %v4482_v20, %s4064_s6 }
  0xbb   :  { %653 = vrot.lane.b32.xlu1 %v4484_v21, %s4064_s6  ;;  %v4596_v59 = vpop.permute.xlu2 %563 }
  0xbc   :  { %v4598_v60 = vpop.permute.xlu0 %497 }
  0xbd   :  { %6967 = vst [vmem:[#allocation13_spill] sm:$0xff] %v4598_v60  ;;  %v4600_v61 = vpop.permute.xlu1 %493  ;;  %v403_v60 = vld [vmem:[#allocation2 + $0x3b] sm:$0xff] }
  0xbe   :  { %6968 = vst [vmem:[#allocation14_spill] sm:$0xff] %v4600_v61 }
  0xc1   :  { %661 = vrot.lane.b32.xlu2 %v4496_v24, %s4064_s6 }
  0xc2   :  { %663 = vrot.lane.b32.xlu0 %v4498_v25, %s4064_s6  ;;  %v348_v25 = vld [vmem:[#allocation2 + $0x11] sm:$0xff] }
  0xc3   :  { %659 = vrot.lane.b32.xlu1 %v4500_v26, %s4064_s6  ;;  %v4608_v62 = vpop.permute.xlu2 %569  ;;  %v349_v26 = vld [vmem:[#allocation2 + $0x19] sm:$0xff] }
  0xc4   :  { %6969 = vst [vmem:[#allocation15_spill] sm:$0xff] %v4608_v62  ;;  %v4610_v63 = vpop.permute.xlu0 %553  ;;  %v356_v62 = vld [vmem:[#allocation2 + $0x51] sm:$0xff] }
  0xc5   :  { %v4612_v0 = vpop.permute.xlu1 %549 }
  0xc9   :  { %667 = vrot.lane.b32.xlu2 %v319_v30, %s4064_s6  ;;  %v330_v30 = vld [vmem:[#allocation2 + $0x48] sm:$0xff] }
  0xca   :  { %669 = vrot.lane.b32.xlu0 %v320_v31, %s4064_s6 }
  0xcb   :  { %665 = vrot.lane.b32.xlu1 %v318_v32, %s4064_s6  ;;  %v4617_v1 = vpop.permute.xlu2 %575 }
  0xcc   :  { %6970 = vst [vmem:[#allocation16_spill] sm:$0xff] %v4617_v1  ;;  %v4619_v2 = vpop.permute.xlu0 %559  ;;  %v363_v1 = vld [vmem:[#allocation2 + $0x89] sm:$0xff] }
  0xcd   :  { %v4621_v3 = vpop.permute.xlu1 %555 }
  0xd1   :  { %673 = vrot.lane.b32.xlu2 %v322_v4, %s4064_s6  ;;  %v350_v4 = vld [vmem:[#allocation2 + $0x21] sm:$0xff] }
  0xd2   :  { %725 = vrot.lane.b32.xlu0 %v323_v5, %s4065_s0 }
  0xd3   :  { %671 = vrot.lane.b32.xlu1 %v4523_v36, %s4064_s6  ;;  %v4627_v6 = vpop.permute.xlu2 %581 }
  0xd4   :  { %v4629_v7 = vpop.permute.xlu0 %565 }
  0xd5   :  { %v4631_v8 = vpop.permute.xlu1 %561 }
  0xd9   :  { %729 = vrot.lane.b32.xlu2 %v325_v9, %s4065_s0 }
  0xda   :  { %731 = vrot.lane.b32.xlu0 %v326_v10, %s4065_s0 }
  0xdb   :  { %727 = vrot.lane.b32.xlu1 %v324_v11, %s4065_s0  ;;  %v4636_v12 = vpop.permute.xlu2 %587  ;;  %v351_v11 = vld [vmem:[#allocation2 + $0x29] sm:$0xff] }
  0xdc   :  { %6971 = vst [vmem:[#allocation17_spill] sm:$0xff] %v4636_v12  ;;  %v4638_v13 = vpop.permute.xlu0 %571 }
  0xdd   :  { %6972 = vst [vmem:[#allocation18_spill] sm:$0xff] %v4638_v13  ;;  %v4640_v15 = vpop.permute.xlu1 %567  ;;  %v355_v13 = vld [vmem:[#allocation2 + $0x49] sm:$0xff] }
  0xde   :  { %6973 = vst [vmem:[#allocation19_spill] sm:$0xff] %v4640_v15 }
  0xe1   :  { %735 = vrot.lane.b32.xlu2 %v328_v16, %s4065_s0  ;;  %v376_v16 = vld [vmem:[#allocation2 + $0x2a] sm:$0xff] }
  0xe2   :  { %737 = vrot.lane.b32.xlu0 %v329_v17, %s4065_s0 }
  0xe3   :  { %733 = vrot.lane.b32.xlu1 %v327_v19, %s4065_s0  ;;  %v4645_v20 = vpop.permute.xlu2 %593 }
  0xe4   :  { %6974 = vst [vmem:[#allocation20_spill] sm:$0xff] %v4645_v20  ;;  %v4647_v21 = vpop.permute.xlu0 %577  ;;  %v337_v20 = vld [vmem:[#allocation2 + $0x80] sm:$0xff] }
  0xe5   :  { %v4649_v24 = vpop.permute.xlu1 %573 }
  0xe6   :  { %6975 = vst [vmem:[#allocation21_spill] sm:$0xff] %v4649_v24 }
  0xe9   :  { %825 = vrot.lane.b32.xlu2 %v348_v25, %s4066_s16 }
  0xea   :  { %901 = vrot.lane.b32.xlu0 %v349_v26, %s4067_s17 }
  0xeb   :  { %739 = vrot.lane.b32.xlu1 %v330_v30, %s4065_s0  ;;  %v4654_v31 = vpop.permute.xlu2 %625  ;;  %v401_v30 = vld [vmem:[#allocation2 + $0x2b] sm:$0xff] }
  0xec   :  { %v4656_v32 = vpop.permute.xlu0 %583 }
  0xed   :  { %v4658_v36 = vpop.permute.xlu1 %579 }
  0xf1   :  { %1101 = vrot.lane.b32.xlu2 %v399_v46, %s4068_s18 }
  0xf2   :  { %827 = vrot.lane.b32.xlu0 %v349_v26, %s4066_s16  ;;  %v352_v26 = vld [vmem:[#allocation2 + $0x31] sm:$0xff] }
  0xf3   :  { %1001 = vrot.lane.b32.xlu1 %v374_v47, %s4069_s19  ;;  %v4663_v48 = vpop.permute.xlu2 %631 }
  0xf4   :  { %v4665_v49 = vpop.permute.xlu0 %589 }
  0xf5   :  { %6976 = vst [vmem:[#allocation22_spill] sm:$0xff] %v4665_v49  ;;  %v4667_v50 = vpop.permute.xlu1 %585 }
  0xf6   :  { %6977 = vst [vmem:[#allocation23_spill] sm:$0xff] %v4667_v50 }
  0xf9   :  { %1003 = vrot.lane.b32.xlu2 %v375_v51, %s4069_s19 }
  0xfa   :  { %1103 = vrot.lane.b32.xlu0 %v400_v52, %s4068_s18  ;;  %v402_v52 = vld [vmem:[#allocation2 + $0x33] sm:$0xff] }
  0xfb   :  { %903 = vrot.lane.b32.xlu1 %v350_v4, %s4067_s17  ;;  %v4672_v5 = vpop.permute.xlu2 %637 }
  0xfc   :  { %v4674_v9 = vpop.permute.xlu0 %595 }
  0xfd   :  { %6978 = vst [vmem:[#allocation24_spill] sm:$0xff] %v4674_v9  ;;  %v4676_v10 = vpop.permute.xlu1 %591  ;;  %v353_v9 = vld [vmem:[#allocation2 + $0x39] sm:$0xff] }
  0xfe   :  { %6979 = vst [vmem:[#allocation25_spill] sm:$0xff] %v4676_v10  ;;  %v413_v10 = vld [vmem:[#allocation2 + $0x8b] sm:$0xff] }
 0x101   :  { %905 = vrot.lane.b32.xlu2 %v351_v11, %s4067_s17 }
 0x102   :  { %1005 = vrot.lane.b32.xlu0 %v376_v16, %s4069_s19 }
 0x103   :  { %829 = vrot.lane.b32.xlu1 %v350_v4, %s4066_s16  ;;  %v4681_v17 = vpop.permute.xlu2 %643  ;;  %v377_v4 = vld [vmem:[#allocation2 + $0x32] sm:$0xff] }
 0x104   :  { %6980 = vst [vmem:[#allocation26_spill] sm:$0xff] %v4681_v17  ;;  %v4683_v19 = vpop.permute.xlu0 %627  ;;  %v406_v17 = vld [vmem:[#allocation2 + $0x53] sm:$0xff] }
 0x105   :  { %v4685_v25 = vpop.permute.xlu1 %597 }
 0x106   :  { %6981 = vst [vmem:[#allocation27_spill] sm:$0xff] %v4685_v25 }
 0x109   :  { %831 = vrot.lane.b32.xlu2 %v351_v11, %s4066_s16 }
 0x10a   :  { %907 = vrot.lane.b32.xlu0 %v352_v26, %s4067_s17 }
 0x10b   :  { %1105 = vrot.lane.b32.xlu1 %v401_v30, %s4068_s18  ;;  %v4690_v46 = vpop.permute.xlu2 %649  ;;  %v378_v30 = vld [vmem:[#allocation2 + $0x3a] sm:$0xff] }
 0x10c   :  { %6982 = vst [vmem:[#allocation28_spill] sm:$0xff] %v4690_v46  ;;  %v4692_v47 = vpop.permute.xlu0 %633  ;;  %v354_v46 = vld [vmem:[#allocation2 + $0x41] sm:$0xff] }
 0x10d   :  { %v4694_v51 = vpop.permute.xlu1 %629 }
 0x111   :  { %1107 = vrot.lane.b32.xlu2 %v402_v52, %s4068_s18 }
 0x112   :  { %833 = vrot.lane.b32.xlu0 %v352_v26, %s4066_s16 }
 0x113   :  { %1007 = vrot.lane.b32.xlu1 %v377_v4, %s4069_s19  ;;  %v4699_v16 = vpop.permute.xlu2 %655 }
 0x114   :  { %v4701_v11 = vpop.permute.xlu0 %639 }
 0x115   :  { %v4703_v25 = vpop.permute.xlu1 %635 }
 0x119   :  { %1009 = vrot.lane.b32.xlu2 %v378_v30, %s4069_s19 }
 0x11a   :  { %1109 = vrot.lane.b32.xlu0 %v403_v60, %s4068_s18 }
 0x11b   :  { %909 = vrot.lane.b32.xlu1 %v353_v9, %s4067_s17  ;;  %v4708_v52 = vpop.permute.xlu2 %661 }
 0x11c   :  { %6983 = vst [vmem:[#allocation29_spill] sm:$0xff] %v4708_v52  ;;  %v4710_v26 = vpop.permute.xlu0 %645  ;;  %v390_v52 = vld [vmem:[#allocation2 + $0x9a] sm:$0xff] }
 0x11d   :  { %6984 = vst [vmem:[#allocation30_spill] sm:$0xff] %v4710_v26  ;;  %v4712_v4 = vpop.permute.xlu1 %641 }
 0x121   :  { %835 = vrot.lane.b32.xlu2 %v353_v9, %s4066_s16 }
 0x122   :  { %853 = vrot.lane.b32.xlu0 %v4714_v43, %s4066_s16 }
 0x123   :  { %753 = vrot.lane.b32.xlu1 %v337_v20, %s4065_s0  ;;  %v4720_v30 = vpop.permute.xlu2 %667 }
 0x124   :  { %6985 = vst [vmem:[#allocation31_spill] sm:$0xff] %v4720_v30  ;;  %v4722_v60 = vpop.permute.xlu0 %651  ;;  %v1393_v30 = vld [vmem:[%s6940_s3 + $0x50] sm:$0xff] }
 0x125   :  { %6986 = vst [vmem:[#allocation32_spill] sm:$0xff] %v4722_v60  ;;  %v4724_v61 = vpop.permute.xlu1 %647  ;;  %v1394_v60 = vld [vmem:[%s6940_s3 + $0x58] sm:$0x3] }
 0x126   :  { %6987 = vst [vmem:[#allocation33_spill] sm:$0xff] %v4724_v61  ;;  %3922 = vmatpush.msk.msra.mxu0 %vm1471_vm1, %v1394_v60  ;;  %3977 = vmatpush.msk.msra.mxu3 %vm1471_vm1, %v1394_v60 }
 0x128   :  { %1480 = vmatpush.msra.mxu0 %v1393_v30  ;;  %3978 = vmatpush.msra.mxu3 %v1393_v30  ;;  %v338_v30 = vld [vmem:[#allocation2 + $0x88] sm:$0xff] }
 0x129   :  { %929 = vrot.lane.b32.xlu2 %v363_v1, %s4067_s17 }
 0x12a   :  { %1011 = vrot.lane.b32.xlu0 %v379_v45, %s4069_s19  ;;  %v388_v45 = vld [vmem:[#allocation2 + $0x8a] sm:$0xff]  ;;  %1481 = vmatpush.msra.mxu0 %v1392_v57 }
 0x12b   :  { %911 = vrot.lane.b32.xlu1 %v354_v46, %s4067_s17  ;;  %v4729_v9 = vpop.permute.xlu2 %673  ;;  %3979 = vmatpush.msra.mxu3 %v1392_v57 }
 0x12c   :  { %6988 = vst [vmem:[#allocation34_spill] sm:$0xff] %v4729_v9  ;;  %v4731_v24 = vpop.permute.xlu0 %657 }
 0x12d   :  { %v4733_v20 = vpop.permute.xlu1 %653 }
 0x131   :  { %1111 = vrot.lane.b32.xlu2 %v404_v41, %s4068_s18  ;;  %v1391_v41 = vld [vmem:[%s6940_s3 + $0x40] sm:$0xff] }
 0x132   :  { %1129 = vrot.lane.b32.xlu0 %v413_v10, %s4068_s18  ;;  %v1390_v10 = vld [vmem:[%s6940_s3 + $0x38] sm:$0xff]  ;;  %1482 = vmatpush.msra.mxu0 %v1391_v41 }
 0x133   :  { %1029 = vrot.lane.b32.xlu1 %v388_v45, %s4069_s19  ;;  %v4746_v9 = vpop.permute.xlu2 %729  ;;  %3980 = vmatpush.msra.mxu3 %v1391_v41  ;;  %v1389_v45 = vld [vmem:[%s6940_s3 + $0x30] sm:$0xff]  ;;  %v1388_v41 = vld [vmem:[%s6940_s3 + $0x28] sm:$0xff] }
 0x134   :  { %v4751_v49 = vpop.permute.xlu0 %663  ;;  %1483 = vmatpush.msra.mxu0 %v1390_v10 }
 0x135   :  { %6989 = vst [vmem:[#allocation35_spill] sm:$0xff] %v4751_v49  ;;  %v4753_v60 = vpop.permute.xlu1 %659  ;;  %3981 = vmatpush.msra.mxu3 %v1390_v10  ;;  %v1386_v10 = vld [vmem:[%s6940_s3 + $0x18] sm:$0xff]  ;;  %v1383_v49 = vld [vmem:[%s6940_s3] sm:$0xff] }
 0x136   :  { %1484 = vmatpush.msra.mxu0 %v1389_v45 }
 0x137   :  { %3982 = vmatpush.msra.mxu3 %v1389_v45  ;;  %v1385_v45 = vld [vmem:[%s6940_s3 + $0x10] sm:$0xff] }
 0x138   :  { %1485 = vmatpush.msra.mxu0 %v1388_v41 }
 0x139   :  { %837 = vrot.lane.b32.xlu2 %v354_v46, %s4066_s16  ;;  %v364_v46 = vld [vmem:[#allocation2 + $0x91] sm:$0xff]  ;;  %3983 = vmatpush.msra.mxu3 %v1388_v41  ;;  %v1384_v41 = vld [vmem:[%s6940_s3 + $0x8] sm:$0xff] }
 0x13a   :  { %855 = vrot.lane.b32.xlu0 %v363_v1, %s4066_s16  ;;  %v1387_v1 = vld [vmem:[%s6940_s3 + $0x20] sm:$0xff] }
 0x13b   :  { %755 = vrot.lane.b32.xlu1 %v338_v30, %s4065_s0  ;;  %v4767_v57 = vpop.permute.xlu2 %735  ;;  %v380_v30 = vld [vmem:[#allocation2 + $0x4a] sm:$0xff]  ;;  %1486 = vmatpush.msra.mxu0 %v1387_v1 }
 0x13c   :  { %v4772_v40 = vpop.permute.xlu0 %669  ;;  %3984 = vmatpush.msra.mxu3 %v1387_v1  ;;  %v405_v1 = vld [vmem:[#allocation2 + $0x4b] sm:$0xff] }
 0x13d   :  { %6990 = vst [vmem:[#allocation36_spill] sm:$0xff] %v4772_v40  ;;  %v4774_v61 = vpop.permute.xlu1 %665  ;;  %1487 = vmatpush.msra.mxu0 %v1386_v10 }
 0x13e   :  { %6991 = vst [vmem:[#allocation37_spill] sm:$0xff] %v4774_v61  ;;  %3985 = vmatpush.msra.mxu3 %v1386_v10  ;;  %v414_v10 = vld [vmem:[#allocation2 + $0x93] sm:$0xff] }
 0x13f   :  { %1488 = vmatpush.msra.mxu0 %v1385_v45 }
 0x140   :  { %3986 = vmatpush.msra.mxu3 %v1385_v45 }
 0x141   :  { %931 = vrot.lane.b32.xlu2 %v364_v46, %s4067_s17  ;;  %1489 = vmatpush.msra.mxu0 %v1384_v41 }
 0x142   :  { %1013 = vrot.lane.b32.xlu0 %v380_v30, %s4069_s19  ;;  %3987 = vmatpush.msra.mxu3 %v1384_v41  ;;  %v389_v30 = vld [vmem:[#allocation2 + $0x92] sm:$0xff] }
 0x143   :  { %913 = vrot.lane.b32.xlu1 %v355_v13, %s4067_s17  ;;  %v826_v40 = vpop.permute.xlu2 %825  ;;  %1490 = vmatpush.msra.mxu0 %v1383_v49 }
 0x144   :  { %v726_v61 = vpop.permute.xlu0 %725  ;;  %3988 = vmatpush.msra.mxu3 %v1383_v49 }
 0x145   :  { %v4791_v27 = vpop.permute.xlu1 %671 }
 0x146   :  { %6992 = vst [vmem:[#allocation38_spill] sm:$0xff] %v4791_v27 }
 0x149   :  { %1113 = vrot.lane.b32.xlu2 %v405_v1, %s4068_s18  ;;  %v365_v1 = vld [vmem:[#allocation2 + $0x99] sm:$0xff] }
 0x14a   :  { %1131 = vrot.lane.b32.xlu0 %v414_v10, %s4068_s18  ;;  %v381_v10 = vld [vmem:[#allocation2 + $0x52] sm:$0xff] }
 0x14b   :  { %1031 = vrot.lane.b32.xlu1 %v389_v30, %s4069_s19  ;;  %v1102_v45 = vpop.permute.xlu2 %1101  ;;  %v247_v30 = vld [vmem:[#allocation2 + $0x5] sm:$0xff] }
 0x14c   :  { %v4799_v12 = vpop.permute.xlu0 %731  ;;  %v1176_v42 = vsel %vm217_vm0, %v247_v30, %v4494_v23 }
 0x14d   :  { %v728_v27 = vpop.permute.xlu1 %727  ;;  %v1202_v15 = vsel %vm1201_vm3, %v1176_v42, %v4612_v0 }
 0x151   :  { %839 = vrot.lane.b32.xlu2 %v355_v13, %s4066_s16 }
 0x152   :  { %857 = vrot.lane.b32.xlu0 %v364_v46, %s4066_s16 }
 0x153   :  { %757 = vrot.lane.b32.xlu1 %v339_v58, %s4065_s0  ;;  %v1004_v41 = vpop.permute.xlu2 %1003 }
 0x154   :  { %v4804_v26 = vpop.permute.xlu0 %737 }
 0x155   :  { %v4806_v49 = vpop.permute.xlu1 %733 }
 0x159   :  { %933 = vrot.lane.b32.xlu2 %v365_v1, %s4067_s17 }
 0x15a   :  { %1015 = vrot.lane.b32.xlu0 %v381_v10, %s4069_s19  ;;  %v1228_v10 = vsel %vm1227_vm2, %v1202_v15, %v4654_v31 }
 0x15b   :  { %915 = vrot.lane.b32.xlu1 %v356_v62, %s4067_s17  ;;  %v4811_v13 = vpop.permute.xlu2 %905  ;;  %v1254_v50 = vsel %vm1253_vm4, %v1228_v10, %v726_v61  ;;  %v248_v61 = vld [vmem:[#allocation2 + $0xd] sm:$0xff] }
 0x15c   :  { %v902_v46 = vpop.permute.xlu0 %901  ;;  %v1280_v42 = vsel %vm1279_vm5, %v1254_v50, %v826_v40 }
 0x15d   :  { %v4813_v58 = vpop.permute.xlu1 %739  ;;  %v1306_v15 = vsel %vm1305_vm6, %v1280_v42, %v902_v46 }
 0x161   :  { %1115 = vrot.lane.b32.xlu2 %v406_v17, %s4068_s18  ;;  %v340_v17 = vld [vmem:[#allocation2 + $0x98] sm:$0xff] }
 0x162   :  { %1133 = vrot.lane.b32.xlu0 %v415_v38, %s4068_s18  ;;  %v331_v38 = vld [vmem:[#allocation2 + $0x50] sm:$0xff] }
 0x163   :  { %1033 = vrot.lane.b32.xlu1 %v390_v52, %s4069_s19  ;;  %v4825_v23 = vpop.permute.xlu2 %831  ;;  %v1177_v52 = vsel %vm217_vm0, %v248_v61, %v4510_v28  ;;  %v357_v61 = vld [vmem:[#allocation2 + $0x59] sm:$0xff] }
 0x164   :  { %v828_v0 = vpop.permute.xlu0 %827  ;;  %v1203_v40 = vsel %vm1201_vm3, %v1177_v52, %v4571_v53  ;;  %v366_v53 = vld [vmem:[#allocation2 + $0xa1] sm:$0xff] }
 0x165   :  { %v1002_v31 = vpop.permute.xlu1 %1001  ;;  %v1229_v50 = vsel %vm1227_vm2, %v1203_v40, %v4683_v19  ;;  %v391_v40 = vld [vmem:[#allocation2 + $0xa2] sm:$0xff] }
 0x166   :  { %v1332_v30 = vsel %vm1331_vm7, %v1306_v15, %v1002_v31 }
 0x167   :  { %v1358_v10 = vsel %vm1357_vm8, %v1332_v30, %v1102_v45  ;;  %v1255_v45 = vsel %vm1253_vm4, %v1229_v50, %v728_v27 }
 0x168   :  { %3923 = vmatmul.msk.f32.vlgmr.msra.gmra.mxu0 %vm1395_vm9, %v1358_v10  ;;  %v1281_v15 = vsel %vm1279_vm5, %v1255_v45, %v828_v0  ;;  %v407_v45 = vld [vmem:[#allocation2 + $0x5b] sm:$0xff] }
 0x169   :  { %759 = vrot.lane.b32.xlu2 %v340_v17, %s4065_s0  ;;  %v249_v17 = vld [vmem:[#allocation2 + $0x15] sm:$0xff] }
 0x16a   :  { %841 = vrot.lane.b32.xlu0 %v356_v62, %s4066_s16  ;;  %v1178_v27 = vsel %vm217_vm0, %v249_v17, %v4512_v29  ;;  %v416_v17 = vld [vmem:[#allocation2 + $0xa3] sm:$0xff] }
 0x16b   :  { %741 = vrot.lane.b32.xlu1 %v331_v38, %s4065_s0  ;;  %v1108_v46 = vpop.permute.xlu2 %1107  ;;  %v1204_v0 = vsel %vm1201_vm3, %v1178_v27, %v4610_v63 }
 0x16c   :  { %v1104_v42 = vpop.permute.xlu0 %1103  ;;  %v1230_v10 = vsel %vm1227_vm2, %v1204_v0, %v4694_v51 }
 0x16d   :  { %v904_v31 = vpop.permute.xlu1 %903  ;;  %v1256_v52 = vsel %vm1253_vm4, %v1230_v10, %v4746_v9 }
 0x16e   :  { %v1307_v28 = vsel %vm1305_vm6, %v1281_v15, %v904_v31 }
 0x16f   :  { %v1333_v30 = vsel %vm1331_vm7, %v1307_v28, %v1004_v41  ;;  %v332_v28 = vld [vmem:[#allocation2 + $0x58] sm:$0xff] }
 0x170   :  { %v1359_v62 = vsel %vm1357_vm8, %v1333_v30, %v1104_v42  ;;  %v382_v42 = vld [vmem:[#allocation2 + $0x5a] sm:$0xff] }
 0x171   :  { %3924 = vmatmul.msk.f32.gmra.mxu0 %vm1395_vm9, %v1359_v62  ;;  %917 = vrot.lane.b32.xlu2 %v357_v61, %s4067_s17  ;;  %v341_v30 = vld [vmem:[#allocation2 + $0xa0] sm:$0xff] }
 0x172   :  { %935 = vrot.lane.b32.xlu0 %v366_v53, %s4067_s17 }
 0x173   :  { %859 = vrot.lane.b32.xlu1 %v365_v1, %s4066_s16  ;;  %v1010_v19 = vpop.permute.xlu2 %1009  ;;  %v250_v1 = vld [vmem:[#allocation2 + $0x1d] sm:$0xff] }
 0x174   :  { %v1006_v41 = vpop.permute.xlu0 %1005 }
 0x175   :  { %v830_v38 = vpop.permute.xlu1 %829 }
 0x176   :  { %v1282_v50 = vsel %vm1279_vm5, %v1256_v52, %v830_v38  ;;  %v251_v52 = vld [vmem:[#allocation2 + $0x25] sm:$0xff] }
 0x177   :  { %v1308_v29 = vsel %vm1305_vm6, %v1282_v50, %v4811_v13  ;;  %v1179_v13 = vsel %vm217_vm0, %v250_v1, %v4521_v35  ;;  %v358_v50 = vld [vmem:[#allocation2 + $0x61] sm:$0xff] }
 0x178   :  { %v1334_v9 = vsel %vm1331_vm7, %v1308_v29, %v1006_v41  ;;  %v1205_v62 = vsel %vm1201_vm3, %v1179_v13, %v4621_v3  ;;  %v383_v1 = vld [vmem:[#allocation2 + $0x62] sm:$0xff] }
 0x179   :  { %1035 = vrot.lane.b32.xlu2 %v391_v40, %s4069_s19  ;;  %v1231_v27 = vsel %vm1227_vm2, %v1205_v62, %v4663_v48  ;;  %v333_v13 = vld [vmem:[#allocation2 + $0x60] sm:$0xff] }
 0x17a   :  { %1117 = vrot.lane.b32.xlu0 %v407_v45, %s4068_s18  ;;  %v1257_v0 = vsel %vm1253_vm4, %v1231_v27, %v4799_v12  ;;  %v1180_v12 = vsel %vm217_vm0, %v251_v52, %v4464_v14  ;;  %v261_v27 = vld [vmem:[#allocation2 + $0x75] sm:$0xff] }
 0x17b   :  { %1017 = vrot.lane.b32.xlu1 %v382_v42, %s4069_s19  ;;  %v4864_v63 = vpop.permute.xlu2 %835  ;;  %v1283_v35 = vsel %vm1279_vm5, %v1257_v0, %v4825_v23  ;;  %v1206_v23 = vsel %vm1201_vm3, %v1180_v12, %v4584_v56  ;;  %v342_v12 = vld [vmem:[#allocation2 + $0xa8] sm:$0xff] }
 0x17c   :  { %v908_v51 = vpop.permute.xlu0 %907  ;;  %v1232_v45 = vsel %vm1227_vm2, %v1206_v23, %v4692_v47 }
 0x17d   :  { %v1106_v15 = vpop.permute.xlu1 %1105  ;;  %v1309_v3 = vsel %vm1305_vm6, %v1283_v35, %v908_v51 }
 0x17e   :  { %v1360_v31 = vsel %vm1357_vm8, %v1334_v9, %v1106_v15  ;;  %v392_v9 = vld [vmem:[#allocation2 + $0xaa] sm:$0xff] }
 0x17f   :  { %3925 = vmatmul.msk.f32.gmra.mxu0 %vm1395_vm9, %v1360_v31  ;;  %v367_v31 = vld [vmem:[#allocation2 + $0xa9] sm:$0xff] }
 0x181   :  { %743 = vrot.lane.b32.xlu2 %v332_v28, %s4065_s0  ;;  %v252_v28 = vld [vmem:[#allocation2 + $0x2d] sm:$0xff] }
 0x182   :  { %761 = vrot.lane.b32.xlu0 %v341_v30, %s4065_s0  ;;  %v417_v30 = vld [vmem:[#allocation2 + $0xab] sm:$0xff] }
 0x183   :  { %1135 = vrot.lane.b32.xlu1 %v416_v17, %s4068_s18  ;;  %v4880_v41 = vpop.permute.xlu2 %929  ;;  %v1181_v17 = vsel %vm217_vm0, %v252_v28, %v4478_v18 }
 0x184   :  { %v834_v10 = vpop.permute.xlu0 %833  ;;  %v1207_v62 = vsel %vm1201_vm3, %v1181_v17, %v4619_v2  ;;  %v1190_v2 = vsel %vm217_vm0, %v261_v27, %v4517_v33  ;;  %v343_v27 = vld [vmem:[#allocation2 + $0xb0] sm:$0xff] }
 0x185   :  { %v1008_v38 = vpop.permute.xlu1 %1007  ;;  %v1233_v0 = vsel %vm1227_vm2, %v1207_v62, %v4703_v25  ;;  %v1216_v25 = vsel %vm1201_vm3, %v1190_v2, %v4647_v21 }
 0x186   :  { %v1335_v40 = vsel %vm1331_vm7, %v1309_v3, %v1008_v38 }
 0x187   :  { %v1361_v48 = vsel %vm1357_vm8, %v1335_v40, %v1108_v46  ;;  %v1258_v46 = vsel %vm1253_vm4, %v1232_v45, %v4806_v49 }
 0x188   :  { %3926 = vmatmul.msk.f32.gmra.mxu0 %vm1395_vm9, %v1361_v48  ;;  %v1284_v51 = vsel %vm1279_vm5, %v1258_v46, %v834_v10  ;;  %v1259_v10 = vsel %vm1253_vm4, %v1233_v0, %v4767_v57  ;;  %v1242_v48 = vsel %vm1227_vm2, %v1216_v25, %v4733_v20  ;;  %v368_v46 = vld [vmem:[#allocation2 + $0xb1] sm:$0xff] }
 0x189   :  { %861 = vrot.lane.b32.xlu2 %v366_v53, %s4066_s16  ;;  %v1285_v18 = vsel %vm1279_vm5, %v1259_v10, %v4864_v63 }
 0x18a   :  { %919 = vrot.lane.b32.xlu0 %v358_v50, %s4067_s17 }
 0x18b   :  { %843 = vrot.lane.b32.xlu1 %v357_v61, %s4066_s16  ;;  %v1112_v42 = vpop.permute.xlu2 %1111 }
 0x18c   :  { %v1110_v29 = vpop.permute.xlu0 %1109 }
 0x18d   :  { %v910_v14 = vpop.permute.xlu1 %909 }
 0x18e   :  { %v1310_v53 = vsel %vm1305_vm6, %v1284_v51, %v910_v14  ;;  %v359_v51 = vld [vmem:[#allocation2 + $0x69] sm:$0xff] }
 0x18f   :  { %v1336_v56 = vsel %vm1331_vm7, %v1310_v53, %v1010_v19  ;;  %v408_v19 = vld [vmem:[#allocation2 + $0x63] sm:$0xff] }
 0x190   :  { %v1362_v15 = vsel %vm1357_vm8, %v1336_v56, %v1110_v29  ;;  %v409_v56 = vld [vmem:[#allocation2 + $0x6b] sm:$0xff] }
 0x191   :  { %3927 = vmatmul.msk.f32.gmra.mxu0 %vm1395_vm9, %v1362_v15  ;;  %1019 = vrot.lane.b32.xlu2 %v383_v1, %s4069_s19  ;;  %v393_v15 = vld [vmem:[#allocation2 + $0xb2] sm:$0xff] }
 0x192   :  { %1037 = vrot.lane.b32.xlu0 %v392_v9, %s4069_s19  ;;  %v418_v9 = vld [vmem:[#allocation2 + $0xb3] sm:$0xff] }
 0x193   :  { %937 = vrot.lane.b32.xlu1 %v367_v31, %s4067_s17  ;;  %v4907_v47 = vpop.permute.xlu2 %837 }
 0x194   :  { %v854_v49 = vpop.permute.xlu0 %853 }
 0x195   :  { %v754_v61 = vpop.permute.xlu1 %753 }
 0x196   :  { %v1268_v23 = vsel %vm1253_vm4, %v1242_v48, %v754_v61  ;;  %v262_v61 = vld [vmem:[#allocation2 + $0x7d] sm:$0xff] }
 0x197   :  { %v1294_v33 = vsel %vm1279_vm5, %v1268_v23, %v854_v49  ;;  %v254_v23 = vld [vmem:[#allocation2 + $0x3d] sm:$0xff] }
 0x198   :  { %v1320_v20 = vsel %vm1305_vm6, %v1294_v33, %v4880_v41  ;;  %v253_v41 = vld [vmem:[#allocation2 + $0x35] sm:$0xff] }
 0x199   :  { %1137 = vrot.lane.b32.xlu2 %v417_v30, %s4068_s18  ;;  %v410_v33 = vld [vmem:[#allocation2 + $0x73] sm:$0xff] }
 0x19a   :  { %745 = vrot.lane.b32.xlu0 %v333_v13, %s4065_s0 }
 0x19b   :  { %1119 = vrot.lane.b32.xlu1 %v408_v19, %s4068_s18  ;;  %v4918_v35 = vpop.permute.xlu2 %931 }
 0x19c   :  { %v1012_v3 = vpop.permute.xlu0 %1011 }
 0x19d   :  { %v912_v38 = vpop.permute.xlu1 %911 }
 0x19e   :  { %v1311_v52 = vsel %vm1305_vm6, %v1285_v18, %v912_v38 }
 0x19f   :  { %v1337_v40 = vsel %vm1331_vm7, %v1311_v52, %v1012_v3  ;;  %v360_v52 = vld [vmem:[#allocation2 + $0x71] sm:$0xff] }
 0x1a0   :  { %v1363_v57 = vsel %vm1357_vm8, %v1337_v40, %v1112_v42  ;;  %v369_v40 = vld [vmem:[#allocation2 + $0xb9] sm:$0xff] }
 0x1a1   :  { %845 = vrot.lane.b32.xlu2 %v358_v50, %s4066_s16  ;;  %3928 = vmatmul.msk.f32.gmra.mxu0 %vm1395_vm9, %v1363_v57  ;;  %v384_v50 = vld [vmem:[#allocation2 + $0x6a] sm:$0xff] }
 0x1a2   :  { %863 = vrot.lane.b32.xlu0 %v367_v31, %s4066_s16  ;;  %v1182_v31 = vsel %vm217_vm0, %v253_v41, %v4519_v34 }
 0x1a3   :  { %763 = vrot.lane.b32.xlu1 %v342_v12, %s4065_s0  ;;  %v1114_v21 = vpop.permute.xlu2 %1113  ;;  %v1208_v49 = vsel %vm1201_vm3, %v1182_v31, %v4631_v8  ;;  %v1191_v8 = vsel %vm217_vm0, %v262_v61, %v4549_v44 }
 0x1a4   :  { %v1130_v63 = vpop.permute.xlu0 %1129  ;;  %v1234_v28 = vsel %vm1227_vm2, %v1208_v49, %v4672_v5  ;;  %v1217_v5 = vsel %vm1201_vm3, %v1191_v8, %v4658_v36  ;;  %v386_v8 = vld [vmem:[#allocation2 + $0x7a] sm:$0xff] }
 0x1a5   :  { %v1030_v45 = vpop.permute.xlu1 %1029  ;;  %v1260_v13 = vsel %vm1253_vm4, %v1234_v28, %v4804_v26  ;;  %v1243_v10 = vsel %vm1227_vm2, %v1217_v5, %v4699_v16  ;;  %v334_v26 = vld [vmem:[#allocation2 + $0x68] sm:$0xff] }
 0x1a6   :  { %v1346_v42 = vsel %vm1331_vm7, %v1320_v20, %v1030_v45  ;;  %v1286_v34 = vsel %vm1279_vm5, %v1260_v13, %v4907_v47  ;;  %v263_v20 = vld [vmem:[#allocation2 + $0x85] sm:$0xff]  ;;  %v361_v13 = vld [vmem:[#allocation2 + $0x79] sm:$0xff] }
 0x1a7   :  { %v1372_v29 = vsel %vm1357_vm8, %v1346_v42, %v1130_v63  ;;  %v1183_v63 = vsel %vm217_vm0, %v254_v23, %v4533_v39 }
 0x1a8   :  { %3937 = vmatmul.msk.f32.vlgmr.msra.gmra.mxu3 %vm1395_vm9, %v1372_v29  ;;  %v1209_v45 = vsel %vm1201_vm3, %v1183_v63, %v4596_v59  ;;  %v1192_v59 = vsel %vm217_vm0, %v263_v20, %v4576_v55  ;;  %v371_v20 = vld [vmem:[#allocation2 + $0xc9] sm:$0xff] }
 0x1a9   :  { %939 = vrot.lane.b32.xlu2 %v368_v46, %s4067_s17  ;;  %v1235_v42 = vsel %vm1227_vm2, %v1209_v45, %v4701_v11  ;;  %v1218_v11 = vsel %vm1201_vm3, %v1192_v59, %v4627_v6 }
 0x1aa   :  { %1021 = vrot.lane.b32.xlu0 %v384_v50, %s4069_s19  ;;  %v1261_v29 = vsel %vm1253_vm4, %v1235_v42, %v4813_v58  ;;  %v1244_v58 = vsel %vm1227_vm2, %v1218_v11, %v4731_v24  ;;  %v387_v42 = vld [vmem:[#allocation2 + $0x82] sm:$0xff] }
 0x1ab   :  { %921 = vrot.lane.b32.xlu1 %v359_v51, %s4067_s17  ;;  %v4947_v14 = vpop.permute.xlu2 %839 }
 0x1ac   :  { %v856_v53 = vpop.permute.xlu0 %855  ;;  %v1287_v39 = vsel %vm1279_vm5, %v1261_v29, %v4947_v14  ;;  %v265_v29 = vld [vmem:[#allocation2 + $0x95] sm:$0xff] }
 0x1ad   :  { %v756_v1 = vpop.permute.xlu1 %755  ;;  %v1194_v59 = vsel %vm217_vm0, %v265_v29, %v4573_v54 }
 0x1ae   :  { %v1269_v47 = vsel %vm1253_vm4, %v1243_v10, %v756_v1  ;;  %v335_v1 = vld [vmem:[#allocation2 + $0x70] sm:$0xff] }
 0x1af   :  { %v1295_v44 = vsel %vm1279_vm5, %v1269_v47, %v856_v53 }
 0x1b0   :  { %v1321_v16 = vsel %vm1305_vm6, %v1295_v44, %v4918_v35  ;;  %v394_v35 = vld [vmem:[#allocation2 + $0xba] sm:$0xff] }
 0x1b1   :  { %1121 = vrot.lane.b32.xlu2 %v409_v56, %s4068_s18  ;;  %v344_v56 = vld [vmem:[#allocation2 + $0xb8] sm:$0xff] }
 0x1b2   :  { %1139 = vrot.lane.b32.xlu0 %v418_v9, %s4068_s18  ;;  %v419_v9 = vld [vmem:[#allocation2 + $0xbb] sm:$0xff] }
 0x1b3   :  { %1039 = vrot.lane.b32.xlu1 %v393_v15, %s4069_s19  ;;  %v4958_v30 = vpop.permute.xlu2 %933  ;;  %v336_v44 = vld [vmem:[#allocation2 + $0x78] sm:$0xff] }
 0x1b4   :  { %v1014_v19 = vpop.permute.xlu0 %1013 }
 0x1b5   :  { %v914_v17 = vpop.permute.xlu1 %913 }
 0x1b6   :  { %v1312_v62 = vsel %vm1305_vm6, %v1286_v34, %v914_v17 }
 0x1b7   :  { %v1338_v0 = vsel %vm1331_vm7, %v1312_v62, %v1014_v19  ;;  %v395_v62 = vld [vmem:[#allocation2 + $0xc2] sm:$0xff] }
 0x1b8   :  { %v1364_v3 = vsel %vm1357_vm8, %v1338_v0, %v1114_v21  ;;  %v385_v21 = vld [vmem:[#allocation2 + $0x72] sm:$0xff] }
 0x1b9   :  { %765 = vrot.lane.b32.xlu2 %v343_v27, %s4065_s0  ;;  %3929 = vmatmul.msk.f32.gmra.mxu0 %vm1395_vm9, %v1364_v3  ;;  %v255_v27 = vld [vmem:[#allocation2 + $0x45] sm:$0xff] }
 0x1ba   :  { %847 = vrot.lane.b32.xlu0 %v359_v51, %s4066_s16  ;;  %v420_v3 = vld [vmem:[#allocation2 + $0xc3] sm:$0xff] }
 0x1bb   :  { %747 = vrot.lane.b32.xlu1 %v334_v26, %s4065_s0  ;;  %v1116_v36 = vpop.permute.xlu2 %1115  ;;  %v1184_v26 = vsel %vm217_vm0, %v255_v27, %v4492_v22 }
 0x1bc   :  { %v1132_v18 = vpop.permute.xlu0 %1131  ;;  %v1210_v47 = vsel %vm1201_vm3, %v1184_v26, %v4629_v7 }
 0x1bd   :  { %v1032_v38 = vpop.permute.xlu1 %1031 }
 0x1be   :  { %v1347_v2 = vsel %vm1331_vm7, %v1321_v16, %v1032_v38  ;;  %v264_v16 = vld [vmem:[#allocation2 + $0x8d] sm:$0xff] }
 0x1bf   :  { %v1373_v25 = vsel %vm1357_vm8, %v1347_v2, %v1132_v18  ;;  %v411_v18 = vld [vmem:[#allocation2 + $0x7b] sm:$0xff]  ;;  %v1193_v7 = vsel %vm217_vm0, %v264_v16, %v4529_v37 }
 0x1c0   :  { %3938 = vmatmul.msk.f32.gmra.mxu3 %vm1395_vm9, %v1373_v25 }
 0x1c1   :  { %923 = vrot.lane.b32.xlu2 %v360_v52, %s4067_s17 }
 0x1c2   :  { %941 = vrot.lane.b32.xlu0 %v369_v40, %s4067_s17 }
 0x1c3   :  { %865 = vrot.lane.b32.xlu1 %v368_v46, %s4066_s16  ;;  %v4987_v48 = vpop.permute.xlu2 %759 }
 0x1c4   :  { %v858_v12 = vpop.permute.xlu0 %857 }
 0x1c5   :  { %v758_v57 = vpop.permute.xlu1 %757 }
 0x1c6   :  { %v1270_v14 = vsel %vm1253_vm4, %v1244_v58, %v758_v57  ;;  %v6994_v58 = vld [vmem:[#allocation29_spill] sm:$0xff] }
 0x1c7   :  { %v1296_v55 = vsel %vm1279_vm5, %v1270_v14, %v858_v12 }
 0x1c8   :  { %v1322_v24 = vsel %vm1305_vm6, %v1296_v55, %v4958_v30  ;;  %v370_v30 = vld [vmem:[#allocation2 + $0xc1] sm:$0xff]  ;;  %v6995_v55 = vld [vmem:[#allocation5_spill] sm:$0xff] }
 0x1c9   :  { %1041 = vrot.lane.b32.xlu2 %v394_v35, %s4069_s19 }
 0x1ca   :  { %1123 = vrot.lane.b32.xlu0 %v410_v33, %s4068_s18  ;;  %v345_v33 = vld [vmem:[#allocation2 + $0xc0] sm:$0xff] }
 0x1cb   :  { %1023 = vrot.lane.b32.xlu1 %v385_v21, %s4069_s19  ;;  %v918_v46 = vpop.permute.xlu2 %917 }
 0x1cc   :  { %v1016_v50 = vpop.permute.xlu0 %1015 }
 0x1cd   :  { %v916_v51 = vpop.permute.xlu1 %915 }
 0x1ce   :  { %v1313_v53 = vsel %vm1305_vm6, %v1287_v39, %v916_v51  ;;  %v412_v51 = vld [vmem:[#allocation2 + $0x83] sm:$0xff] }
 0x1cf   :  { %v1339_v41 = vsel %vm1331_vm7, %v1313_v53, %v1016_v50  ;;  %v421_v53 = vld [vmem:[#allocation2 + $0xcb] sm:$0xff] }
 0x1d0   :  { %v1365_v15 = vsel %vm1357_vm8, %v1339_v41, %v1116_v36  ;;  %v1236_v36 = vsel %vm1227_vm2, %v1210_v47, %v4712_v4  ;;  %v396_v41 = vld [vmem:[#allocation2 + $0xca] sm:$0xff] }
 0x1d1   :  { %749 = vrot.lane.b32.xlu2 %v335_v1, %s4065_s0  ;;  %3930 = vmatmul.msk.f32.gmra.mxu0 %vm1395_vm9, %v1365_v15  ;;  %v6993_v1 = vld [vmem:[#allocation23_spill] sm:$0xff] }
 0x1d2   :  { %767 = vrot.lane.b32.xlu0 %v344_v56, %s4065_s0  ;;  %v1220_v11 = vsel %vm1201_vm3, %v1194_v59, %v6993_v1  ;;  %v4070_v56 = vmov 0   ;;  %v423_v59 = vld [vmem:[#allocation2 + $0xdb] sm:$0xff] }
 0x1d3   :  { %1141 = vrot.lane.b32.xlu1 %v419_v9, %s4068_s18  ;;  %v1036_v6 = vpop.permute.xlu2 %1035  ;;  %4014 = vset.pattern.permute.xlu2 %v4070_v56  ;;  %v256_v9 = vld [vmem:[#allocation2 + $0x4d] sm:$0xff] }
 0x1d4   :  { %v1134_v31 = vpop.permute.xlu0 %1133  ;;  %4015 = vset.pattern.permute.xlu0 %v4070_v56  ;;  %4016 = vset.pattern.permute.xlu1 %v4070_v56 }
 0x1d5   :  { %v1034_v49 = vpop.permute.xlu1 %1033 }
 0x1d6   :  { %v1348_v61 = vsel %vm1331_vm7, %v1322_v24, %v1034_v49  ;;  %v6996_v24 = vld [vmem:[#allocation19_spill] sm:$0xff] }
 0x1d7   :  { %v1374_v28 = vsel %vm1357_vm8, %v1348_v61, %v1134_v31 }
 0x1d8   :  { %3939 = vmatmul.msk.f32.gmra.mxu3 %vm1395_vm9, %v1374_v28 }
 0x1d9   :  { %867 = vrot.lane.b32.xlu2 %v369_v40, %s4066_s16  ;;  %v1219_v40 = vsel %vm1201_vm3, %v1193_v7, %v4656_v32  ;;  %v373_v7 = vld [vmem:[#allocation2 + $0xd9] sm:$0xff] }
 0x1da   :  { %925 = vrot.lane.b32.xlu0 %v361_v13, %s4067_s17  ;;  %v1245_v57 = vsel %vm1227_vm2, %v1219_v40, %v4753_v60  ;;  %v6999_v40 = vld [vmem:[#allocation15_spill] sm:$0xff] }
 0x1db   :  { %849 = vrot.lane.b32.xlu1 %v360_v52, %s4066_s16  ;;  %v5025_v19 = vpop.permute.xlu2 %743  ;;  %v1271_v35 = vsel %vm1253_vm4, %v1245_v57, %v4987_v48  ;;  %v7000_v57 = vld [vmem:[#allocation30_spill] sm:$0xff] }
 0x1dc   :  { %v842_v34 = vpop.permute.xlu0 %841 }
 0x1dd   :  { %v742_v17 = vpop.permute.xlu1 %741 }
 0x1de   :  { %v1262_v38 = vsel %vm1253_vm4, %v1236_v36, %v742_v17  ;;  %v347_v36 = vld [vmem:[#allocation2 + $0xd0] sm:$0xff] }
 0x1df   :  { %v1288_v2 = vsel %vm1279_vm5, %v1262_v38, %v842_v34  ;;  %v257_v38 = vld [vmem:[#allocation2 + $0x55] sm:$0xff] }
 0x1e0   :  { %v1314_v4 = vsel %vm1305_vm6, %v1288_v2, %v918_v46 }
 0x1e1   :  { %1025 = vrot.lane.b32.xlu2 %v386_v8, %s4069_s19  ;;  %v372_v8 = vld [vmem:[#allocation2 + $0xd1] sm:$0xff] }
 0x1e2   :  { %1043 = vrot.lane.b32.xlu0 %v395_v62, %s4069_s19 }
 0x1e3   :  { %943 = vrot.lane.b32.xlu1 %v370_v30, %s4067_s17  ;;  %v5030_v5 = vpop.permute.xlu2 %861 }
 0x1e4   :  { %v936_v0 = vpop.permute.xlu0 %935 }
 0x1e5   :  { %v860_v10 = vpop.permute.xlu1 %859 }
 0x1e6   :  { %v1297_v37 = vsel %vm1279_vm5, %v1271_v35, %v860_v10 }
 0x1e7   :  { %v1323_v21 = vsel %vm1305_vm6, %v1297_v37, %v936_v0 }
 0x1e8   :  { %v1349_v45 = vsel %vm1331_vm7, %v1323_v21, %v1036_v6  ;;  %v1185_v6 = vsel %vm217_vm0, %v256_v9, %v6995_v55  ;;  %v20_v9 = vld [vmem:[%s6941_s1 + $0x18] sm:$0xff]  ;;  %v19_v55 = vld [vmem:[%s6941_s1 + $0x10] sm:$0xff] }
 0x1e9   :  { %1143 = vrot.lane.b32.xlu2 %v420_v3, %s4068_s18  ;;  %v1211_v61 = vsel %vm1201_vm3, %v1185_v6, %v6996_v24  ;;  %v26_v24 = vld [vmem:[%s6941_s1 + $0x48] sm:$0xff] }
 0x1ea   :  { %751 = vrot.lane.b32.xlu0 %v336_v44, %s4065_s0  ;;  %v422_v44 = vld [vmem:[#allocation2 + $0xd3] sm:$0xff] }
 0x1eb   :  { %1125 = vrot.lane.b32.xlu1 %v411_v18, %s4068_s18  ;;  %v5043_v22 = vpop.permute.xlu2 %1019  ;;  %v397_v18 = vld [vmem:[#allocation2 + $0xd2] sm:$0xff] }
 0x1ec   :  { %v1118_v52 = vpop.permute.xlu0 %1117 }
 0x1ed   :  { %v1018_v25 = vpop.permute.xlu1 %1017 }
 0x1ee   :  { %v1340_v12 = vsel %vm1331_vm7, %v1314_v4, %v1018_v25  ;;  %v398_v4 = vld [vmem:[#allocation2 + $0xda] sm:$0xff] }
 0x1ef   :  { %v1366_v23 = vsel %vm1357_vm8, %v1340_v12, %v1118_v52 }
 0x1f0   :  { %3931 = vmatmul.msk.f32.gmra.mxu0 %vm1395_vm9, %v1366_v23 }
 0x1f1   :  { %851 = vrot.lane.b32.xlu2 %v361_v13, %s4066_s16  ;;  %v6997_v13 = vld [vmem:[#allocation26_spill] sm:$0xff] }
 0x1f2   :  { %869 = vrot.lane.b32.xlu0 %v370_v30, %s4066_s16  ;;  %v1237_v34 = vsel %vm1227_vm2, %v1211_v61, %v6997_v13  ;;  %v346_v30 = vld [vmem:[#allocation2 + $0xc8] sm:$0xff]  ;;  %v21_v61 = vld [vmem:[%s6941_s1 + $0x20] sm:$0xff] }
 0x1f3   :  { %769 = vrot.lane.b32.xlu1 %v345_v33, %s4065_s0  ;;  %v1138_v32 = vpop.permute.xlu2 %1137  ;;  %v1263_v62 = vsel %vm1253_vm4, %v1237_v34, %v5025_v19  ;;  %v266_v33 = vld [vmem:[#allocation2 + $0x9d] sm:$0xff] }
 0x1f4   :  { %v762_v60 = vpop.permute.xlu0 %761 }
 0x1f5   :  { %v1136_v63 = vpop.permute.xlu1 %1135 }
 0x1f6   :  { %v1375_v48 = vsel %vm1357_vm8, %v1349_v45, %v1136_v63 }
 0x1f7   :  { %3940 = vmatmul.msk.f32.gmra.mxu3 %vm1395_vm9, %v1375_v48  ;;  %v17_v48 = vld [vmem:[%s6941_s1] sm:$0xff] }
 0x1f9   :  { %945 = vrot.lane.b32.xlu2 %v371_v20, %s4067_s17 }
 0x1fa   :  { %1027 = vrot.lane.b32.xlu0 %v387_v42, %s4069_s19 }
 0x1fb   :  { %927 = vrot.lane.b32.xlu1 %v4714_v43, %s4067_s17  ;;  %v5069_v46 = vpop.permute.xlu2 %845  ;;  %v1246_v43 = vsel %vm1227_vm2, %v1220_v11, %v6994_v58 }
 0x1fc   :  { %v920_v50 = vpop.permute.xlu0 %919  ;;  %v1272_v15 = vsel %vm1253_vm4, %v1246_v43, %v762_v60  ;;  %v7001_v60 = vld [vmem:[#allocation12_spill] sm:$0xff] }
 0x1fd   :  { %v844_v39 = vpop.permute.xlu1 %843  ;;  %v1298_v49 = vsel %vm1279_vm5, %v1272_v15, %v5030_v5  ;;  %v1195_v63 = vsel %vm217_vm0, %v266_v33, %v7001_v60 }
 0x1fe   :  { %v1289_v0 = vsel %vm1279_vm5, %v1263_v62, %v844_v39  ;;  %v18_v39 = vld [vmem:[%s6941_s1 + $0x8] sm:$0xff] }
 0x1ff   :  { %v1315_v5 = vsel %vm1305_vm6, %v1289_v0, %v920_v50 }
 0x200   :  { %v1341_v19 = vsel %vm1331_vm7, %v1315_v5, %v5043_v22  ;;  %v6998_v22 = vld [vmem:[#allocation8_spill] sm:$0xff]  ;;  %v29_v5 = vld [vmem:[%s6941_s1 + $0x60] sm:$0xff] }
 0x201   :  { %1127 = vrot.lane.b32.xlu2 %v412_v51, %s4068_s18  ;;  %v1186_v25 = vsel %vm217_vm0, %v257_v38, %v6998_v22  ;;  %v7008_v22 = vld [vmem:[#allocation22_spill] sm:$0xff] }
 0x202   :  { %1145 = vrot.lane.b32.xlu0 %v421_v53, %s4068_s18  ;;  %v1212_v12 = vsel %vm1201_vm3, %v1186_v25, %v6999_v40  ;;  %v28_v40 = vld [vmem:[%s6941_s1 + $0x58] sm:$0xff] }
 0x203   :  { %1045 = vrot.lane.b32.xlu1 %v396_v41, %s4069_s19  ;;  %v5081_v54 = vpop.permute.xlu2 %939  ;;  %v1238_v23 = vsel %vm1227_vm2, %v1212_v12, %v7000_v57  ;;  %v7009_v12 = vld [vmem:[#allocation37_spill] sm:$0xff] }
 0x204   :  { %v1038_v14 = vpop.permute.xlu0 %1037 }
 0x205   :  { %v938_v31 = vpop.permute.xlu1 %937 }
 0x206   :  { %v1324_v28 = vsel %vm1305_vm6, %v1298_v49, %v938_v31  ;;  %v22_v49 = vld [vmem:[%s6941_s1 + $0x28] sm:$0xff] }
 0x207   :  { %v1350_v17 = vsel %vm1331_vm7, %v1324_v28, %v1038_v14  ;;  %v23_v14 = vld [vmem:[%s6941_s1 + $0x30] sm:$0xff]  ;;  %v258_v28 = vld [vmem:[#allocation2 + $0x5d] sm:$0xff] }
 0x208   :  { %v1376_v27 = vsel %vm1357_vm8, %v1350_v17, %v1138_v32 }
 0x209   :  { %871 = vrot.lane.b32.xlu2 %v371_v20, %s4066_s16  ;;  %3941 = vmatmul.msk.f32.gmra.mxu3 %vm1395_vm9, %v1376_v27  ;;  %v7002_v20 = vld [vmem:[#allocation17_spill] sm:$0xff]  ;;  %v7005_v27 = vld [vmem:[#allocation18_spill] sm:$0xff] }
 0x20a   :  { %947 = vrot.lane.b32.xlu0 %v372_v8, %s4067_s17  ;;  %v1221_v42 = vsel %vm1201_vm3, %v1195_v63, %v7002_v20 }
 0x20b   :  { %771 = vrot.lane.b32.xlu1 %v346_v30, %s4065_s0  ;;  %v1122_v10 = vpop.permute.xlu2 %1121  ;;  %v25_v30 = vld [vmem:[%s6941_s1 + $0x40] sm:$0xff] }
 0x20c   :  { %v746_v26 = vpop.permute.xlu0 %745 }
 0x20d   :  { %v1120_v3 = vpop.permute.xlu1 %1119  ;;  %v1264_v35 = vsel %vm1253_vm4, %v1238_v23, %v746_v26 }
 0x20e   :  { %v1367_v47 = vsel %vm1357_vm8, %v1341_v19, %v1120_v3  ;;  %v1290_v32 = vsel %vm1279_vm5, %v1264_v35, %v5069_v46  ;;  %v7003_v46 = vld [vmem:[#allocation35_spill] sm:$0xff]  ;;  %v24_v3 = vld [vmem:[%s6941_s1 + $0x38] sm:$0xff] }
 0x20f   :  { %3932 = vmatmul.msk.f32.gmra.mxu0 %vm1395_vm9, %v1367_v47  ;;  %v1247_v51 = vsel %vm1227_vm2, %v1221_v42, %v7003_v46  ;;  %v267_v47 = vld [vmem:[#allocation2 + $0xa5] sm:$0xff]  ;;  %v32_v35 = vld [vmem:[%s6941_s1 + $0x78] sm:$0xff] }
 0x210   :  { %v35_v42 = vld [vmem:[%s6941_s1 + $0x90] sm:$0xff] }
 0x211   :  { %1147 = vrot.lane.b32.xlu2 %v422_v44, %s4068_s18 }
 0x212   :  { %773 = vrot.lane.b32.xlu0 %v347_v36, %s4065_s0 }
 0x213   :  { %1047 = vrot.lane.b32.xlu1 %v397_v18, %s4069_s19  ;;  %v5109_v2 = vpop.permute.xlu2 %765  ;;  %v7007_v18 = vld [vmem:[#allocation6_spill] sm:$0xff] }
 0x214   :  { %v864_v16 = vpop.permute.xlu0 %863  ;;  %v1196_v38 = vsel %vm217_vm0, %v267_v47, %v7007_v18  ;;  %v39_v18 = vld [vmem:[%s6941_s1 + $0xb0] sm:$0xff] }
 0x215   :  { %v764_v52 = vpop.permute.xlu1 %763  ;;  %v1222_v25 = vsel %vm1201_vm3, %v1196_v38, %v7008_v22  ;;  %v260_v38 = vld [vmem:[#allocation2 + $0x6d] sm:$0xff]  ;;  %v7016_v22 = vld [vmem:[#allocation10_spill] sm:$0xff] }
 0x216   :  { %v1273_v1 = vsel %vm1253_vm4, %v1247_v51, %v764_v52  ;;  %v1248_v57 = vsel %vm1227_vm2, %v1222_v25, %v7009_v12  ;;  %v34_v51 = vld [vmem:[%s6941_s1 + $0x88] sm:$0xff]  ;;  %v1189_v25 = vsel %vm217_vm0, %v260_v38, %v7016_v22  ;;  %v7018_v12 = vld [vmem:[#allocation32_spill] sm:$0xff] }
 0x217   :  { %v1299_v11 = vsel %vm1279_vm5, %v1273_v1, %v864_v16  ;;  %v1274_v33 = vsel %vm1253_vm4, %v1248_v57, %v5109_v2  ;;  %v31_v2 = vld [vmem:[%s6941_s1 + $0x70] sm:$0xff]  ;;  %v38_v1 = vld [vmem:[%s6941_s1 + $0xa8] sm:$0xff] }
 0x218   :  { %v1325_v58 = vsel %vm1305_vm6, %v1299_v11, %v5081_v54  ;;  %v7011_v11 = vld [vmem:[#allocation25_spill] sm:$0xff] }
 0x219   :  { %949 = vrot.lane.b32.xlu2 %v373_v7, %s4067_s17 }
 0x21a   :  { %1049 = vrot.lane.b32.xlu0 %v398_v4, %s4069_s19 }
 0x21b   :  { %873 = vrot.lane.b32.xlu1 %v372_v8, %s4066_s16  ;;  %v924_v29 = vpop.permute.xlu2 %923  ;;  %v7004_v8 = vld [vmem:[#allocation4_spill] sm:$0xff] }
 0x21c   :  { %v1022_v37 = vpop.permute.xlu0 %1021  ;;  %v1187_v62 = vsel %vm217_vm0, %v258_v28, %v7004_v8 }
 0x21d   :  { %v922_v21 = vpop.permute.xlu1 %921  ;;  %v1213_v0 = vsel %vm1201_vm3, %v1187_v62, %v7005_v27 }
 0x21e   :  { %v1316_v45 = vsel %vm1305_vm6, %v1290_v32, %v922_v21 }
 0x21f   :  { %v1342_v50 = vsel %vm1331_vm7, %v1316_v45, %v1022_v37  ;;  %v27_v37 = vld [vmem:[%s6941_s1 + $0x50] sm:$0xff] }
 0x220   :  { %v1368_v53 = vsel %vm1357_vm8, %v1342_v50, %v1122_v10  ;;  %v7006_v10 = vld [vmem:[#allocation33_spill] sm:$0xff] }
 0x221   :  { %1571 = vperm.xlu2 %4014, %v17_v48   ;;  %3933 = vmatmul.msk.f32.gmra.mxu0 %vm1395_vm9, %v1368_v53  ;;  %v1239_v26 = vsel %vm1227_vm2, %v1213_v0, %v7006_v10  ;;  %v268_v50 = vld [vmem:[#allocation2 + $0xad] sm:$0xff] }
 0x222   :  { %1576 = vperm.xlu0 %4015, %v18_v39   ;;  %v36_v0 = vld [vmem:[%s6941_s1 + $0x98] sm:$0xff] }
 0x223   :  { %1149 = vrot.lane.b32.xlu1 %v423_v59, %s4068_s18  ;;  %v1042_v6 = vpop.permute.xlu2 %1041  ;;  %v7010_v59 = vld [vmem:[#allocation11_spill] sm:$0xff] }
 0x224   :  { %v1140_v41 = vpop.permute.xlu0 %1139  ;;  %v1197_v53 = vsel %vm217_vm0, %v268_v50, %v7010_v59 }
 0x225   :  { %v1040_v56 = vpop.permute.xlu1 %1039 }
 0x226   :  { %v1351_v43 = vsel %vm1331_vm7, %v1325_v58, %v1040_v56  ;;  %v33_v56 = vld [vmem:[%s6941_s1 + $0x80] sm:$0xff]  ;;  %v7012_v58 = vld [vmem:[#allocation31_spill] sm:$0xff] }
 0x227   :  { %v1377_v15 = vsel %vm1357_vm8, %v1351_v43, %v1140_v41  ;;  %v1223_v41 = vsel %vm1201_vm3, %v1197_v53, %v7011_v11 }
 0x228   :  { %3942 = vmatmul.msk.f32.gmra.mxu3 %vm1395_vm9, %v1377_v15  ;;  %v1249_v43 = vsel %vm1227_vm2, %v1223_v41, %v7012_v58  ;;  %v259_v15 = vld [vmem:[#allocation2 + $0x65] sm:$0xff]  ;;  %v270_v41 = vld [vmem:[#allocation2 + $0xbd] sm:$0xff] }
 0x229   :  { %1586 = vperm.xlu2 %4014, %v20_v9  }
 0x22a   :  { %1601 = vperm.xlu0 %4015, %v23_v14  }
 0x22b   :  { %1581 = vperm.xlu1 %4016, %v19_v55   ;;  %v5165_v13 = vpop.permute.xlu2 %749 }
 0x22c   :  { %v848_v54 = vpop.permute.xlu0 %847 }
 0x22d   :  { %v748_v31 = vpop.permute.xlu1 %747 }
 0x22e   :  { %v1265_v19 = vsel %vm1253_vm4, %v1239_v26, %v748_v31 }
 0x22f   :  { %v1291_v44 = vsel %vm1279_vm5, %v1265_v19, %v848_v54 }
 0x230   :  { %v1317_v7 = vsel %vm1305_vm6, %v1291_v44, %v924_v29  ;;  %v30_v29 = vld [vmem:[%s6941_s1 + $0x68] sm:$0xff] }
 0x231   :  { %1596 = vperm.xlu2 %4014, %v22_v49  }
 0x232   :  { %1616 = vperm.xlu0 %4015, %v26_v24   ;;  %v7014_v24 = vld [vmem:[#allocation21_spill] sm:$0xff] }
 0x233   :  { %1591 = vperm.xlu1 %4016, %v21_v61   ;;  %v868_v16 = vpop.permute.xlu2 %867 }
 0x234   :  { %v942_v34 = vpop.permute.xlu0 %941 }
 0x235   :  { %v866_v17 = vpop.permute.xlu1 %865 }
 0x236   :  { %v1300_v21 = vsel %vm1279_vm5, %v1274_v33, %v866_v17  ;;  %v7015_v17 = vld [vmem:[#allocation28_spill] sm:$0xff] }
 0x237   :  { %v1326_v32 = vsel %vm1305_vm6, %v1300_v21, %v942_v34  ;;  %v37_v34 = vld [vmem:[%s6941_s1 + $0xa0] sm:$0xff] }
 0x238   :  { %v1352_v45 = vsel %vm1331_vm7, %v1326_v32, %v1042_v6  ;;  %v7013_v6 = vld [vmem:[#allocation7_spill] sm:$0xff]  ;;  %v7019_v32 = vld [vmem:[#allocation14_spill] sm:$0xff] }
 0x239   :  { %1611 = vperm.xlu2 %4014, %v25_v30   ;;  %v1188_v54 = vsel %vm217_vm0, %v259_v15, %v7013_v6  ;;  %v41_v30 = vld [vmem:[%s6941_s1 + $0xc0] sm:$0xff] }
 0x23a   :  { %1631 = vperm.xlu0 %4015, %v29_v5   ;;  %v1214_v61 = vsel %vm1201_vm3, %v1188_v54, %v7014_v24  ;;  %v5300_v24 = vpop.f32.mrf.mxu0 }
 0x23b   :  { %1606 = vperm.xlu1 %4016, %v24_v3   ;;  %v1026_v20 = vpop.permute.xlu2 %1025  ;;  %v1240_v8 = vsel %vm1227_vm2, %v1214_v61, %v7015_v17 }
 0x23c   :  { %v1124_v36 = vpop.permute.xlu0 %1123  ;;  %v1266_v27 = vsel %vm1253_vm4, %v1240_v8, %v5165_v13 }
 0x23d   :  { %v1024_v52 = vpop.permute.xlu1 %1023 }
 0x23e   :  { %v1343_v4 = vsel %vm1331_vm7, %v1317_v7, %v1024_v52 }
 0x23f   :  { %v1369_v23 = vsel %vm1357_vm8, %v1343_v4, %v1124_v36  ;;  %v40_v36 = vld [vmem:[%s6941_s1 + $0xb8] sm:$0xff]  ;;  %v7017_v4 = vld [vmem:[#allocation16_spill] sm:$0xff] }
 0x240   :  { %3934 = vmatmul.msk.f32.gmra.mxu0 %vm1395_vm9, %v1369_v23 }
 0x241   :  { %1626 = vperm.xlu2 %4014, %v28_v40   ;;  %v1215_v40 = vsel %vm1201_vm3, %v1189_v25, %v7017_v4 }
 0x242   :  { %1646 = vperm.xlu0 %4015, %v32_v35   ;;  %v1241_v57 = vsel %vm1227_vm2, %v1215_v40, %v7018_v12  ;;  %v269_v35 = vld [vmem:[#allocation2 + $0xb5] sm:$0xff] }
 0x243   :  { %1621 = vperm.xlu1 %4016, %v27_v37   ;;  %v1144_v9 = vpop.permute.xlu2 %1143 }
 0x244   :  { %v768_v60 = vpop.permute.xlu0 %767 }
 0x245   :  { %v1142_v63 = vpop.permute.xlu1 %1141  ;;  %v1275_v14 = vsel %vm1253_vm4, %v1249_v43, %v768_v60  ;;  %v1198_v60 = vsel %vm217_vm0, %v269_v35, %v7019_v32 }
 0x246   :  { %v1378_v48 = vsel %vm1357_vm8, %v1352_v45, %v1142_v63  ;;  %v1301_v49 = vsel %vm1279_vm5, %v1275_v14, %v868_v16  ;;  %v7020_v45 = vld [vmem:[#allocation20_spill] sm:$0xff] }
 0x247   :  { %3943 = vmatmul.msk.f32.gmra.mxu3 %vm1395_vm9, %v1378_v48  ;;  %v1224_v48 = vsel %vm1201_vm3, %v1198_v60, %v7020_v45 }
 0x249   :  { %1641 = vperm.xlu2 %4014, %v31_v2  }
 0x24a   :  { %1661 = vperm.xlu0 %4015, %v35_v42   ;;  %v7021_v42 = vld [vmem:[#allocation36_spill] sm:$0xff] }
 0x24b   :  { %1636 = vperm.xlu1 %4016, %v30_v29   ;;  %v852_v3 = vpop.permute.xlu2 %851  ;;  %v1250_v29 = vsel %vm1227_vm2, %v1224_v48, %v7021_v42 }
 0x24c   :  { %v926_v39 = vpop.permute.xlu0 %925 }
 0x24d   :  { %v850_v46 = vpop.permute.xlu1 %849 }
 0x24e   :  { %v1292_v10 = vsel %vm1279_vm5, %v1266_v27, %v850_v46  ;;  %v7025_v27 = vld [vmem:[#allocation13_spill] sm:$0xff] }
 0x24f   :  { %v1318_v26 = vsel %vm1305_vm6, %v1292_v10, %v926_v39 }
 0x250   :  { %v1344_v13 = vsel %vm1331_vm7, %v1318_v26, %v1026_v20  ;;  %v5310_v26 = vpop.f32.mrf.mxu0 }
 0x251   :  { %1656 = vperm.xlu2 %4014, %v34_v51  }
 0x252   :  { %1676 = vperm.xlu0 %4015, %v38_v1  }
 0x253   :  { %1651 = vperm.xlu1 %4016, %v33_v56   ;;  %v946_v52 = vpop.permute.xlu2 %945  ;;  %v7022_v56 = vld [vmem:[#allocation9_spill] sm:$0xff] }
 0x254   :  { %v1044_v55 = vpop.permute.xlu0 %1043  ;;  %v1199_v58 = vsel %vm217_vm0, %v270_v41, %v7022_v56 }
 0x255   :  { %v944_v31 = vpop.permute.xlu1 %943 }
 0x256   :  { %v1327_v28 = vsel %vm1305_vm6, %v1301_v49, %v944_v31 }
 0x257   :  { %v1353_v62 = vsel %vm1331_vm7, %v1327_v28, %v1044_v55  ;;  %v7024_v55 = vld [vmem:[#allocation38_spill] sm:$0xff] }
 0x258   :  { %v1379_v5 = vsel %vm1357_vm8, %v1353_v62, %v1144_v9  ;;  %v7023_v9 = vld [vmem:[#allocation24_spill] sm:$0xff] }
 0x259   :  { %3944 = vmatmul.msk.f32.gmra.mxu3 %vm1395_vm9, %v1379_v5  ;;  %1671 = vperm.xlu2 %4014, %v37_v34   ;;  %v1225_v15 = vsel %vm1201_vm3, %v1199_v58, %v7023_v9  ;;  %v271_v62 = vld [vmem:[#allocation2 + $0xc5] sm:$0xff] }
 0x25a   :  { %1691 = vperm.xlu0 %4015, %v41_v30   ;;  %v1251_v6 = vsel %vm1227_vm2, %v1225_v15, %v7024_v55  ;;  %v7026_v5 = vld [vmem:[#allocation27_spill] sm:$0xff] }
 0x25b   :  { %1666 = vperm.xlu1 %4016, %v36_v0   ;;  %v1128_v2 = vpop.permute.xlu2 %1127  ;;  %v1200_v0 = vsel %vm217_vm0, %v271_v62, %v7025_v27 }
 0x25c   :  { %v752_v19 = vpop.permute.xlu0 %751  ;;  %v1226_v10 = vsel %vm1201_vm3, %v1200_v0, %v7026_v5 }
 0x25d   :  { %v1126_v47 = vpop.permute.xlu1 %1125  ;;  %v1267_v23 = vsel %vm1253_vm4, %v1241_v57, %v752_v19 }
 0x25e   :  { %v1370_v44 = vsel %vm1357_vm8, %v1344_v13, %v1126_v47  ;;  %v1293_v21 = vsel %vm1279_vm5, %v1267_v23, %v852_v3  ;;  %v7027_v3 = vld [vmem:[#allocation34_spill] sm:$0xff] }
 0x25f   :  { %3935 = vmatmul.msk.f32.gmra.mxu0 %vm1395_vm9, %v1370_v44  ;;  %v1252_v19 = vsel %vm1227_vm2, %v1226_v10, %v7027_v3 }
 0x261   :  { %1686 = vperm.xlu2 %4014, %v40_v36  }
 0x263   :  { %1681 = vperm.xlu1 %4016, %v39_v18   ;;  %v872_v43 = vpop.permute.xlu2 %871 }
 0x264   :  { %v870_v16 = vpop.permute.xlu0 %869 }
 0x265   :  { %v770_v7 = vpop.permute.xlu1 %769 }
 0x266   :  { %v1276_v39 = vsel %vm1253_vm4, %v1250_v29, %v770_v7 }
 0x267   :  { %v1302_v46 = vsel %vm1279_vm5, %v1276_v39, %v870_v16  ;;  %v5317_v16 = vpop.f32.mrf.mxu0 }
 0x268   :  { %v1328_v53 = vsel %vm1305_vm6, %v1302_v46, %v946_v52 }
 0x26b   :  { %v1148_v34 = vpop.permute.xlu2 %1147 }
 0x26c   :  { %v1028_v33 = vpop.permute.xlu0 %1027 }
 0x26d   :  { %v928_v37 = vpop.permute.xlu1 %927 }
 0x26e   :  { %v1319_v63 = vsel %vm1305_vm6, %v1293_v21, %v928_v37  ;;  %v5338_v37 = vpop.f32.mrf.mxu3 }
 0x26f   :  { %v1345_v20 = vsel %vm1331_vm7, %v1319_v63, %v1028_v33  ;;  %v5322_v25 = vpop.f32.mrf.mxu0 }
 0x270   :  { %v1371_v50 = vsel %vm1357_vm8, %v1345_v20, %v1128_v2 }
 0x271   :  { %3936 = vmatmul.msk.f32.gmra.mxu0 %vm1395_vm9, %v1371_v50 }
 0x273   :  { %v950_v36 = vpop.permute.xlu2 %949 }
 0x274   :  { %v1146_v51 = vpop.permute.xlu0 %1145 }
 0x275   :  { %v1046_v59 = vpop.permute.xlu1 %1045 }
 0x276   :  { %v1354_v1 = vsel %vm1331_vm7, %v1328_v53, %v1046_v59  ;;  %v5355_v42 = vpop.f32.mrf.mxu3 }
 0x277   :  { %v1380_v11 = vsel %vm1357_vm8, %v1354_v1, %v1146_v51  ;;  %v5324_v4 = vpop.f32.mrf.mxu0 }
 0x278   :  { %3945 = vmatmul.msk.f32.gmra.mxu3 %vm1395_vm9, %v1380_v11 }
 0x27b   :  { %v5332_v23 = vpop.permute.xlu2 %1571 }
 0x27c   :  { %v948_v54 = vpop.permute.xlu0 %947  ;;  %v1694_v45 = vmul.f32 %v5332_v23, %v5300_v24 }
 0x27d   :  { %v772_v14 = vpop.permute.xlu1 %771 }
 0x27e   :  { %v1277_v31 = vsel %vm1253_vm4, %v1251_v6, %v772_v14  ;;  %v1719_v29 = vsel %vm217_vm0, %v1694_v45, 0.0  ;;  %v5371_v58 = vpop.f32.mrf.mxu3 }
 0x27f   :  { %v1303_v49 = vsel %vm1279_vm5, %v1277_v31, %v872_v43  ;;  %v5326_v40 = vpop.f32.mrf.mxu0 }
 0x280   :  { %v1329_v61 = vsel %vm1305_vm6, %v1303_v49, %v948_v54 }
 0x283   :  { %v5340_v21 = vpop.permute.xlu2 %1586 }
 0x284   :  { %v774_v30 = vpop.permute.xlu0 %773  ;;  %v1697_v51 = vmul.f32 %v5340_v21, %v5322_v25 }
 0x285   :  { %v1048_v28 = vpop.permute.xlu1 %1047  ;;  %v1278_v13 = vsel %vm1253_vm4, %v1252_v19, %v774_v30 }
 0x286   :  { %v1355_v17 = vsel %vm1331_vm7, %v1329_v61, %v1048_v28  ;;  %v1724_v41 = vsel %vm217_vm0, %v1697_v51, 0.0  ;;  %v5386_v28 = vpop.f32.mrf.mxu3 }
 0x287   :  { %v1381_v8 = vsel %vm1357_vm8, %v1355_v17, %v1148_v34  ;;  %v5328_v12 = vpop.f32.mrf.mxu0 }
 0x288   :  { %3946 = vmatmul.msk.f32.gmra.mxu3 %vm1395_vm9, %v1381_v8 }
 0x28b   :  { %v5359_v39 = vpop.permute.xlu2 %1596 }
 0x28c   :  { %v1050_v38 = vpop.permute.xlu0 %1049  ;;  %v1699_v15 = vmul.f32 %v5359_v39, %v5326_v40 }
 0x28d   :  { %v874_v47 = vpop.permute.xlu1 %873 }
 0x28e   :  { %v1304_v44 = vsel %vm1279_vm5, %v1278_v13, %v874_v47  ;;  %v1728_v54 = vsel %vm217_vm0, %v1699_v15, 0.0  ;;  %v5405_v13 = vpop.f32.mrf.mxu3 }
 0x28f   :  { %v1330_v18 = vsel %vm1305_vm6, %v1304_v44, %v950_v36  ;;  %v5330_v57 = vpop.f32.mrf.mxu0 }
 0x290   :  { %v1356_v52 = vsel %vm1331_vm7, %v1330_v18, %v1050_v38 }
 0x293   :  { %v5377_v55 = vpop.permute.xlu2 %1611 }
 0x294   :  { %v5342_v32 = vpop.permute.xlu0 %1576  ;;  %7028 = vst [vmem:[#allocation23_spill] sm:$0xff] %v5377_v55 }
 0x295   :  { %v1150_v7 = vpop.permute.xlu1 %1149  ;;  %v1695_v60 = vmul.f32 %v5342_v32, %v5310_v26 }
 0x296   :  { %v1382_v22 = vsel %vm1357_vm8, %v1356_v52, %v1150_v7 }
 0x297   :  { %3947 = vmatmul.msk.f32.gmra.mxu3 %vm1395_vm9, %v1382_v22  ;;  %v5334_v35 = vpop.f32.mrf.mxu0  ;;  %v1720_v20 = vsel %vm217_vm0, %v1695_v60, 0.0 }
 0x298   :  { %v1721_v46 = vadd.f32 %v1720_v20, %v1719_v29  ;;  %v1702_v27 = vmul.f32 %v5377_v55, %v5334_v35 }
 0x29a   :  { %v1734_v3 = vsel %vm217_vm0, %v1702_v27, 0.0 }
 0x29b   :  { %v5398_v10 = vpop.permute.xlu2 %1626 }
 0x29c   :  { %v5367_v11 = vpop.permute.xlu0 %1601  ;;  %7031 = vst [vmem:[#allocation19_spill] sm:$0xff] %v5398_v10 }
 0x29d   :  { %v5336_v33 = vpop.permute.xlu1 %1581  ;;  %v1700_v31 = vmul.f32 %v5367_v11, %v5328_v12 }
 0x29e   :  { %v1696_v48 = vmul.f32 %v5336_v33, %v5317_v16 }
 0x29f   :  { %v5346_v63 = vpop.f32.mrf.mxu0  ;;  %v1730_v17 = vsel %vm217_vm0, %v1700_v31, 0.0 }
 0x2a0   :  { %v1722_v50 = vsel %vm217_vm0, %v1696_v48, 0.0 }
 0x2a1   :  { %v1723_v53 = vadd.f32 %v1722_v50, %v1721_v46 }
 0x2a3   :  { %v1725_v43 = vadd.f32 %v1724_v41, %v1723_v53  ;;  %v5423_v46 = vpop.permute.xlu2 %1641 }
 0x2a4   :  { %v5388_v34 = vpop.permute.xlu0 %1616  ;;  %7034 = vst [vmem:[#allocation15_spill] sm:$0xff] %v5423_v46 }
 0x2a5   :  { %v5352_v2 = vpop.permute.xlu1 %1591  ;;  %7029 = vst [vmem:[#allocation29_spill] sm:$0xff] %v5388_v34  ;;  %v1703_v19 = vmul.f32 %v5388_v34, %v5346_v63 }
 0x2a6   :  { %v1698_v59 = vmul.f32 %v5352_v2, %v5324_v4 }
 0x2a7   :  { %v5365_v1 = vpop.f32.mrf.mxu0  ;;  %v1736_v38 = vsel %vm217_vm0, %v1703_v19, 0.0 }
 0x2a8   :  { %v1726_v56 = vsel %vm217_vm0, %v1698_v59, 0.0 }
 0x2a9   :  { %v1727_v14 = vadd.f32 %v1726_v56, %v1725_v43  ;;  %v1708_v56 = vmul.f32 %v5423_v46, %v5338_v37 }
 0x2ab   :  { %v1729_v61 = vadd.f32 %v1728_v54, %v1727_v14  ;;  %v5425_v51 = vpop.f32.mrf.mxu3  ;;  %v1746_v54 = vsel %vm217_vm0, %v1708_v56, 0.0 }
 0x2ac   :  { %v5409_v18 = vpop.permute.xlu0 %1631 }
 0x2ad   :  { %v5373_v9 = vpop.permute.xlu1 %1606  ;;  %v1731_v62 = vadd.f32 %v1730_v17, %v1729_v61  ;;  %7032 = vst [vmem:[#allocation26_spill] sm:$0xff] %v5409_v18 }
 0x2ae   :  { %v1701_v49 = vmul.f32 %v5373_v9, %v5330_v57 }
 0x2b0   :  { %v1732_v8 = vsel %vm217_vm0, %v1701_v49, 0.0 }
 0x2b1   :  { %v1733_v0 = vadd.f32 %v1732_v8, %v1731_v62  ;;  %v5442_v62 = vpop.permute.xlu2 %1656 }
 0x2b3   :  { %v1735_v44 = vadd.f32 %v1734_v3, %v1733_v0  ;;  %v1711_v0 = vmul.f32 %v5442_v62, %v5386_v28 }
 0x2b4   :  { %v5430_v43 = vpop.permute.xlu0 %1646 }
 0x2b5   :  { %v5392_v30 = vpop.permute.xlu1 %1621  ;;  %v1737_v60 = vadd.f32 %v1736_v38, %v1735_v44  ;;  %7035 = vst [vmem:[#allocation30_spill] sm:$0xff] %v5430_v43  ;;  %v1709_v14 = vmul.f32 %v5430_v43, %v5355_v42 }
 0x2b6   :  { %7030 = vst [vmem:[#allocation5_spill] sm:$0xff] %v5392_v30  ;;  %v1704_v47 = vmul.f32 %v5392_v30, %v5365_v1 }
 0x2b7   :  { %v1748_v17 = vsel %vm217_vm0, %v1709_v14, 0.0 }
 0x2b8   :  { %v1738_v52 = vsel %vm217_vm0, %v1704_v47, 0.0 }
 0x2b9   :  { %v1739_v29 = vadd.f32 %v1738_v52, %v1737_v60 }
 0x2bc   :  { %v5447_v19 = vpop.permute.xlu0 %1661 }
 0x2bd   :  { %v5379_v6 = vpop.f32.mrf.mxu0  ;;  %v5415_v22 = vpop.permute.xlu1 %1636  ;;  %v1712_v38 = vmul.f32 %v5447_v19, %v5405_v13 }
 0x2be   :  { %v1705_v36 = vmul.f32 %v5398_v10, %v5379_v6  ;;  %7033 = vst [vmem:[#allocation8_spill] sm:$0xff] %v5415_v22 }
 0x2bf   :  { %v1754_v60 = vsel %vm217_vm0, %v1712_v38, 0.0 }
 0x2c0   :  { %v1740_v48 = vsel %vm217_vm0, %v1705_v36, 0.0  ;;  %v1752_v36 = vsel %vm217_vm0, %v1711_v0, 0.0 }
 0x2c1   :  { %v1741_v59 = vadd.f32 %v1740_v48, %v1739_v29 }
 0x2c4   :  { %v5466_v56 = vpop.permute.xlu0 %1676 }
 0x2c5   :  { %v5435_v31 = vpop.permute.xlu1 %1651 }
 0x2c6   :  { %v1710_v8 = vmul.f32 %v5435_v31, %v5371_v58 }
 0x2c8   :  { %v1750_v3 = vsel %vm217_vm0, %v1710_v8, 0.0 }
 0x2ca   :  { %v5437_v49 = vpop.f32.mrf.mxu3 }
 0x2cd   :  { %v5454_v52 = vpop.permute.xlu1 %1666 }
 0x2ce   :  { %v1713_v48 = vmul.f32 %v5454_v52, %v5425_v51 }
 0x2d5   :  { %v5475_v8 = vpop.permute.xlu1 %1681 }
 0x2d6   :  { %7037 = vst [vmem:[#allocation17_spill] sm:$0xff] %v5475_v8 }
 0x2dc   :  { %v5396_v5 = vpop.f32.mrf.mxu0  ;;  %v5449_v47 = vpop.f32.mrf.mxu3 }
 0x2dd   :  { %v1706_v7 = vmul.f32 %v5409_v18, %v5396_v5  ;;  %v1715_v14 = vmul.f32 %v5466_v56, %v5449_v47 }
 0x2df   :  { %v1742_v50 = vsel %vm217_vm0, %v1706_v7, 0.0 }
 0x2e0   :  { %v1743_v41 = vadd.f32 %v1742_v50, %v1741_v59 }
 0x2ee   :  { %v5417_v45 = vpop.f32.mrf.mxu0 }
 0x2ef   :  { %v1707_v20 = vmul.f32 %v5415_v22, %v5417_v45 }
 0x2f1   :  { %v1744_v53 = vsel %vm217_vm0, %v1707_v20, 0.0  ;;  %v5459_v20 = vpop.permute.xlu2 %1671 }
 0x2f2   :  { %v1745_v15 = vadd.f32 %v1744_v53, %v1743_v41  ;;  %v1714_v59 = vmul.f32 %v5459_v20, %v5437_v49  ;;  %v1756_v53 = vsel %vm217_vm0, %v1713_v48, 0.0 }
 0x2f4   :  { %v1747_v61 = vadd.f32 %v1746_v54, %v1745_v15  ;;  %v1758_v15 = vsel %vm217_vm0, %v1714_v59, 0.0 }
 0x2f6   :  { %v1749_v27 = vadd.f32 %v1748_v17, %v1747_v61 }
 0x2f8   :  { %v1751_v44 = vadd.f32 %v1750_v3, %v1749_v27  ;;  %v1760_v27 = vsel %vm217_vm0, %v1715_v14, 0.0 }
 0x2f9   :  { %v5473_v17 = vpop.permute.xlu2 %1686 }
 0x2fa   :  { %v1753_v7 = vadd.f32 %v1752_v36, %v1751_v44  ;;  %7036 = vst [vmem:[#allocation12_spill] sm:$0xff] %v5473_v17 }
 0x2fb   :  { %v5461_v29 = vpop.f32.mrf.mxu3 }
 0x2fc   :  { %v1755_v50 = vadd.f32 %v1754_v60, %v1753_v7  ;;  %v1716_v0 = vmul.f32 %v5475_v8, %v5461_v29  ;;  %v5484_v7 = vpop.permute.xlu0 %1691 }
 0x2fe   :  { %v1757_v41 = vadd.f32 %v1756_v53, %v1755_v50  ;;  %v1762_v36 = vsel %vm217_vm0, %v1716_v0, 0.0 }
 0x300   :  { %v1759_v54 = vadd.f32 %v1758_v15, %v1757_v41 }
 0x302   :  { %v1761_v44 = vadd.f32 %v1760_v27, %v1759_v54 }
 0x304   :  { %v1763_v60 = vadd.f32 %v1762_v36, %v1761_v44 }
 0x30b   :  { %v5471_v61 = vpop.f32.mrf.mxu3 }
 0x30c   :  { %v1717_v3 = vmul.f32 %v5473_v17, %v5471_v61 }
 0x30e   :  { %v1764_v38 = vsel %vm217_vm0, %v1717_v3, 0.0 }
 0x30f   :  { %v1765_v59 = vadd.f32 %v1764_v38, %v1763_v60 }
 0x31a   :  { %v5486_v48 = vpop.f32.mrf.mxu3 }
 0x31b   :  { %v1718_v50 = vmul.f32 %v5484_v7, %v5486_v48 }
 0x31d   :  { %v1766_v53 = vsel %vm217_vm0, %v1718_v50, 0.0 }
 0x31e   :  { %v1767_v41 = vadd.f32 %v1766_v53, %v1765_v59 }
 0x320   :  { %v1768_v15 = vrot.slane %v1767_v41, 4 }
 0x322   :  { %v1769_v14 = vadd.f32 %v1768_v15, %v1767_v41 }
 0x324   :  { %v1770_v17 = vrot.slane %v1769_v14, 2 }
 0x326   :  { %v1771_v54 = vadd.f32 %v1770_v17, %v1769_v14 }
 0x328   :  { %v1772_v27 = vrot.slane %v1771_v54, 1 }
 0x32a   :  { %v1773_v0 = vadd.f32 %v1772_v27, %v1771_v54 }
 0x32c   :  { %v5491_v8 = vmul.f32 0.0078125, %v1773_v0 }
 0x32e   :  { %v5495_v3 = vsub.f32 %v5300_v24, %v5491_v8  ;;  %v5499_v44 = vsub.f32 %v5310_v26, %v5491_v8  ;;  %v5503_v36 = vsub.f32 %v5317_v16, %v5491_v8  ;;  %v5509_v17 = vsub.f32 %v5322_v25, %v5491_v8 }
 0x32f   :  { %v5515_v24 = vsub.f32 %v5324_v4, %v5491_v8  ;;  %v5521_v16 = vsub.f32 %v5326_v40, %v5491_v8  ;;  %v5527_v53 = vsub.f32 %v5328_v12, %v5491_v8  ;;  %v5534_v14 = vsub.f32 %v5330_v57, %v5491_v8 }
 0x330   :  { %v1800_v38 = vmul.f32 %v5495_v3, %v5332_v23  ;;  %v1801_v60 = vmul.f32 %v5499_v44, %v5342_v32  ;;  %v1802_v26 = vmul.f32 %v5503_v36, %v5336_v33  ;;  %v1803_v59 = vmul.f32 %v5509_v17, %v5340_v21 }
 0x331   :  { %v1804_v4 = vmul.f32 %v5515_v24, %v5352_v2  ;;  %v1805_v40 = vmul.f32 %v5521_v16, %v5359_v39  ;;  %v5541_v12 = vsub.f32 %v5334_v35, %v5491_v8  ;;  %v5548_v57 = vsub.f32 %v5346_v63, %v5491_v8 }
 0x332   :  { %v1825_v50 = vmul.f32 %v1800_v38, %v1800_v38  ;;  %v1826_v25 = vmul.f32 %v1801_v60, %v1801_v60  ;;  %v1827_v41 = vmul.f32 %v1802_v26, %v1802_v26  ;;  %v1828_v54 = vmul.f32 %v1803_v59, %v1803_v59 }
 0x333   :  { %v1806_v38 = vmul.f32 %v5527_v53, %v5367_v11  ;;  %v1829_v60 = vmul.f32 %v1804_v4, %v1804_v4  ;;  %v1807_v59 = vmul.f32 %v5534_v14, %v5373_v9  ;;  %v5555_v35 = vsub.f32 %v5365_v1, %v5491_v8 }
 0x334   :  { %v1850_v15 = vsel %vm217_vm0, %v1825_v50, 0.0  ;;  %v1851_v27 = vsel %vm217_vm0, %v1826_v25, 0.0  ;;  %v1853_v26 = vsel %vm217_vm0, %v1827_v41, 0.0  ;;  %v1830_v25 = vmul.f32 %v1805_v40, %v1805_v40 }
 0x335   :  { %v1852_v0 = vadd.f32 %v1851_v27, %v1850_v15  ;;  %v1855_v15 = vsel %vm217_vm0, %v1828_v54, 0.0  ;;  %v1808_v4 = vmul.f32 %v5541_v12, %v5377_v55  ;;  %v1831_v41 = vmul.f32 %v1806_v38, %v1806_v38 }
 0x336   :  { %v5562_v63 = vsub.f32 %v5379_v6, %v5491_v8  ;;  %v1809_v40 = vmul.f32 %v5548_v57, %v5388_v34  ;;  %v1832_v54 = vmul.f32 %v1807_v59, %v1807_v59  ;;  %v5569_v1 = vsub.f32 %v5396_v5, %v5491_v8 }
 0x337   :  { %v1854_v50 = vadd.f32 %v1853_v26, %v1852_v0  ;;  %v1857_v0 = vsel %vm217_vm0, %v1829_v60, 0.0  ;;  %v1810_v38 = vmul.f32 %v5555_v35, %v5392_v30  ;;  %v1833_v60 = vmul.f32 %v1808_v4, %v1808_v4 }
 0x338   :  { %v5576_v6 = vsub.f32 %v5417_v45, %v5491_v8  ;;  %v1811_v59 = vmul.f32 %v5562_v63, %v5398_v10  ;;  %v5583_v5 = vsub.f32 %v5338_v37, %v5491_v8  ;;  %v1812_v4 = vmul.f32 %v5569_v1, %v5409_v18 }
 0x339   :  { %v1856_v27 = vadd.f32 %v1855_v15, %v1854_v50  ;;  %v1859_v50 = vsel %vm217_vm0, %v1830_v25, 0.0  ;;  %v1834_v25 = vmul.f32 %v1809_v40, %v1809_v40  ;;  %v5590_v45 = vsub.f32 %v5355_v42, %v5491_v8 }
 0x33a   :  { %v1813_v40 = vmul.f32 %v5576_v6, %v5415_v22  ;;  %v5597_v37 = vsub.f32 %v5371_v58, %v5491_v8  ;;  %v5604_v42 = vsub.f32 %v5386_v28, %v5491_v8  ;;  %v5611_v58 = vsub.f32 %v5405_v13, %v5491_v8 }
 0x33b   :  { %v1858_v26 = vadd.f32 %v1857_v0, %v1856_v27  ;;  %v1861_v27 = vsel %vm217_vm0, %v1831_v41, 0.0  ;;  %v1835_v41 = vmul.f32 %v1810_v38, %v1810_v38  ;;  %v1814_v38 = vmul.f32 %v5583_v5, %v5423_v46 }
 0x33c   :  { %v5618_v28 = vsub.f32 %v5425_v51, %v5491_v8  ;;  %v5625_v13 = vsub.f32 %v5437_v49, %v5491_v8  ;;  %v5632_v51 = vsub.f32 %v5449_v47, %v5491_v8  ;;  %v5639_v49 = vsub.f32 %v5461_v29, %v5491_v8 }
 0x33d   :  { %v1860_v15 = vadd.f32 %v1859_v50, %v1858_v26  ;;  %v1863_v26 = vsel %vm217_vm0, %v1832_v54, 0.0  ;;  %v1836_v54 = vmul.f32 %v1811_v59, %v1811_v59  ;;  %v1815_v59 = vmul.f32 %v5590_v45, %v5430_v43 }
 0x33e   :  { %v1798_v47 = vsub.f32 %v5471_v61, %v5491_v8  ;;  %v1799_v29 = vsub.f32 %v5486_v48, %v5491_v8 }
 0x33f   :  { %v1862_v0 = vadd.f32 %v1861_v27, %v1860_v15  ;;  %v1865_v15 = vsel %vm217_vm0, %v1833_v60, 0.0  ;;  %v1837_v60 = vmul.f32 %v1812_v4, %v1812_v4  ;;  %v1816_v4 = vmul.f32 %v5597_v37, %v5435_v31 }
 0x341   :  { %v1864_v50 = vadd.f32 %v1863_v26, %v1862_v0  ;;  %v1867_v0 = vsel %vm217_vm0, %v1834_v25, 0.0  ;;  %v1838_v25 = vmul.f32 %v1813_v40, %v1813_v40  ;;  %v1817_v40 = vmul.f32 %v5604_v42, %v5442_v62 }
 0x343   :  { %v1866_v27 = vadd.f32 %v1865_v15, %v1864_v50  ;;  %v1869_v50 = vsel %vm217_vm0, %v1835_v41, 0.0  ;;  %v1839_v41 = vmul.f32 %v1814_v38, %v1814_v38  ;;  %v1818_v38 = vmul.f32 %v5611_v58, %v5447_v19 }
 0x345   :  { %v1868_v26 = vadd.f32 %v1867_v0, %v1866_v27  ;;  %v1871_v27 = vsel %vm217_vm0, %v1836_v54, 0.0  ;;  %v1840_v54 = vmul.f32 %v1815_v59, %v1815_v59  ;;  %v1819_v59 = vmul.f32 %v5618_v28, %v5454_v52 }
 0x347   :  { %v1870_v15 = vadd.f32 %v1869_v50, %v1868_v26  ;;  %v1873_v26 = vsel %vm217_vm0, %v1837_v60, 0.0  ;;  %v1841_v60 = vmul.f32 %v1816_v4, %v1816_v4  ;;  %v1820_v4 = vmul.f32 %v5625_v13, %v5459_v20 }
 0x348   :  { %v1844_v22 = vmul.f32 %v1819_v59, %v1819_v59  ;;  %v1824_v59 = vmul.f32 %v1799_v29, %v5484_v7 }
 0x349   :  { %v1872_v0 = vadd.f32 %v1871_v27, %v1870_v15  ;;  %v1875_v15 = vsel %vm217_vm0, %v1838_v25, 0.0  ;;  %v1842_v25 = vmul.f32 %v1817_v40, %v1817_v40  ;;  %v1821_v40 = vmul.f32 %v5632_v51, %v5466_v56 }
 0x34a   :  { %v1887_v34 = vsel %vm217_vm0, %v1844_v22, 0.0 }
 0x34b   :  { %v1874_v50 = vadd.f32 %v1873_v26, %v1872_v0  ;;  %v1877_v0 = vsel %vm217_vm0, %v1839_v41, 0.0  ;;  %v1843_v41 = vmul.f32 %v1818_v38, %v1818_v38  ;;  %v1845_v38 = vmul.f32 %v1820_v4, %v1820_v4 }
 0x34c   :  { %v1846_v61 = vmul.f32 %v1821_v40, %v1821_v40  ;;  %v1849_v4 = vmul.f32 %v1824_v59, %v1824_v59 }
 0x34d   :  { %v1876_v27 = vadd.f32 %v1875_v15, %v1874_v50  ;;  %v1879_v50 = vsel %vm217_vm0, %v1840_v54, 0.0  ;;  %v1883_v54 = vsel %vm217_vm0, %v1842_v25, 0.0 }
 0x34e   :  { %v1891_v48 = vsel %vm217_vm0, %v1846_v61, 0.0  ;;  %v1897_v22 = vsel %vm217_vm0, %v1849_v4, 0.0 }
 0x34f   :  { %v1878_v26 = vadd.f32 %v1877_v0, %v1876_v27  ;;  %v1881_v27 = vsel %vm217_vm0, %v1841_v60, 0.0  ;;  %v1885_v60 = vsel %vm217_vm0, %v1843_v41, 0.0 }
 0x351   :  { %v1880_v15 = vadd.f32 %v1879_v50, %v1878_v26  ;;  %v7038_v50 = vld [vmem:[#allocation17_spill] sm:$0xff] }
 0x352   :  { %v1822_v18 = vmul.f32 %v5639_v49, %v7038_v50 }
 0x353   :  { %v1882_v0 = vadd.f32 %v1881_v27, %v1880_v15  ;;  %v7039_v27 = vld [vmem:[#allocation12_spill] sm:$0xff] }
 0x354   :  { %v1823_v10 = vmul.f32 %v1798_v47, %v7039_v27  ;;  %v1847_v25 = vmul.f32 %v1822_v18, %v1822_v18 }
 0x355   :  { %v1884_v26 = vadd.f32 %v1883_v54, %v1882_v0  ;;  %v1889_v0 = vsel %vm217_vm0, %v1845_v38, 0.0 }
 0x356   :  { %v1848_v8 = vmul.f32 %v1823_v10, %v1823_v10  ;;  %v1893_v41 = vsel %vm217_vm0, %v1847_v25, 0.0 }
 0x357   :  { %v1886_v15 = vadd.f32 %v1885_v60, %v1884_v26 }
 0x358   :  { %v1895_v60 = vsel %vm217_vm0, %v1848_v8, 0.0 }
 0x359   :  { %v1888_v55 = vadd.f32 %v1887_v34, %v1886_v15 }
 0x35b   :  { %v1890_v54 = vadd.f32 %v1889_v0, %v1888_v55 }
 0x35d   :  { %v1892_v30 = vadd.f32 %v1891_v48, %v1890_v54 }
 0x35f   :  { %v1894_v26 = vadd.f32 %v1893_v41, %v1892_v30 }
 0x361   :  { %v1896_v40 = vadd.f32 %v1895_v60, %v1894_v26 }
 0x363   :  { %v1898_v34 = vadd.f32 %v1897_v22, %v1896_v40 }
 0x365   :  { %v1899_v15 = vrot.slane %v1898_v34, 4 }
 0x367   :  { %v1900_v43 = vadd.f32 %v1899_v15, %v1898_v34 }
 0x369   :  { %v1901_v18 = vrot.slane %v1900_v43, 2 }
 0x36b   :  { %v1902_v46 = vadd.f32 %v1901_v18, %v1900_v43 }
 0x36d   :  { %v1903_v38 = vrot.slane %v1902_v46, 1 }
 0x36f   :  { %v1904_v55 = vadd.f32 %v1903_v38, %v1902_v46  ;;  %v5671_v46 = vld [vmem:[%s6940_s3 + $0xc0] ss:$0 sm:$0xff] }
 0x371   :  { %v1905_v10 = vmul.f32 0.0078125, %v1904_v55 }
 0x373   :  { %v1906_v0 = vadd.f32 1e-05, %v1905_v10 }
 0x375   :  { %4025 = vrsqrt.f32 %v1906_v0  ;;  %vm1913_vm11 = vweird.f32 %v1906_v0 }
 0x37b   :  { %v4026_v61 = vpop.eup %4025 }
 0x37c   :  { %v1908_v59 = vmul.f32 %v4026_v61, %v1906_v0  ;;  %vm1914_vm10 = vweird.f32 %v4026_v61 }
 0x37d   :  { %vm1915_vm12 = vmor %vm1913_vm11, %vm1914_vm10 }
 0x37e   :  { %v1909_v54 = vmul.f32 %v4026_v61, %v1908_v59 }
 0x380   :  { %v1910_v25 = vmul.f32 0.5, %v1909_v54 }
 0x382   :  { %v1911_v30 = vsub.f32 1.5, %v1910_v25 }
 0x384   :  { %v1912_v8 = vmul.f32 %v4026_v61, %v1911_v30 }
 0x386   :  { %v5662_v48 = vsel %vm1915_vm12, %v4026_v61, %v1912_v8 }
 0x387   :  { %v5666_v4 = vmul.f32 %v5662_v48, %v5555_v35  ;;  %v1931_v43 = vmul.f32 %v5662_v48, %v5583_v5  ;;  %v1932_v41 = vmul.f32 %v5662_v48, %v5590_v45  ;;  %v1933_v26 = vmul.f32 %v5662_v48, %v5597_v37 }
 0x388   :  { %v1934_v60 = vmul.f32 %v5662_v48, %v5604_v42  ;;  %v1935_v35 = vmul.f32 %v5662_v48, %v5611_v58  ;;  %v1936_v40 = vmul.f32 %v5662_v48, %v5618_v28  ;;  %v1937_v22 = vmul.f32 %v5662_v48, %v5625_v13  ;;  %v5698_v58 = vld [vmem:[%s6940_s3 + $0xc1] ss:$0 sm:$0xff] }
 0x389   :  { %v1938_v5 = vmul.f32 %v5662_v48, %v5632_v51  ;;  %v1929_v45 = vmul.f32 %v5662_v48, %v5569_v1  ;;  %v1939_v37 = vmul.f32 %v5662_v48, %v5639_v49  ;;  %v1940_v42 = vmul.f32 %v5662_v48, %v1798_v47 }
 0x38a   :  { %v1941_v34 = vmul.f32 %v5662_v48, %v1799_v29  ;;  %v5702_v28 = vmul.f32 %v5662_v48, %v5562_v63  ;;  %v1957_v13 = vmul.f32 %v5671_v46, %v1931_v43  ;;  %v1958_v1 = vmul.f32 %v5671_v46, %v1932_v41 }
 0x38b   :  { %v1959_v51 = vmul.f32 %v5671_v46, %v1933_v26  ;;  %v1960_v49 = vmul.f32 %v5671_v46, %v1934_v60  ;;  %v1961_v47 = vmul.f32 %v5671_v46, %v1935_v35  ;;  %v1962_v29 = vmul.f32 %v5671_v46, %v1936_v40 }
 0x38c   :  { %v1963_v15 = vmul.f32 %v5671_v46, %v1937_v22  ;;  %v1964_v18 = vmul.f32 %v5671_v46, %v1938_v5  ;;  %v1965_v38 = vmul.f32 %v5671_v46, %v1939_v37  ;;  %v1966_v63 = vmul.f32 %v5671_v46, %v1940_v42 }
 0x38d   :  { %v1967_v55 = vmul.f32 %v5671_v46, %v1941_v34  ;;  %v5717_v10 = vmul.f32 %v5662_v48, %v5576_v6  ;;  %v5720_v0 = vmul.f32 %v5671_v46, %v1929_v45  ;;  %v1985_v61 = vadd.f32 %v5698_v58, %v1959_v51 }
 0x38e   :  { %v1986_v59 = vadd.f32 %v5698_v58, %v1960_v49  ;;  %v1987_v54 = vadd.f32 %v5698_v58, %v1961_v47  ;;  %v1988_v25 = vadd.f32 %v5698_v58, %v1962_v29  ;;  %v1989_v30 = vadd.f32 %v5698_v58, %v1963_v15 }
 0x38f   :  { %v1990_v8 = vadd.f32 %v5698_v58, %v1964_v18  ;;  %v5729_v43 = vadd.f32 %v5698_v58, %v1957_v13  ;;  %v1991_v6 = vadd.f32 %v5698_v58, %v1965_v38  ;;  %v1992_v41 = vadd.f32 %v5698_v58, %v1966_v63 }
 0x390   :  { %v1993_v26 = vadd.f32 %v5698_v58, %v1967_v55  ;;  %v5735_v60 = vadd.f32 %v5698_v58, %v1958_v1  ;;  %v2010_v35 = vmax.f32 %v1985_v61, 0.0  ;;  %v2011_v40 = vmax.f32 %v1986_v59, 0.0 }
 0x391   :  { %v2012_v22 = vmax.f32 %v1987_v54, 0.0  ;;  %v2013_v5 = vmax.f32 %v1988_v25, 0.0  ;;  %v2014_v45 = vmax.f32 %v1989_v30, 0.0  ;;  %v2015_v37 = vmax.f32 %v1990_v8, 0.0 }
 0x392   :  { %v2016_v42 = vmax.f32 %v1991_v6, 0.0  ;;  %v2017_v34 = vmax.f32 %v1992_v41, 0.0  ;;  %v2018_v51 = vmax.f32 %v1993_v26, 0.0  ;;  %v2035_v13 = vmul.f32 %v2010_v35, %v5435_v31 }
 0x393   :  { %v2036_v49 = vmul.f32 %v2011_v40, %v5442_v62  ;;  %v2037_v47 = vmul.f32 %v2012_v22, %v5447_v19  ;;  %v2038_v29 = vmul.f32 %v2013_v5, %v5454_v52  ;;  %v2039_v1 = vmul.f32 %v2014_v45, %v5459_v20 }
 0x394   :  { %v2040_v15 = vmul.f32 %v2015_v37, %v5466_v56  ;;  %v2041_v18 = vmul.f32 %v2016_v42, %v7038_v50  ;;  %v2042_v38 = vmul.f32 %v2017_v34, %v7039_v27  ;;  %v2043_v63 = vmul.f32 %v2018_v51, %v5484_v7  ;;  %2063 = vst.msk [vmem:[#allocation3 + $0x80] sm:$0xff] %vm217_vm0, %v2035_v13 }
 0x395   :  { %v1918_v31 = vmul.f32 %v5662_v48, %v5499_v44  ;;  %2065 = vst.msk [vmem:[#allocation3 + $0x90] sm:$0xff] %vm217_vm0, %v2037_v47  ;;  %v1919_v62 = vmul.f32 %v5662_v48, %v5503_v36  ;;  %v1917_v19 = vmul.f32 %v5662_v48, %v5495_v3  ;;  %v1920_v52 = vmul.f32 %v5662_v48, %v5509_v17 }
 0x396   :  { %v1921_v20 = vmul.f32 %v5662_v48, %v5515_v24  ;;  %2066 = vst.msk [vmem:[#allocation3 + $0x98] sm:$0xff] %vm217_vm0, %v2038_v29  ;;  %v1922_v7 = vmul.f32 %v5662_v48, %v5521_v16  ;;  %v1923_v44 = vmul.f32 %v5662_v48, %v5527_v53  ;;  %v1924_v36 = vmul.f32 %v5662_v48, %v5534_v14 }
 0x397   :  { %v1944_v56 = vmul.f32 %v5671_v46, %v1918_v31  ;;  %2067 = vst.msk [vmem:[#allocation3 + $0xa0] sm:$0xff] %vm217_vm0, %v2039_v1  ;;  %v1945_v3 = vmul.f32 %v5671_v46, %v1919_v62  ;;  %v1943_v17 = vmul.f32 %v5671_v46, %v1917_v19  ;;  %v1946_v24 = vmul.f32 %v5671_v46, %v1920_v52  ;;  %v7042_v62 = vld [vmem:[#allocation5_spill] sm:$0xff] }
 0x398   :  { %v1947_v50 = vmul.f32 %v5671_v46, %v1921_v20  ;;  %2068 = vst.msk [vmem:[#allocation3 + $0xa8] sm:$0xff] %vm217_vm0, %v2040_v15  ;;  %v1948_v27 = vmul.f32 %v5671_v46, %v1922_v7  ;;  %v1949_v53 = vmul.f32 %v5671_v46, %v1923_v44  ;;  %v1950_v14 = vmul.f32 %v5671_v46, %v1924_v36  ;;  %v7044_v36 = vld [vmem:[#allocation29_spill] sm:$0xff] }
 0x399   :  { %v1970_v16 = vadd.f32 %v5698_v58, %v1944_v56  ;;  %2069 = vst.msk [vmem:[#allocation3 + $0xb0] sm:$0xff] %vm217_vm0, %v2041_v18  ;;  %v1971_v55 = vadd.f32 %v5698_v58, %v1945_v3  ;;  %v1969_v61 = vadd.f32 %v5698_v58, %v1943_v17  ;;  %v1972_v59 = vadd.f32 %v5698_v58, %v1946_v24  ;;  %v7045_v17 = vld [vmem:[#allocation19_spill] sm:$0xff] }
 0x39a   :  { %v1973_v54 = vadd.f32 %v5698_v58, %v1947_v50  ;;  %2070 = vst.msk [vmem:[#allocation3 + $0xb8] sm:$0xff] %vm217_vm0, %v2042_v38  ;;  %v1974_v30 = vadd.f32 %v5698_v58, %v1948_v27  ;;  %v1975_v8 = vadd.f32 %v5698_v58, %v1949_v53  ;;  %v1976_v6 = vadd.f32 %v5698_v58, %v1950_v14  ;;  %v7046_v50 = vld [vmem:[#allocation26_spill] sm:$0xff]  ;;  %v7047_v27 = vld [vmem:[#allocation8_spill] sm:$0xff] }
 0x39b   :  { %v1995_v25 = vmax.f32 %v1970_v16, 0.0  ;;  %2071 = vst.msk [vmem:[#allocation3 + $0xc0] sm:$0xff] %vm217_vm0, %v2043_v63  ;;  %v1996_v41 = vmax.f32 %v1971_v55, 0.0  ;;  %v1994_v26 = vmax.f32 %v1969_v61, 0.0  ;;  %v1997_v35 = vmax.f32 %v1972_v59, 0.0 }
 0x39c   :  { %v1998_v40 = vmax.f32 %v1973_v54, 0.0  ;;  %2064 = vst.msk [vmem:[#allocation3 + $0x88] sm:$0xff] %vm217_vm0, %v2036_v49  ;;  %v1999_v5 = vmax.f32 %v1974_v30, 0.0  ;;  %v2000_v45 = vmax.f32 %v1975_v8, 0.0  ;;  %v2001_v37 = vmax.f32 %v1976_v6, 0.0 }
 0x39d   :  { %v2020_v22 = vmul.f32 %v1995_v25, %v5342_v32  ;;  %v1956_v42 = vmul.f32 %v5671_v46, %v5717_v10  ;;  %v2021_v34 = vmul.f32 %v1996_v41, %v5336_v33  ;;  %v2019_v51 = vmul.f32 %v1994_v26, %v5332_v23 }
 0x39e   :  { %v2022_v13 = vmul.f32 %v1997_v35, %v5340_v21  ;;  %v2008_v47 = vmax.f32 %v5729_v43, 0.0  ;;  %v2009_v29 = vmax.f32 %v5735_v60, 0.0  ;;  %v2023_v32 = vmul.f32 %v1998_v40, %v5352_v2 }
 0x39f   :  { %2048 = vst.msk [vmem:[#allocation3 + $0x8] sm:$0xff] %vm217_vm0, %v2020_v22  ;;  %v2024_v49 = vmul.f32 %v1999_v5, %v5359_v39  ;;  %v1925_v10 = vmul.f32 %v5662_v48, %v5541_v12  ;;  %v1926_v23 = vmul.f32 %v5662_v48, %v5548_v57  ;;  %v1953_v33 = vmul.f32 %v5671_v46, %v5666_v4 }
 0x3a0   :  { %2049 = vst.msk [vmem:[#allocation3 + $0x10] sm:$0xff] %vm217_vm0, %v2021_v34  ;;  %v2025_v21 = vmul.f32 %v2000_v45, %v5367_v11  ;;  %v2026_v43 = vmul.f32 %v2001_v37, %v5373_v9  ;;  %v1954_v2 = vmul.f32 %v5671_v46, %v5702_v28  ;;  %v1981_v39 = vadd.f32 %v5698_v58, %v5720_v0  ;;  %v7040_v11 = vld [vmem:[#allocation15_spill] sm:$0xff]  ;;  %v7041_v28 = vld [vmem:[#allocation30_spill] sm:$0xff] }
 0x3a1   :  { %2047 = vst.msk [vmem:[#allocation3] sm:$0xff] %vm217_vm0, %v2019_v51  ;;  %v1951_v12 = vmul.f32 %v5671_v46, %v1925_v10  ;;  %v1952_v57 = vmul.f32 %v5671_v46, %v1926_v23  ;;  %v1979_v48 = vadd.f32 %v5698_v58, %v1953_v33  ;;  %v1982_v4 = vadd.f32 %v5698_v58, %v1956_v42  ;;  %v3210_v23 = vld [vmem:[%s6940_s3 + $0xa8] sm:$0xff]  ;;  %v3209_v33 = vld [vmem:[%s6940_s3 + $0xa0] sm:$0xff] }
 0x3a2   :  { %2050 = vst.msk [vmem:[#allocation3 + $0x18] sm:$0xff] %vm217_vm0, %v2022_v13  ;;  %v2033_v9 = vmul.f32 %v2008_v47, %v7040_v11  ;;  %v1980_v60 = vadd.f32 %v5698_v58, %v1954_v2  ;;  %v2034_v0 = vmul.f32 %v2009_v29, %v7041_v28  ;;  %v2006_v38 = vmax.f32 %v1981_v39, 0.0  ;;  %v3212_v47 = vld [vmem:[%s6940_s3 + $0xb8] sm:$0x3]  ;;  %v3211_v29 = vld [vmem:[%s6940_s3 + $0xb0] sm:$0xff]  ;;  %v3202_v28 = vld [vmem:[%s6940_s3 + $0x68] sm:$0xff] }
 0x3a3   :  { %2051 = vst.msk [vmem:[#allocation3 + $0x20] sm:$0xff] %vm217_vm0, %v2023_v32  ;;  %v1977_v1 = vadd.f32 %v5698_v58, %v1951_v12  ;;  %v1978_v15 = vadd.f32 %v5698_v58, %v1952_v57  ;;  %v2004_v18 = vmax.f32 %v1979_v48, 0.0  ;;  %v2007_v52 = vmax.f32 %v1982_v4, 0.0  ;;  %v7043_v58 = vld [vmem:[#allocation23_spill] sm:$0xff]  ;;  %3948 = vmatpush.msk.msra.mxu1 %vm1471_vm1, %v3212_v47  ;;  %3989 = vmatpush.msk.msra.mxu2 %vm1471_vm1, %v3212_v47  ;;  %v3207_v2 = vld [vmem:[%s6940_s3 + $0x90] sm:$0xff]  ;;  %v3205_v48 = vld [vmem:[%s6940_s3 + $0x80] sm:$0xff] }
 0x3a4   :  { %2052 = vst.msk [vmem:[#allocation3 + $0x28] sm:$0xff] %vm217_vm0, %v2024_v49  ;;  %v2005_v46 = vmax.f32 %v1980_v60, 0.0  ;;  %v2031_v16 = vmul.f32 %v2006_v38, %v7046_v50  ;;  %v3206_v12 = vld [vmem:[%s6940_s3 + $0x88] sm:$0xff]  ;;  %v3204_v4 = vld [vmem:[%s6940_s3 + $0x78] sm:$0xff] }
 0x3a5   :  { %2053 = vst.msk [vmem:[#allocation3 + $0x30] sm:$0xff] %vm217_vm0, %v2025_v21  ;;  %v2002_v63 = vmax.f32 %v1977_v1, 0.0  ;;  %v2003_v31 = vmax.f32 %v1978_v15, 0.0  ;;  %v2029_v19 = vmul.f32 %v2004_v18, %v7042_v62  ;;  %v2032_v53 = vmul.f32 %v2007_v52, %v7047_v27  ;;  %3296 = vmatpush.msra.mxu1 %v3211_v29  ;;  %3990 = vmatpush.msra.mxu2 %v3211_v29  ;;  %v3208_v21 = vld [vmem:[%s6940_s3 + $0x98] sm:$0xff]  ;;  %v3201_v1 = vld [vmem:[%s6940_s3 + $0x60] sm:$0xff] }
 0x3a6   :  { %2054 = vst.msk [vmem:[#allocation3 + $0x38] sm:$0xff] %vm217_vm0, %v2026_v43  ;;  %v2030_v24 = vmul.f32 %v2005_v46, %v7045_v17 }
 0x3a7   :  { %v2123_v20 = vld [vmem:[#allocation3 + $0xa] sm:$0xff]  ;;  %2061 = vst.msk [vmem:[#allocation3 + $0x70] sm:$0xff] %vm217_vm0, %v2033_v9  ;;  %v2027_v44 = vmul.f32 %v2002_v63, %v7043_v58  ;;  %v2028_v3 = vmul.f32 %v2003_v31, %v7044_v36  ;;  %3297 = vmatpush.msra.mxu1 %v3210_v23  ;;  %3991 = vmatpush.msra.mxu2 %v3210_v23  ;;  %v3203_v9 = vld [vmem:[%s6940_s3 + $0x70] sm:$0xff] }
 0x3a8   :  { %2450 = vrot.lane.b32.xlu0 %v2123_v20, %s4064_s6  ;;  %v2122_v56 = vld [vmem:[#allocation3 + $0x2] sm:$0xff]  ;;  %2062 = vst.msk [vmem:[#allocation3 + $0x78] sm:$0xff] %vm217_vm0, %v2034_v0  ;;  %v2173_v55 = vld [vmem:[#allocation3 + $0xc] sm:$0xff] }
 0x3a9   :  { %v2097_v7 = vld [vmem:[#allocation3 + $0x1] sm:$0xff]  ;;  %2374 = vrot.lane.b32.xlu2 %v2122_v56, %s4063_s5  ;;  %2057 = vst.msk [vmem:[#allocation3 + $0x50] sm:$0xff] %vm217_vm0, %v2029_v19  ;;  %v2174_v14 = vld [vmem:[#allocation3 + $0x14] sm:$0xff]  ;;  %v2148_v61 = vld [vmem:[#allocation3 + $0xb] sm:$0xff]  ;;  %3298 = vmatpush.msra.mxu1 %v3209_v33 }
 0x3aa   :  { %2274 = vrot.lane.b32.xlu1 %v2097_v7, %s4062_s15  ;;  %2055 = vst.msk [vmem:[#allocation3 + $0x40] sm:$0xff] %vm217_vm0, %v2027_v44  ;;  %v2098_v59 = vld [vmem:[#allocation3 + $0x9] sm:$0xff]  ;;  %v2224_v54 = vld [vmem:[#allocation3 + $0x16] sm:$0xff]  ;;  %v2225_v35 = vld [vmem:[#allocation3 + $0x1e] sm:$0xff]  ;;  %3992 = vmatpush.msra.mxu2 %v3209_v33 }
 0x3ab   :  { %2056 = vst.msk [vmem:[#allocation3 + $0x48] sm:$0xff] %vm217_vm0, %v2028_v3  ;;  %v2199_v25 = vld [vmem:[#allocation3 + $0x15] sm:$0xff]  ;;  %v2200_v6 = vld [vmem:[#allocation3 + $0x1d] sm:$0xff]  ;;  %v2226_v5 = vld [vmem:[#allocation3 + $0x26] sm:$0xff]  ;;  %3299 = vmatpush.msra.mxu1 %v3208_v21 }
 0x3ac   :  { %2058 = vst.msk [vmem:[#allocation3 + $0x58] sm:$0xff] %vm217_vm0, %v2030_v24  ;;  %v2149_v30 = vld [vmem:[#allocation3 + $0x13] sm:$0xff]  ;;  %v2175_v41 = vld [vmem:[#allocation3 + $0x1c] sm:$0xff]  ;;  %v2201_v45 = vld [vmem:[#allocation3 + $0x25] sm:$0xff]  ;;  %3993 = vmatpush.msra.mxu2 %v3208_v21 }
 0x3ad   :  { %2059 = vst.msk [vmem:[#allocation3 + $0x60] sm:$0xff] %vm217_vm0, %v2031_v16  ;;  %v2124_v8 = vld [vmem:[#allocation3 + $0x12] sm:$0xff]  ;;  %v2150_v40 = vld [vmem:[#allocation3 + $0x1b] sm:$0xff]  ;;  %v2176_v37 = vld [vmem:[#allocation3 + $0x24] sm:$0xff]  ;;  %3300 = vmatpush.msra.mxu1 %v3207_v2 }
 0x3ae   :  { %2060 = vst.msk [vmem:[#allocation3 + $0x68] sm:$0xff] %vm217_vm0, %v2032_v53  ;;  %v2099_v26 = vld [vmem:[#allocation3 + $0x11] sm:$0xff]  ;;  %v2125_v22 = vld [vmem:[#allocation3 + $0x1a] sm:$0xff]  ;;  %v2126_v42 = vld [vmem:[#allocation3 + $0x22] sm:$0xff]  ;;  %3994 = vmatpush.msra.mxu2 %v3207_v2 }
 0x3af   :  { %v2100_v34 = vld [vmem:[#allocation3 + $0x19] sm:$0xff]  ;;  %v2177_v51 = vld [vmem:[#allocation3 + $0x2c] sm:$0xff]  ;;  %v2151_v13 = vld [vmem:[#allocation3 + $0x23] sm:$0xff]  ;;  %3301 = vmatpush.msra.mxu1 %v3206_v12 }
 0x3b0   :  { %2726 = vrot.lane.b32.xlu0 %v2174_v14, %s4067_s17  ;;  %v2101_v32 = vld [vmem:[#allocation3 + $0x21] sm:$0xff]  ;;  %v2227_v49 = vld [vmem:[#allocation3 + $0x2e] sm:$0xff]  ;;  %3995 = vmatpush.msra.mxu2 %v3206_v12  ;;  %v2228_v46 = vld [vmem:[#allocation3 + $0x36] sm:$0xff] }
 0x3b1   :  { %2650 = vrot.lane.b32.xlu2 %v2173_v55, %s4066_s16  ;;  %v2202_v10 = vld [vmem:[#allocation3 + $0x2d] sm:$0xff]  ;;  %3302 = vmatpush.msra.mxu1 %v3205_v48  ;;  %v2203_v11 = vld [vmem:[#allocation3 + $0x35] sm:$0xff] }
 0x3b2   :  { %2550 = vrot.lane.b32.xlu1 %v2148_v61, %s4065_s0  ;;  %v2152_v43 = vld [vmem:[#allocation3 + $0x2b] sm:$0xff]  ;;  %v2178_v60 = vld [vmem:[#allocation3 + $0x34] sm:$0xff]  ;;  %3996 = vmatpush.msra.mxu2 %v3205_v48  ;;  %v5933_v27 = vld [vmem:[#allocation3 + $0x3c] sm:$0xff] }
 0x3b3   :  { %v2127_v39 = vld [vmem:[#allocation3 + $0x2a] sm:$0xff]  ;;  %3303 = vmatpush.msra.mxu1 %v3204_v4  ;;  %v2128_v63 = vld [vmem:[#allocation3 + $0x32] sm:$0xff]  ;;  %v2162_v7 = vld [vmem:[#allocation3 + $0x7b] sm:$0xff] }
 0x3b4   :  { %3997 = vmatpush.msra.mxu2 %v3204_v4  ;;  %v2111_v15 = vld [vmem:[#allocation3 + $0x71] sm:$0xff]  ;;  %v2102_v18 = vld [vmem:[#allocation3 + $0x29] sm:$0xff]  ;;  %v2137_v44 = vld [vmem:[#allocation3 + $0x7a] sm:$0xff] }
 0x3b5   :  { %3304 = vmatpush.msra.mxu1 %v3203_v9  ;;  %v5921_v31 = vld [vmem:[#allocation3 + $0x72] sm:$0xff]  ;;  %v2154_v12 = vld [vmem:[#allocation3 + $0x3b] sm:$0xff] }
 0x3b6   :  { %3998 = vmatpush.msra.mxu2 %v3203_v9  ;;  %v2153_v58 = vld [vmem:[#allocation3 + $0x33] sm:$0xff] }
 0x3b7   :  { %3305 = vmatpush.msra.mxu1 %v3202_v28  ;;  %v2112_v23 = vld [vmem:[#allocation3 + $0x79] sm:$0xff]  ;;  %v2074_v4 = vld [vmem:[#allocation3 + $0x10] sm:$0xff] }
 0x3b8   :  { %2276 = vrot.lane.b32.xlu0 %v2098_v59, %s4062_s15  ;;  %3999 = vmatpush.msra.mxu2 %v3202_v28  ;;  %v2129_v48 = vld [vmem:[#allocation3 + $0x3a] sm:$0xff] }
 0x3b9   :  { %2926 = vrot.lane.b32.xlu2 %v2224_v54, %s4068_s18  ;;  %3306 = vmatpush.msra.mxu1 %v3201_v1 }
 0x3ba   :  { %2826 = vrot.lane.b32.xlu1 %v2199_v25, %s4069_s19  ;;  %4000 = vmatpush.msra.mxu2 %v3201_v1 }
 0x3c0   :  { %2552 = vrot.lane.b32.xlu0 %v2149_v30, %s4065_s0 }
 0x3c1   :  { %2452 = vrot.lane.b32.xlu2 %v2124_v8, %s4064_s6 }
 0x3c2   :  { %2376 = vrot.lane.b32.xlu1 %v2123_v20, %s4063_s5  ;;  %v2072_v20 = vld [vmem:[#allocation3] sm:$0xff] }
 0x3c8   :  { %2828 = vrot.lane.b32.xlu0 %v2200_v6, %s4069_s19  ;;  %v2204_v6 = vld [vmem:[#allocation3 + $0x3d] sm:$0xff] }
 0x3c9   :  { %2728 = vrot.lane.b32.xlu2 %v2175_v41, %s4067_s17 }
 0x3ca   :  { %2652 = vrot.lane.b32.xlu1 %v2174_v14, %s4066_s16  ;;  %v2187_v14 = vld [vmem:[#allocation3 + $0x7c] sm:$0xff] }
 0x3d0   :  { %2378 = vrot.lane.b32.xlu0 %v2124_v8, %s4063_s5  ;;  %v2213_v8 = vld [vmem:[#allocation3 + $0x85] sm:$0xff] }
 0x3d1   :  { %2278 = vrot.lane.b32.xlu2 %v2099_v26, %s4062_s15 }
 0x3d2   :  { %2928 = vrot.lane.b32.xlu1 %v2225_v35, %s4068_s18 }
 0x3d8   :  { %2654 = vrot.lane.b32.xlu0 %v2175_v41, %s4066_s16  ;;  %v2188_v41 = vld [vmem:[#allocation3 + $0x84] sm:$0xff] }
 0x3d9   :  { %2554 = vrot.lane.b32.xlu2 %v2150_v40, %s4065_s0 }
 0x3da   :  { %2454 = vrot.lane.b32.xlu1 %v2125_v22, %s4064_s6 }
 0x3e0   :  { %2930 = vrot.lane.b32.xlu0 %v2226_v5, %s4068_s18 }
 0x3e1   :  { %2830 = vrot.lane.b32.xlu2 %v2201_v45, %s4069_s19 }
 0x3e2   :  { %2730 = vrot.lane.b32.xlu1 %v2176_v37, %s4067_s17 }
 0x3e8   :  { %2456 = vrot.lane.b32.xlu0 %v2126_v42, %s4064_s6 }
 0x3e9   :  { %2380 = vrot.lane.b32.xlu2 %v2125_v22, %s4063_s5  ;;  %v2073_v22 = vld [vmem:[#allocation3 + $0x8] sm:$0xff] }
 0x3ea   :  { %2280 = vrot.lane.b32.xlu1 %v2100_v34, %s4062_s15  ;;  %v2229_v34 = vld [vmem:[#allocation3 + $0x3e] sm:$0xff] }
 0x3f0   :  { %2732 = vrot.lane.b32.xlu0 %v2177_v51, %s4067_s17 }
 0x3f1   :  { %2656 = vrot.lane.b32.xlu2 %v2176_v37, %s4066_s16  ;;  %v2103_v37 = vld [vmem:[#allocation3 + $0x31] sm:$0xff] }
 0x3f2   :  { %2556 = vrot.lane.b32.xlu1 %v2151_v13, %s4065_s0 }
 0x3f8   :  { %2282 = vrot.lane.b32.xlu0 %v2101_v32, %s4062_s15 }
 0x3f9   :  { %2932 = vrot.lane.b32.xlu2 %v2227_v49, %s4068_s18 }
 0x3fa   :  { %2832 = vrot.lane.b32.xlu1 %v2202_v10, %s4069_s19 }
 0x400   :  { %2558 = vrot.lane.b32.xlu0 %v2152_v43, %s4065_s0 }
 0x401   :  { %2458 = vrot.lane.b32.xlu2 %v2127_v39, %s4064_s6 }
 0x402   :  { %2382 = vrot.lane.b32.xlu1 %v2126_v42, %s4063_s5  ;;  %v2238_v42 = vld [vmem:[#allocation3 + $0x86] sm:$0xff] }
 0x403   :  { %v2375_v57 = vpop.permute.xlu2 %2374 }
 0x408   :  { %2834 = vrot.lane.b32.xlu0 %v2203_v11, %s4069_s19 }
 0x409   :  { %2734 = vrot.lane.b32.xlu2 %v2178_v60, %s4067_s17 }
 0x40a   :  { %2658 = vrot.lane.b32.xlu1 %v2177_v51, %s4066_s16 }
 0x40b   :  { %v2651_v0 = vpop.permute.xlu2 %2650 }
 0x410   :  { %2302 = vrot.lane.b32.xlu0 %v2111_v15, %s4062_s15 }
 0x411   :  { %2284 = vrot.lane.b32.xlu2 %v2102_v18, %s4062_s15  ;;  %v2163_v18 = vld [vmem:[#allocation3 + $0x83] sm:$0xff] }
 0x412   :  { %2934 = vrot.lane.b32.xlu1 %v2228_v46, %s4068_s18 }
 0x413   :  { %v2927_v38 = vpop.permute.xlu2 %2926 }
 0x418   :  { %2460 = vrot.lane.b32.xlu0 %v2128_v63, %s4064_s6 }
 0x419   :  { %2402 = vrot.lane.b32.xlu2 %v5921_v31, %s4063_s5 }
 0x41a   :  { %2384 = vrot.lane.b32.xlu1 %v2127_v39, %s4063_s5  ;;  %v2451_v62 = vpop.permute.xlu0 %2450 }
 0x41b   :  { %v2453_v19 = vpop.permute.xlu2 %2452 }
 0x41c   :  { %v2275_v52 = vpop.permute.xlu1 %2274 }
 0x41d   :  { %v3001_v56 = vsel %vm217_vm0, %v2072_v20, %v2275_v52 }
 0x41e   :  { %v3026_v36 = vsel %vm1201_vm3, %v3001_v56, %v2375_v57  ;;  %v5963_v57 = vld [vmem:[#allocation3 + $0x82] sm:$0xff] }
 0x41f   :  { %v3051_v50 = vsel %vm1227_vm2, %v3026_v36, %v2451_v62  ;;  %v2205_v56 = vld [vmem:[#allocation3 + $0x45] sm:$0xff] }
 0x420   :  { %2578 = vrot.lane.b32.xlu0 %v2162_v7, %s4065_s0  ;;  %v2189_v7 = vld [vmem:[#allocation3 + $0x8c] sm:$0xff] }
 0x421   :  { %2560 = vrot.lane.b32.xlu2 %v2153_v58, %s4065_s0  ;;  %v2180_v58 = vld [vmem:[#allocation3 + $0x44] sm:$0xff] }
 0x422   :  { %2478 = vrot.lane.b32.xlu1 %v2137_v44, %s4064_s6  ;;  %v2727_v3 = vpop.permute.xlu0 %2726 }
 0x423   :  { %v2729_v17 = vpop.permute.xlu2 %2728 }
 0x424   :  { %v2551_v24 = vpop.permute.xlu1 %2550 }
 0x425   :  { %v3076_v16 = vsel %vm1253_vm4, %v3051_v50, %v2551_v24  ;;  %v2239_v50 = vld [vmem:[#allocation3 + $0x8e] sm:$0xff] }
 0x426   :  { %v3101_v53 = vsel %vm1279_vm5, %v3076_v16, %v2651_v0  ;;  %v2230_v16 = vld [vmem:[#allocation3 + $0x46] sm:$0xff] }
 0x427   :  { %v3126_v54 = vsel %vm1305_vm6, %v3101_v53, %v2727_v3 }
 0x428   :  { %2736 = vrot.lane.b32.xlu0 %v5933_v27, %s4067_s17 }
 0x429   :  { %2678 = vrot.lane.b32.xlu2 %v2187_v14, %s4066_s16 }
 0x42a   :  { %2660 = vrot.lane.b32.xlu1 %v2178_v60, %s4066_s16  ;;  %v2277_v55 = vpop.permute.xlu0 %2276 }
 0x42b   :  { %v2279_v61 = vpop.permute.xlu2 %2278  ;;  %v3002_v5 = vsel %vm217_vm0, %v2073_v22, %v2277_v55 }
 0x42c   :  { %v2827_v59 = vpop.permute.xlu1 %2826  ;;  %v3003_v9 = vsel %vm217_vm0, %v2074_v4, %v2279_v61 }
 0x42d   :  { %v3151_v25 = vsel %vm1331_vm7, %v3126_v54, %v2827_v59 }
 0x42e   :  { %v3176_v30 = vsel %vm1357_vm8, %v3151_v25, %v2927_v38 }
 0x42f   :  { %3949 = vmatmul.msk.f32.vlgmr.msra.gmra.mxu1 %vm1395_vm9, %v3176_v30  ;;  %v2113_v30 = vld [vmem:[#allocation3 + $0x81] sm:$0xff] }
 0x430   :  { %2854 = vrot.lane.b32.xlu0 %v2213_v8, %s4069_s19  ;;  %v2104_v8 = vld [vmem:[#allocation3 + $0x39] sm:$0xff] }
 0x431   :  { %2836 = vrot.lane.b32.xlu2 %v2204_v6, %s4069_s19 }
 0x432   :  { %2754 = vrot.lane.b32.xlu1 %v2188_v41, %s4067_s17  ;;  %v2553_v26 = vpop.permute.xlu0 %2552 }
 0x433   :  { %v2555_v35 = vpop.permute.xlu2 %2554 }
 0x434   :  { %v2377_v40 = vpop.permute.xlu1 %2376 }
 0x435   :  { %v3027_v45 = vsel %vm1201_vm3, %v3002_v5, %v2377_v40  ;;  %v2139_v5 = vld [vmem:[#allocation3 + $0x8a] sm:$0xff] }
 0x436   :  { %v3052_v51 = vsel %vm1227_vm2, %v3027_v45, %v2453_v19  ;;  %v2130_v45 = vld [vmem:[#allocation3 + $0x42] sm:$0xff] }
 0x437   :  { %v3077_v32 = vsel %vm1253_vm4, %v3052_v51, %v2553_v26  ;;  %v2076_v51 = vld [vmem:[#allocation3 + $0x20] sm:$0xff] }
 0x438   :  { %2286 = vrot.lane.b32.xlu0 %v2103_v37, %s4062_s15 }
 0x439   :  { %2954 = vrot.lane.b32.xlu2 %v2238_v42, %s4068_s18 }
 0x43a   :  { %2936 = vrot.lane.b32.xlu1 %v2229_v34, %s4068_s18  ;;  %v2829_v13 = vpop.permute.xlu0 %2828 }
 0x43b   :  { %v2831_v47 = vpop.permute.xlu2 %2830 }
 0x43c   :  { %v2653_v29 = vpop.permute.xlu1 %2652 }
 0x43d   :  { %v3102_v49 = vsel %vm1279_vm5, %v3077_v32, %v2653_v29  ;;  %v2164_v29 = vld [vmem:[#allocation3 + $0x8b] sm:$0xff]  ;;  %v2155_v32 = vld [vmem:[#allocation3 + $0x43] sm:$0xff] }
 0x43e   :  { %v3127_v10 = vsel %vm1305_vm6, %v3102_v49, %v2729_v17  ;;  %v2075_v17 = vld [vmem:[#allocation3 + $0x18] sm:$0xff] }
 0x43f   :  { %v3152_v2 = vsel %vm1331_vm7, %v3127_v10, %v2829_v13 }
 0x440   :  { %2404 = vrot.lane.b32.xlu0 %v2137_v44, %s4063_s5 }
 0x441   :  { %2386 = vrot.lane.b32.xlu2 %v2128_v63, %s4063_s5 }
 0x442   :  { %2304 = vrot.lane.b32.xlu1 %v2112_v23, %s4062_s15  ;;  %v2379_v33 = vpop.permute.xlu0 %2378 }
 0x443   :  { %v2381_v21 = vpop.permute.xlu2 %2380  ;;  %v3028_v0 = vsel %vm1201_vm3, %v3003_v9, %v2379_v33 }
 0x444   :  { %v2929_v43 = vpop.permute.xlu1 %2928 }
 0x445   :  { %v3177_v39 = vsel %vm1357_vm8, %v3152_v2, %v2929_v43  ;;  %v6013_v2 = vld [vmem:[#allocation3 + $0x94] sm:$0xff] }
 0x446   :  { %3950 = vmatmul.msk.f32.gmra.mxu1 %vm1395_vm9, %v3177_v39 }
 0x448   :  { %2562 = vrot.lane.b32.xlu0 %v2154_v12, %s4065_s0  ;;  %v2181_v12 = vld [vmem:[#allocation3 + $0x4c] sm:$0xff] }
 0x449   :  { %2480 = vrot.lane.b32.xlu2 %v5963_v57, %s4064_s6 }
 0x44a   :  { %2462 = vrot.lane.b32.xlu1 %v2129_v48, %s4064_s6  ;;  %v2655_v11 = vpop.permute.xlu0 %2654 }
 0x44b   :  { %v2657_v60 = vpop.permute.xlu2 %2656 }
 0x44c   :  { %v2455_v28 = vpop.permute.xlu1 %2454 }
 0x44d   :  { %v3053_v1 = vsel %vm1227_vm2, %v3028_v0, %v2455_v28  ;;  %v2215_v28 = vld [vmem:[#allocation3 + $0x95] sm:$0xff]  ;;  %v2206_v0 = vld [vmem:[#allocation3 + $0x4d] sm:$0xff] }
 0x44e   :  { %v3078_v15 = vsel %vm1253_vm4, %v3053_v1, %v2555_v35 }
 0x44f   :  { %v3103_v63 = vsel %vm1279_vm5, %v3078_v15, %v2655_v11 }
 0x450   :  { %2680 = vrot.lane.b32.xlu0 %v2188_v41, %s4066_s16 }
 0x451   :  { %2662 = vrot.lane.b32.xlu2 %v5933_v27, %s4066_s16  ;;  %v2214_v27 = vld [vmem:[#allocation3 + $0x8d] sm:$0xff] }
 0x452   :  { %2580 = vrot.lane.b32.xlu1 %v2163_v18, %s4065_s0  ;;  %v2931_v46 = vpop.permute.xlu0 %2930 }
 0x453   :  { %v2933_v38 = vpop.permute.xlu2 %2932 }
 0x454   :  { %v2731_v62 = vpop.permute.xlu1 %2730 }
 0x455   :  { %v3128_v19 = vsel %vm1305_vm6, %v3103_v63, %v2731_v62  ;;  %v2240_v63 = vld [vmem:[#allocation3 + $0x96] sm:$0xff] }
 0x456   :  { %v3153_v52 = vsel %vm1331_vm7, %v3128_v19, %v2831_v47 }
 0x457   :  { %v3178_v20 = vsel %vm1357_vm8, %v3153_v52, %v2931_v46  ;;  %v2114_v46 = vld [vmem:[#allocation3 + $0x89] sm:$0xff] }
 0x458   :  { %3951 = vmatmul.msk.f32.gmra.mxu1 %vm1395_vm9, %v3178_v20  ;;  %2838 = vrot.lane.b32.xlu0 %v2205_v56, %s4069_s19  ;;  %v6029_v20 = vld [vmem:[#allocation3 + $0x4a] sm:$0xff] }
 0x459   :  { %2756 = vrot.lane.b32.xlu2 %v2189_v7, %s4067_s17  ;;  %v2086_v56 = vld [vmem:[#allocation3 + $0x70] sm:$0xff] }
 0x45a   :  { %2738 = vrot.lane.b32.xlu1 %v2180_v58, %s4067_s17  ;;  %v2457_v44 = vpop.permute.xlu0 %2456 }
 0x45b   :  { %v2459_v36 = vpop.permute.xlu2 %2458 }
 0x45c   :  { %v2281_v3 = vpop.permute.xlu1 %2280 }
 0x45d   :  { %v3004_v24 = vsel %vm217_vm0, %v2075_v17, %v2281_v3  ;;  %v2077_v3 = vld [vmem:[#allocation3 + $0x28] sm:$0xff] }
 0x45e   :  { %v3029_v53 = vsel %vm1201_vm3, %v3004_v24, %v2381_v21 }
 0x45f   :  { %v3054_v59 = vsel %vm1227_vm2, %v3029_v53, %v2457_v44 }
 0x460   :  { %2956 = vrot.lane.b32.xlu0 %v2239_v50, %s4068_s18 }
 0x461   :  { %2938 = vrot.lane.b32.xlu2 %v2230_v16, %s4068_s18 }
 0x462   :  { %2856 = vrot.lane.b32.xlu1 %v2214_v27, %s4069_s19  ;;  %v2733_v14 = vpop.permute.xlu0 %2732  ;;  %v2165_v27 = vld [vmem:[#allocation3 + $0x93] sm:$0xff] }
 0x463   :  { %v2735_v55 = vpop.permute.xlu2 %2734 }
 0x464   :  { %v2557_v61 = vpop.permute.xlu1 %2556 }
 0x465   :  { %v3079_v54 = vsel %vm1253_vm4, %v3054_v59, %v2557_v61 }
 0x466   :  { %v3104_v25 = vsel %vm1279_vm5, %v3079_v54, %v2657_v60  ;;  %v2231_v60 = vld [vmem:[#allocation3 + $0x4e] sm:$0xff] }
 0x467   :  { %v3129_v26 = vsel %vm1305_vm6, %v3104_v25, %v2733_v14  ;;  %v2156_v14 = vld [vmem:[#allocation3 + $0x4b] sm:$0xff] }
 0x468   :  { %2388 = vrot.lane.b32.xlu0 %v2129_v48, %s4063_s5 }
 0x469   :  { %2306 = vrot.lane.b32.xlu2 %v2113_v30, %s4062_s15 }
 0x46a   :  { %2288 = vrot.lane.b32.xlu1 %v2104_v8, %s4062_s15  ;;  %v2283_v6 = vpop.permute.xlu0 %2282 }
 0x46b   :  { %v5995_v41 = vpop.permute.xlu2 %2284  ;;  %v3005_v13 = vsel %vm217_vm0, %v2076_v51, %v2283_v6  ;;  %v2216_v51 = vld [vmem:[#allocation3 + $0x9d] sm:$0xff] }
 0x46c   :  { %v2833_v35 = vpop.permute.xlu1 %2832  ;;  %v3006_v24 = vsel %vm217_vm0, %v2077_v3, %v5995_v41  ;;  %v2166_v3 = vld [vmem:[#allocation3 + $0x9b] sm:$0xff] }
 0x46d   :  { %v3154_v40 = vsel %vm1331_vm7, %v3129_v26, %v2833_v35 }
 0x46e   :  { %v3179_v22 = vsel %vm1357_vm8, %v3154_v40, %v2933_v38  ;;  %v2105_v38 = vld [vmem:[#allocation3 + $0x41] sm:$0xff]  ;;  %v2182_v40 = vld [vmem:[#allocation3 + $0x54] sm:$0xff] }
 0x46f   :  { %3952 = vmatmul.msk.f32.gmra.mxu1 %vm1395_vm9, %v3179_v22 }
 0x470   :  { %2482 = vrot.lane.b32.xlu0 %v2139_v5, %s4064_s6 }
 0x471   :  { %2464 = vrot.lane.b32.xlu2 %v2130_v45, %s4064_s6 }
 0x472   :  { %2406 = vrot.lane.b32.xlu1 %v5963_v57, %s4063_s5  ;;  %v2559_v37 = vpop.permute.xlu0 %2558 }
 0x473   :  { %v2403_v42 = vpop.permute.xlu2 %2402 }
 0x474   :  { %v2383_v34 = vpop.permute.xlu1 %2382 }
 0x475   :  { %v3030_v47 = vsel %vm1201_vm3, %v3005_v13, %v2383_v34  ;;  %v2207_v13 = vld [vmem:[#allocation3 + $0x55] sm:$0xff] }
 0x476   :  { %v3055_v49 = vsel %vm1227_vm2, %v3030_v47, %v2459_v36  ;;  %v2191_v47 = vld [vmem:[#allocation3 + $0x9c] sm:$0xff] }
 0x477   :  { %v3080_v21 = vsel %vm1253_vm4, %v3055_v49, %v2559_v37 }
 0x478   :  { %2664 = vrot.lane.b32.xlu0 %v2180_v58, %s4066_s16 }
 0x479   :  { %2582 = vrot.lane.b32.xlu2 %v2164_v29, %s4065_s0 }
 0x47a   :  { %2564 = vrot.lane.b32.xlu1 %v2155_v32, %s4065_s0  ;;  %v2835_v10 = vpop.permute.xlu0 %2834 }
 0x47b   :  { %v2561_v23 = vpop.permute.xlu2 %2560 }
 0x47c   :  { %v2659_v33 = vpop.permute.xlu1 %2658 }
 0x47d   :  { %v3105_v43 = vsel %vm1279_vm5, %v3080_v21, %v2659_v33  ;;  %v2232_v33 = vld [vmem:[#allocation3 + $0x56] sm:$0xff] }
 0x47e   :  { %v3130_v39 = vsel %vm1305_vm6, %v3105_v43, %v2735_v55  ;;  %v2140_v55 = vld [vmem:[#allocation3 + $0x92] sm:$0xff] }
 0x47f   :  { %v3155_v11 = vsel %vm1331_vm7, %v3130_v39, %v2835_v10  ;;  %v2106_v10 = vld [vmem:[#allocation3 + $0x49] sm:$0xff] }
 0x480   :  { %2758 = vrot.lane.b32.xlu0 %v6013_v2, %s4067_s17  ;;  %v2078_v39 = vld [vmem:[#allocation3 + $0x30] sm:$0xff] }
 0x481   :  { %2740 = vrot.lane.b32.xlu2 %v2181_v12, %s4067_s17 }
 0x482   :  { %2682 = vrot.lane.b32.xlu1 %v2189_v7, %s4066_s16  ;;  %v2303_v57 = vpop.permute.xlu0 %2302 }
 0x483   :  { %v2679_v48 = vpop.permute.xlu2 %2678  ;;  %v3015_v7 = vsel %vm217_vm0, %v2086_v56, %v2303_v57 }
 0x484   :  { %v2935_v4 = vpop.permute.xlu1 %2934  ;;  %v3040_v17 = vsel %vm1201_vm3, %v3015_v7, %v2403_v42 }
 0x485   :  { %v3180_v9 = vsel %vm1357_vm8, %v3155_v11, %v2935_v4 }
 0x486   :  { %3953 = vmatmul.msk.f32.gmra.mxu1 %vm1395_vm9, %v3180_v9 }
 0x488   :  { %2940 = vrot.lane.b32.xlu0 %v2231_v60, %s4068_s18  ;;  %v2087_v60 = vld [vmem:[#allocation3 + $0x78] sm:$0xff] }
 0x489   :  { %2858 = vrot.lane.b32.xlu2 %v2215_v28, %s4069_s19 }
 0x48a   :  { %2840 = vrot.lane.b32.xlu1 %v2206_v0, %s4069_s19  ;;  %v2461_v1 = vpop.permute.xlu0 %2460 }
 0x48b   :  { %v2837_v15 = vpop.permute.xlu2 %2836 }
 0x48c   :  { %v2385_v18 = vpop.permute.xlu1 %2384 }
 0x48d   :  { %v3031_v16 = vsel %vm1201_vm3, %v3006_v24, %v2385_v18  ;;  %v2141_v18 = vld [vmem:[#allocation3 + $0x9a] sm:$0xff] }
 0x48e   :  { %v3056_v61 = vsel %vm1227_vm2, %v3031_v16, %v2461_v1  ;;  %v2157_v1 = vld [vmem:[#allocation3 + $0x53] sm:$0xff] }
 0x48f   :  { %v3081_v8 = vsel %vm1253_vm4, %v3056_v61, %v2561_v23  ;;  %v2241_v23 = vld [vmem:[#allocation3 + $0x9e] sm:$0xff] }
 0x490   :  { %2308 = vrot.lane.b32.xlu0 %v2114_v46, %s4062_s15  ;;  %v2132_v46 = vld [vmem:[#allocation3 + $0x52] sm:$0xff]  ;;  %v2183_v61 = vld [vmem:[#allocation3 + $0x5c] sm:$0xff] }
 0x491   :  { %2290 = vrot.lane.b32.xlu2 %v2105_v38, %s4062_s15 }
 0x492   :  { %2958 = vrot.lane.b32.xlu1 %v2240_v63, %s4068_s18  ;;  %v2579_v62 = vpop.permute.xlu0 %2578 }
 0x493   :  { %v2955_v19 = vpop.permute.xlu2 %2954 }
 0x494   :  { %v2479_v52 = vpop.permute.xlu1 %2478 }
 0x495   :  { %v3065_v50 = vsel %vm1227_vm2, %v3040_v17, %v2479_v52 }
 0x496   :  { %v3090_v53 = vsel %vm1253_vm4, %v3065_v50, %v2579_v62 }
 0x497   :  { %v3115_v25 = vsel %vm1279_vm5, %v3090_v53, %v2679_v48 }
 0x498   :  { %2466 = vrot.lane.b32.xlu0 %v6029_v20, %s4064_s6 }
 0x499   :  { %2408 = vrot.lane.b32.xlu2 %v2139_v5, %s4063_s5 }
 0x49a   :  { %2390 = vrot.lane.b32.xlu1 %v2130_v45, %s4063_s5  ;;  %v2737_v58 = vpop.permute.xlu0 %2736 }
 0x49b   :  { %v6036_v44 = vpop.permute.xlu2 %2386 }
 0x49c   :  { %v2661_v36 = vpop.permute.xlu1 %2660 }
 0x49d   :  { %v3106_v41 = vsel %vm1279_vm5, %v3081_v8, %v2661_v36  ;;  %v2233_v8 = vld [vmem:[#allocation3 + $0x5e] sm:$0xff] }
 0x49e   :  { %v3131_v22 = vsel %vm1305_vm6, %v3106_v41, %v2737_v58 }
 0x49f   :  { %v3156_v42 = vsel %vm1331_vm7, %v3131_v22, %v2837_v15  ;;  %v2107_v22 = vld [vmem:[#allocation3 + $0x51] sm:$0xff] }
 0x4a0   :  { %2584 = vrot.lane.b32.xlu0 %v2165_v27, %s4065_s0 }
 0x4a1   :  { %2566 = vrot.lane.b32.xlu2 %v2156_v14, %s4065_s0  ;;  %v2208_v14 = vld [vmem:[#allocation3 + $0x5d] sm:$0xff] }
 0x4a2   :  { %2484 = vrot.lane.b32.xlu1 %v2140_v55, %s4064_s6  ;;  %v2855_v59 = vpop.permute.xlu0 %2854 }
 0x4a3   :  { %v6048_v54 = vpop.permute.xlu2 %2480 }
 0x4a4   :  { %v2755_v30 = vpop.permute.xlu1 %2754 }
 0x4a5   :  { %v3140_v6 = vsel %vm1305_vm6, %v3115_v25, %v2755_v30  ;;  %v2242_v30 = vld [vmem:[#allocation3 + $0xa6] sm:$0xff] }
 0x4a6   :  { %v3165_v26 = vsel %vm1331_vm7, %v3140_v6, %v2855_v59  ;;  %v2217_v6 = vld [vmem:[#allocation3 + $0xa5] sm:$0xff] }
 0x4a7   :  { %v3190_v35 = vsel %vm1357_vm8, %v3165_v26, %v2955_v19 }
 0x4a8   :  { %3963 = vmatmul.msk.f32.vlgmr.msra.gmra.mxu2 %vm1395_vm9, %v3190_v35  ;;  %2742 = vrot.lane.b32.xlu0 %v2182_v40, %s4067_s17 }
 0x4a9   :  { %2684 = vrot.lane.b32.xlu2 %v6013_v2, %s4066_s16 }
 0x4aa   :  { %2666 = vrot.lane.b32.xlu1 %v2181_v12, %s4066_s16  ;;  %v2287_v5 = vpop.permute.xlu0 %2286  ;;  %v2115_v12 = vld [vmem:[#allocation3 + $0x91] sm:$0xff] }
 0x4ab   :  { %v2663_v45 = vpop.permute.xlu2 %2662  ;;  %v3007_v57 = vsel %vm217_vm0, %v2078_v39, %v2287_v5  ;;  %v2167_v39 = vld [vmem:[#allocation3 + $0xa3] sm:$0xff] }
 0x4ac   :  { %v2937_v37 = vpop.permute.xlu1 %2936  ;;  %v3032_v9 = vsel %vm1201_vm3, %v3007_v57, %v6036_v44 }
 0x4ad   :  { %v3181_v34 = vsel %vm1357_vm8, %v3156_v42, %v2937_v37  ;;  %v2079_v42 = vld [vmem:[#allocation3 + $0x38] sm:$0xff] }
 0x4ae   :  { %3954 = vmatmul.msk.f32.gmra.mxu1 %vm1395_vm9, %v3181_v34 }
 0x4b0   :  { %2860 = vrot.lane.b32.xlu0 %v2216_v51, %s4069_s19  ;;  %v6115_v51 = vld [vmem:[#allocation3 + $0xa2] sm:$0xff] }
 0x4b1   :  { %2842 = vrot.lane.b32.xlu2 %v2207_v13, %s4069_s19  ;;  %v6119_v13 = vld [vmem:[#allocation3 + $0x5a] sm:$0xff] }
 0x4b2   :  { %2760 = vrot.lane.b32.xlu1 %v2191_v47, %s4067_s17  ;;  %v2405_v29 = vpop.permute.xlu0 %2404 }
 0x4b3   :  { %v2757_v32 = vpop.permute.xlu2 %2756 }
 0x4b4   :  { %v2305_v49 = vpop.permute.xlu1 %2304 }
 0x4b5   :  { %v3016_v0 = vsel %vm217_vm0, %v2087_v60, %v2305_v49 }
 0x4b6   :  { %v3041_v38 = vsel %vm1201_vm3, %v3016_v0, %v2405_v29 }
 0x4b8   :  { %2292 = vrot.lane.b32.xlu0 %v2106_v10, %s4062_s15  ;;  %v2088_v10 = vld [vmem:[#allocation3 + $0x80] sm:$0xff] }
 0x4b9   :  { %2960 = vrot.lane.b32.xlu2 %v2241_v23, %s4068_s18 }
 0x4ba   :  { %2942 = vrot.lane.b32.xlu1 %v2232_v33, %s4068_s18  ;;  %v2563_v21 = vpop.permute.xlu0 %2562 }
 0x4bb   :  { %v2939_v43 = vpop.permute.xlu2 %2938 }
 0x4bc   :  { %v2463_v2 = vpop.permute.xlu1 %2462 }
 0x4bd   :  { %v3057_v28 = vsel %vm1227_vm2, %v3032_v9, %v2463_v2 }
 0x4be   :  { %v3082_v15 = vsel %vm1253_vm4, %v3057_v28, %v2563_v21 }
 0x4bf   :  { %v3107_v19 = vsel %vm1279_vm5, %v3082_v15, %v2663_v45  ;;  %v6145_v15 = vld [vmem:[#allocation3 + $0xac] sm:$0xff] }
 0x4c0   :  { %2410 = vrot.lane.b32.xlu0 %v2140_v55, %s4063_s5  ;;  %v2192_v55 = vld [vmem:[#allocation3 + $0xa4] sm:$0xff] }
 0x4c1   :  { %2392 = vrot.lane.b32.xlu2 %v6029_v20, %s4063_s5  ;;  %v3066_v20 = vsel %vm1227_vm2, %v3041_v38, %v6048_v54 }
 0x4c2   :  { %2310 = vrot.lane.b32.xlu1 %v2115_v12, %s4062_s15  ;;  %v2681_v48 = vpop.permute.xlu0 %2680  ;;  %v2158_v12 = vld [vmem:[#allocation3 + $0x5b] sm:$0xff] }
 0x4c3   :  { %v6076_v4 = vpop.permute.xlu2 %2306 }
 0x4c4   :  { %v2581_v11 = vpop.permute.xlu1 %2580  ;;  %v3017_v33 = vsel %vm217_vm0, %v2088_v10, %v6076_v4 }
 0x4c5   :  { %v3091_v7 = vsel %vm1253_vm4, %v3066_v20, %v2581_v11  ;;  %v2234_v20 = vld [vmem:[#allocation3 + $0x66] sm:$0xff] }
 0x4c6   :  { %v3116_v36 = vsel %vm1279_vm5, %v3091_v7, %v2681_v48  ;;  %v2209_v7 = vld [vmem:[#allocation3 + $0x65] sm:$0xff] }
 0x4c7   :  { %v3141_v50 = vsel %vm1305_vm6, %v3116_v36, %v2757_v32 }
 0x4c8   :  { %2568 = vrot.lane.b32.xlu0 %v2157_v1, %s4065_s0 }
 0x4c9   :  { %2486 = vrot.lane.b32.xlu2 %v2141_v18, %s4064_s6 }
 0x4ca   :  { %2468 = vrot.lane.b32.xlu1 %v2132_v46, %s4064_s6  ;;  %v2839_v63 = vpop.permute.xlu0 %2838 }
 0x4cb   :  { %v2465_v62 = vpop.permute.xlu2 %2464 }
 0x4cc   :  { %v2739_v52 = vpop.permute.xlu1 %2738 }
 0x4cd   :  { %v3132_v56 = vsel %vm1305_vm6, %v3107_v19, %v2739_v52 }
 0x4ce   :  { %v3157_v58 = vsel %vm1331_vm7, %v3132_v56, %v2839_v63  ;;  %v2218_v56 = vld [vmem:[#allocation3 + $0xad] sm:$0xff] }
 0x4cf   :  { %v3182_v44 = vsel %vm1357_vm8, %v3157_v58, %v2939_v43 }
 0x4d0   :  { %3955 = vmatmul.msk.f32.gmra.mxu1 %vm1395_vm9, %v3182_v44  ;;  %2686 = vrot.lane.b32.xlu0 %v2191_v47, %s4066_s16 }
 0x4d1   :  { %2668 = vrot.lane.b32.xlu2 %v2182_v40, %s4066_s16  ;;  %v2116_v40 = vld [vmem:[#allocation3 + $0x99] sm:$0xff] }
 0x4d2   :  { %2586 = vrot.lane.b32.xlu1 %v2166_v3, %s4065_s0  ;;  %v2957_v17 = vpop.permute.xlu0 %2956  ;;  %v2117_v3 = vld [vmem:[#allocation3 + $0xa1] sm:$0xff] }
 0x4d3   :  { %v2583_v24 = vpop.permute.xlu2 %2582 }
 0x4d4   :  { %v2857_v16 = vpop.permute.xlu1 %2856 }
 0x4d5   :  { %v3166_v27 = vsel %vm1331_vm7, %v3141_v50, %v2857_v16 }
 0x4d6   :  { %v3191_v53 = vsel %vm1357_vm8, %v3166_v27, %v2957_v17  ;;  %v2108_v17 = vld [vmem:[#allocation3 + $0x59] sm:$0xff] }
 0x4d7   :  { %3964 = vmatmul.msk.f32.gmra.mxu2 %vm1395_vm9, %v3191_v53  ;;  %v6164_v53 = vld [vmem:[#allocation3 + $0x62] sm:$0xff] }
 0x4d8   :  { %2844 = vrot.lane.b32.xlu0 %v2208_v14, %s4069_s19  ;;  %v2089_v14 = vld [vmem:[#allocation3 + $0x88] sm:$0xff] }
 0x4d9   :  { %2762 = vrot.lane.b32.xlu2 %v2192_v55, %s4067_s17 }
 0x4da   :  { %2744 = vrot.lane.b32.xlu1 %v2183_v61, %s4067_s17  ;;  %v2389_v59 = vpop.permute.xlu0 %2388 }
 0x4db   :  { %v2741_v54 = vpop.permute.xlu2 %2740 }
 0x4dc   :  { %v2289_v25 = vpop.permute.xlu1 %2288 }
 0x4dd   :  { %v3008_v34 = vsel %vm217_vm0, %v2079_v42, %v2289_v25 }
 0x4de   :  { %v3033_v47 = vsel %vm1201_vm3, %v3008_v34, %v2389_v59 }
 0x4df   :  { %v3058_v23 = vsel %vm1227_vm2, %v3033_v47, %v2465_v62 }
 0x4e0   :  { %2962 = vrot.lane.b32.xlu0 %v2242_v30, %s4068_s18  ;;  %v2080_v30 = vld [vmem:[#allocation3 + $0x40] sm:$0xff] }
 0x4e1   :  { %2944 = vrot.lane.b32.xlu2 %v2233_v8, %s4068_s18 }
 0x4e2   :  { %2862 = vrot.lane.b32.xlu1 %v2217_v6, %s4069_s19  ;;  %v2483_v41 = vpop.permute.xlu0 %2482 }
 0x4e3   :  { %v2859_v26 = vpop.permute.xlu2 %2858 }
 0x4e4   :  { %v2407_v35 = vpop.permute.xlu1 %2406 }
 0x4e5   :  { %v3042_v43 = vsel %vm1201_vm3, %v3017_v33, %v2407_v35 }
 0x4e6   :  { %v3067_v57 = vsel %vm1227_vm2, %v3042_v43, %v2483_v41 }
 0x4e7   :  { %v3092_v60 = vsel %vm1253_vm4, %v3067_v57, %v2583_v24  ;;  %v2243_v24 = vld [vmem:[#allocation3 + $0xae] sm:$0xff] }
 0x4e8   :  { %2394 = vrot.lane.b32.xlu0 %v2132_v46, %s4063_s5  ;;  %v6150_v46 = vld [vmem:[#allocation3 + $0x64] sm:$0xff]  ;;  %v2194_v57 = vld [vmem:[#allocation3 + $0xb4] sm:$0xff] }
 0x4e9   :  { %2312 = vrot.lane.b32.xlu2 %v2116_v40, %s4062_s15  ;;  %v2159_v40 = vld [vmem:[#allocation3 + $0x63] sm:$0xff] }
 0x4ea   :  { %2294 = vrot.lane.b32.xlu1 %v2107_v22, %s4062_s15  ;;  %v2665_v5 = vpop.permute.xlu0 %2664  ;;  %v2143_v22 = vld [vmem:[#allocation3 + $0xaa] sm:$0xff] }
 0x4eb   :  { %v6112_v45 = vpop.permute.xlu2 %2290 }
 0x4ec   :  { %v2565_v37 = vpop.permute.xlu1 %2564  ;;  %v3009_v6 = vsel %vm217_vm0, %v2080_v30, %v6112_v45 }
 0x4ed   :  { %v3083_v21 = vsel %vm1253_vm4, %v3058_v23, %v2565_v37 }
 0x4ee   :  { %v3108_v2 = vsel %vm1279_vm5, %v3083_v21, %v2665_v5 }
 0x4ef   :  { %v3133_v4 = vsel %vm1305_vm6, %v3108_v2, %v2741_v54 }
 0x4f0   :  { %2488 = vrot.lane.b32.xlu0 %v6115_v51, %s4064_s6 }
 0x4f1   :  { %2470 = vrot.lane.b32.xlu2 %v6119_v13, %s4064_s6 }
 0x4f2   :  { %2412 = vrot.lane.b32.xlu1 %v2141_v18, %s4063_s5  ;;  %v2759_v29 = vpop.permute.xlu0 %2758 }
 0x4f3   :  { %v6125_v32 = vpop.permute.xlu2 %2408 }
 0x4f4   :  { %v2683_v49 = vpop.permute.xlu1 %2682 }
 0x4f5   :  { %v3117_v0 = vsel %vm1279_vm5, %v3092_v60, %v2683_v49  ;;  %v6196_v49 = vld [vmem:[#allocation3 + $0x6c] sm:$0xff]  ;;  %v2244_v60 = vld [vmem:[#allocation3 + $0xb6] sm:$0xff] }
 0x4f6   :  { %v3142_v18 = vsel %vm1305_vm6, %v3117_v0, %v2759_v29 }
 0x4f7   :  { %v3167_v19 = vsel %vm1331_vm7, %v3142_v18, %v2859_v26  ;;  %v2168_v26 = vld [vmem:[#allocation3 + $0xab] sm:$0xff] }
 0x4f8   :  { %2670 = vrot.lane.b32.xlu0 %v2183_v61, %s4066_s16  ;;  %v2118_v18 = vld [vmem:[#allocation3 + $0xa9] sm:$0xff] }
 0x4f9   :  { %2588 = vrot.lane.b32.xlu2 %v2167_v39, %s4065_s0  ;;  %v2219_v39 = vld [vmem:[#allocation3 + $0xb5] sm:$0xff] }
 0x4fa   :  { %2570 = vrot.lane.b32.xlu1 %v2158_v12, %s4065_s0  ;;  %v2941_v48 = vpop.permute.xlu0 %2940  ;;  %v2210_v12 = vld [vmem:[#allocation3 + $0x6d] sm:$0xff] }
 0x4fb   :  { %v6137_v11 = vpop.permute.xlu2 %2566 }
 0x4fc   :  { %v2841_v9 = vpop.permute.xlu1 %2840 }
 0x4fd   :  { %v3158_v28 = vsel %vm1331_vm7, %v3133_v4, %v2841_v9  ;;  %v2109_v9 = vld [vmem:[#allocation3 + $0x61] sm:$0xff] }
 0x4fe   :  { %v3183_v1 = vsel %vm1357_vm8, %v3158_v28, %v2941_v48  ;;  %v2235_v28 = vld [vmem:[#allocation3 + $0x6e] sm:$0xff] }
 0x4ff   :  { %3956 = vmatmul.msk.f32.gmra.mxu1 %vm1395_vm9, %v3183_v1 }
 0x500   :  { %2764 = vrot.lane.b32.xlu0 %v6145_v15, %s4067_s17 }
 0x501   :  { %2746 = vrot.lane.b32.xlu2 %v6150_v46, %s4067_s17 }
 0x502   :  { %2688 = vrot.lane.b32.xlu1 %v2192_v55, %s4066_s16  ;;  %v2309_v38 = vpop.permute.xlu0 %2308 }
 0x503   :  { %v2685_v63 = vpop.permute.xlu2 %2684  ;;  %v3018_v55 = vsel %vm217_vm0, %v2089_v14, %v2309_v38 }
 0x504   :  { %v2959_v62 = vpop.permute.xlu1 %2958  ;;  %v3043_v25 = vsel %vm1201_vm3, %v3018_v55, %v6125_v32 }
 0x505   :  { %v3192_v52 = vsel %vm1357_vm8, %v3167_v19, %v2959_v62 }
 0x506   :  { %3965 = vmatmul.msk.f32.gmra.mxu2 %vm1395_vm9, %v3192_v52 }
 0x508   :  { %2946 = vrot.lane.b32.xlu0 %v2234_v20, %s4068_s18  ;;  %v2090_v20 = vld [vmem:[#allocation3 + $0x90] sm:$0xff] }
 0x509   :  { %2864 = vrot.lane.b32.xlu2 %v2218_v56, %s4069_s19 }
 0x50a   :  { %2846 = vrot.lane.b32.xlu1 %v2209_v7, %s4069_s19  ;;  %v2467_v58 = vpop.permute.xlu0 %2466 }
 0x50b   :  { %v2843_v44 = vpop.permute.xlu2 %2842 }
 0x50c   :  { %v2391_v36 = vpop.permute.xlu1 %2390 }
 0x50d   :  { %v3034_v41 = vsel %vm1201_vm3, %v3009_v6, %v2391_v36  ;;  %v2135_v36 = vld [vmem:[#allocation3 + $0x6a] sm:$0xff] }
 0x50e   :  { %v3059_v5 = vsel %vm1227_vm2, %v3034_v41, %v2467_v58  ;;  %v2160_v58 = vld [vmem:[#allocation3 + $0x6b] sm:$0xff] }
 0x510   :  { %2314 = vrot.lane.b32.xlu0 %v2117_v3, %s4062_s15 }
 0x511   :  { %2296 = vrot.lane.b32.xlu2 %v2108_v17, %s4062_s15 }
 0x512   :  { %2964 = vrot.lane.b32.xlu1 %v2243_v24, %s4068_s18  ;;  %v2585_v50 = vpop.permute.xlu0 %2584 }
 0x513   :  { %v2961_v16 = vpop.permute.xlu2 %2960 }
 0x514   :  { %v2485_v27 = vpop.permute.xlu1 %2484 }
 0x515   :  { %v3068_v8 = vsel %vm1227_vm2, %v3043_v25, %v2485_v27 }
 0x516   :  { %v3093_v35 = vsel %vm1253_vm4, %v3068_v8, %v2585_v50 }
 0x517   :  { %v3118_v45 = vsel %vm1279_vm5, %v3093_v35, %v2685_v63 }
 0x518   :  { %2472 = vrot.lane.b32.xlu0 %v6164_v53, %s4064_s6 }
 0x519   :  { %2414 = vrot.lane.b32.xlu2 %v6115_v51, %s4063_s5 }
 0x51a   :  { %2396 = vrot.lane.b32.xlu1 %v6119_v13, %s4063_s5  ;;  %v2743_v61 = vpop.permute.xlu0 %2742  ;;  %v3084_v13 = vsel %vm1253_vm4, %v3059_v5, %v6137_v11  ;;  %v2186_v5 = vld [vmem:[#allocation3 + $0x74] sm:$0xff] }
 0x51b   :  { %v6173_v59 = vpop.permute.xlu2 %2392 }
 0x51c   :  { %v2667_v54 = vpop.permute.xlu1 %2666 }
 0x51d   :  { %v3109_v29 = vsel %vm1279_vm5, %v3084_v13, %v2667_v54  ;;  %v2169_v54 = vld [vmem:[#allocation3 + $0xb3] sm:$0xff]  ;;  %v2220_v13 = vld [vmem:[#allocation3 + $0xbd] sm:$0xff] }
 0x51e   :  { %v3134_v10 = vsel %vm1305_vm6, %v3109_v29, %v2743_v61 }
 0x51f   :  { %v3159_v43 = vsel %vm1331_vm7, %v3134_v10, %v2843_v44  ;;  %v2144_v44 = vld [vmem:[#allocation3 + $0xb2] sm:$0xff]  ;;  %v2110_v10 = vld [vmem:[#allocation3 + $0x69] sm:$0xff] }
 0x520   :  { %2590 = vrot.lane.b32.xlu0 %v2168_v26, %s4065_s0 }
 0x521   :  { %2572 = vrot.lane.b32.xlu2 %v2159_v40, %s4065_s0  ;;  %v2211_v40 = vld [vmem:[#allocation3 + $0x75] sm:$0xff] }
 0x522   :  { %2490 = vrot.lane.b32.xlu1 %v2143_v22, %s4064_s6  ;;  %v2861_v37 = vpop.permute.xlu0 %2860 }
 0x523   :  { %v6186_v42 = vpop.permute.xlu2 %2486 }
 0x524   :  { %v2761_v34 = vpop.permute.xlu1 %2760 }
 0x525   :  { %v3143_v51 = vsel %vm1305_vm6, %v3118_v45, %v2761_v34  ;;  %v2245_v34 = vld [vmem:[#allocation3 + $0xbe] sm:$0xff] }
 0x526   :  { %v3168_v47 = vsel %vm1331_vm7, %v3143_v51, %v2861_v37  ;;  %v2236_v51 = vld [vmem:[#allocation3 + $0x76] sm:$0xff] }
 0x527   :  { %v3193_v32 = vsel %vm1357_vm8, %v3168_v47, %v2961_v16 }
 0x528   :  { %3966 = vmatmul.msk.f32.gmra.mxu2 %vm1395_vm9, %v3193_v32  ;;  %2748 = vrot.lane.b32.xlu0 %v6196_v49, %s4067_s17 }
 0x529   :  { %2690 = vrot.lane.b32.xlu2 %v6145_v15, %s4066_s16 }
 0x52a   :  { %2672 = vrot.lane.b32.xlu1 %v6150_v46, %s4066_s16  ;;  %v2293_v23 = vpop.permute.xlu0 %2292  ;;  %v2081_v46 = vld [vmem:[#allocation3 + $0x48] sm:$0xff] }
 0x52b   :  { %v2669_v33 = vpop.permute.xlu2 %2668  ;;  %v3010_v38 = vsel %vm217_vm0, %v2081_v46, %v2293_v23 }
 0x52c   :  { %v2943_v21 = vpop.permute.xlu1 %2942  ;;  %v3035_v52 = vsel %vm1201_vm3, %v3010_v38, %v6173_v59 }
 0x52d   :  { %v3184_v2 = vsel %vm1357_vm8, %v3159_v43, %v2943_v21  ;;  %v2082_v43 = vld [vmem:[#allocation3 + $0x50] sm:$0xff] }
 0x52e   :  { %3957 = vmatmul.msk.f32.gmra.mxu1 %vm1395_vm9, %v3184_v2 }
 0x530   :  { %2866 = vrot.lane.b32.xlu0 %v2219_v39, %s4069_s19  ;;  %v2145_v39 = vld [vmem:[#allocation3 + $0xba] sm:$0xff] }
 0x531   :  { %2848 = vrot.lane.b32.xlu2 %v2210_v12, %s4069_s19 }
 0x532   :  { %2766 = vrot.lane.b32.xlu1 %v2194_v57, %s4067_s17  ;;  %v2411_v48 = vpop.permute.xlu0 %2410 }
 0x533   :  { %v2763_v11 = vpop.permute.xlu2 %2762 }
 0x534   :  { %v2311_v4 = vpop.permute.xlu1 %2310 }
 0x535   :  { %v3019_v7 = vsel %vm217_vm0, %v2090_v20, %v2311_v4  ;;  %v2091_v4 = vld [vmem:[#allocation3 + $0x98] sm:$0xff] }
 0x536   :  { %v3044_v17 = vsel %vm1201_vm3, %v3019_v7, %v2411_v48  ;;  %v2196_v7 = vld [vmem:[#allocation3 + $0xc4] sm:$0xff] }
 0x538   :  { %2298 = vrot.lane.b32.xlu0 %v2109_v9, %s4062_s15 }
 0x539   :  { %2966 = vrot.lane.b32.xlu2 %v2244_v60, %s4068_s18 }
 0x53a   :  { %2948 = vrot.lane.b32.xlu1 %v2235_v28, %s4068_s18  ;;  %v2569_v0 = vpop.permute.xlu0 %2568 }
 0x53b   :  { %v2945_v1 = vpop.permute.xlu2 %2944 }
 0x53c   :  { %v2469_v15 = vpop.permute.xlu1 %2468 }
 0x53d   :  { %v3060_v56 = vsel %vm1227_vm2, %v3035_v52, %v2469_v15 }
 0x53e   :  { %v3085_v3 = vsel %vm1253_vm4, %v3060_v56, %v2569_v0 }
 0x53f   :  { %v3110_v16 = vsel %vm1279_vm5, %v3085_v3, %v2669_v33 }
 0x540   :  { %2416 = vrot.lane.b32.xlu0 %v2143_v22, %s4063_s5  ;;  %v2195_v22 = vld [vmem:[#allocation3 + $0xbc] sm:$0xff] }
 0x541   :  { %2398 = vrot.lane.b32.xlu2 %v6164_v53, %s4063_s5  ;;  %v3069_v53 = vsel %vm1227_vm2, %v3044_v17, %v6186_v42 }
 0x542   :  { %2316 = vrot.lane.b32.xlu1 %v2118_v18, %s4062_s15  ;;  %v2687_v63 = vpop.permute.xlu0 %2686 }
 0x543   :  { %v6219_v62 = vpop.permute.xlu2 %2312 }
 0x544   :  { %v2587_v19 = vpop.permute.xlu1 %2586  ;;  %v3020_v60 = vsel %vm217_vm0, %v2091_v4, %v6219_v62  ;;  %v2121_v4 = vld [vmem:[#allocation3 + $0xc1] sm:$0xff] }
 0x545   :  { %v3094_v55 = vsel %vm1253_vm4, %v3069_v53, %v2587_v19  ;;  %v2212_v53 = vld [vmem:[#allocation3 + $0x7d] sm:$0xff] }
 0x546   :  { %v3119_v25 = vsel %vm1279_vm5, %v3094_v55, %v2687_v63 }
 0x547   :  { %v3144_v6 = vsel %vm1305_vm6, %v3119_v25, %v2763_v11 }
 0x548   :  { %2574 = vrot.lane.b32.xlu0 %v2160_v58, %s4065_s0 }
 0x549   :  { %2492 = vrot.lane.b32.xlu2 %v2144_v44, %s4064_s6 }
 0x54a   :  { %2474 = vrot.lane.b32.xlu1 %v2135_v36, %s4064_s6  ;;  %v2845_v24 = vpop.permute.xlu0 %2844 }
 0x54b   :  { %v2471_v50 = vpop.permute.xlu2 %2470 }
 0x54c   :  { %v2745_v27 = vpop.permute.xlu1 %2744 }
 0x54d   :  { %v3135_v14 = vsel %vm1305_vm6, %v3110_v16, %v2745_v27  ;;  %v2237_v16 = vld [vmem:[#allocation3 + $0x7e] sm:$0xff] }
 0x54e   :  { %v3160_v61 = vsel %vm1331_vm7, %v3135_v14, %v2845_v24  ;;  %v2221_v27 = vld [vmem:[#allocation3 + $0xc5] sm:$0xff] }
 0x54f   :  { %v3185_v59 = vsel %vm1357_vm8, %v3160_v61, %v2945_v1  ;;  %v2161_v1 = vld [vmem:[#allocation3 + $0x73] sm:$0xff] }
 0x550   :  { %3958 = vmatmul.msk.f32.gmra.mxu1 %vm1395_vm9, %v3185_v59  ;;  %2692 = vrot.lane.b32.xlu0 %v2194_v57, %s4066_s16  ;;  %v2120_v59 = vld [vmem:[#allocation3 + $0xb9] sm:$0xff] }
 0x551   :  { %2674 = vrot.lane.b32.xlu2 %v6196_v49, %s4066_s16  ;;  %v2119_v49 = vld [vmem:[#allocation3 + $0xb1] sm:$0xff] }
 0x552   :  { %2592 = vrot.lane.b32.xlu1 %v2169_v54, %s4065_s0  ;;  %v2963_v30 = vpop.permute.xlu0 %2962  ;;  %v2246_v54 = vld [vmem:[#allocation3 + $0xc6] sm:$0xff] }
 0x553   :  { %v2589_v8 = vpop.permute.xlu2 %2588 }
 0x554   :  { %v2863_v41 = vpop.permute.xlu1 %2862 }
 0x555   :  { %v3169_v26 = vsel %vm1331_vm7, %v3144_v6, %v2863_v41  ;;  %v4071_v6 = vmov 1   ;;  %v2171_v41 = vld [vmem:[#allocation3 + $0xc3] sm:$0xff] }
 0x556   :  { %v3194_v35 = vsel %vm1357_vm8, %v3169_v26, %v2963_v30  ;;  %4017 = vset.pattern.permute.xlu0 %v4071_v6  ;;  %4019 = vset.pattern.permute.xlu2 %v4071_v6  ;;  %v2146_v26 = vld [vmem:[#allocation3 + $0xc2] sm:$0xff] }
 0x557   :  { %3967 = vmatmul.msk.f32.gmra.mxu2 %vm1395_vm9, %v3194_v35  ;;  %4018 = vset.pattern.permute.xlu1 %v4071_v6  ;;  %v2092_v35 = vld [vmem:[#allocation3 + $0xa0] sm:$0xff] }
 0x558   :  { %2850 = vrot.lane.b32.xlu0 %v2211_v40, %s4069_s19 }
 0x559   :  { %2768 = vrot.lane.b32.xlu2 %v2195_v22, %s4067_s17 }
 0x55a   :  { %2750 = vrot.lane.b32.xlu1 %v2186_v5, %s4067_s17  ;;  %v2395_v37 = vpop.permute.xlu0 %2394 }
 0x55b   :  { %v2747_v42 = vpop.permute.xlu2 %2746 }
 0x55c   :  { %v2295_v45 = vpop.permute.xlu1 %2294 }
 0x55d   :  { %v3011_v2 = vsel %vm217_vm0, %v2082_v43, %v2295_v45 }
 0x55e   :  { %v3036_v12 = vsel %vm1201_vm3, %v3011_v2, %v2395_v37 }
 0x55f   :  { %v3061_v9 = vsel %vm1227_vm2, %v3036_v12, %v2471_v50  ;;  %v2147_v12 = vld [vmem:[#allocation3 + $0xca] sm:$0xff] }
 0x560   :  { %2968 = vrot.lane.b32.xlu0 %v2245_v34, %s4068_s18  ;;  %v2247_v34 = vld [vmem:[#allocation3 + $0xce] sm:$0xff] }
 0x561   :  { %2950 = vrot.lane.b32.xlu2 %v2236_v51, %s4068_s18 }
 0x562   :  { %2868 = vrot.lane.b32.xlu1 %v2220_v13, %s4069_s19  ;;  %v2489_v47 = vpop.permute.xlu0 %2488 }
 0x563   :  { %v2865_v29 = vpop.permute.xlu2 %2864 }
 0x564   :  { %v2413_v32 = vpop.permute.xlu1 %2412 }
 0x565   :  { %v3045_v0 = vsel %vm1201_vm3, %v3020_v60, %v2413_v32 }
 0x566   :  { %v3070_v18 = vsel %vm1227_vm2, %v3045_v0, %v2489_v47  ;;  %v2222_v47 = vld [vmem:[#allocation3 + $0xcd] sm:$0xff] }
 0x567   :  { %v3095_v19 = vsel %vm1253_vm4, %v3070_v18, %v2589_v8  ;;  %v2172_v18 = vld [vmem:[#allocation3 + $0xcb] sm:$0xff] }
 0x568   :  { %2400 = vrot.lane.b32.xlu0 %v2135_v36, %s4063_s5 }
 0x569   :  { %2318 = vrot.lane.b32.xlu2 %v2119_v49, %s4062_s15 }
 0x56a   :  { %2300 = vrot.lane.b32.xlu1 %v2110_v10, %s4062_s15  ;;  %v2671_v23 = vpop.permute.xlu0 %2670 }
 0x56b   :  { %v6256_v33 = vpop.permute.xlu2 %2296 }
 0x56c   :  { %v2571_v21 = vpop.permute.xlu1 %2570 }
 0x56d   :  { %v3086_v28 = vsel %vm1253_vm4, %v3061_v9, %v2571_v21 }
 0x56e   :  { %v3111_v15 = vsel %vm1279_vm5, %v3086_v28, %v2671_v23 }
 0x56f   :  { %v3136_v63 = vsel %vm1305_vm6, %v3111_v15, %v2747_v42  ;;  %v2083_v42 = vld [vmem:[#allocation3 + $0x58] sm:$0xff] }
 0x570   :  { %2494 = vrot.lane.b32.xlu0 %v2145_v39, %s4064_s6  ;;  %v3012_v51 = vsel %vm217_vm0, %v2083_v42, %v6256_v33  ;;  %v2198_v15 = vld [vmem:[#allocation3 + $0xd4] sm:$0xff] }
 0x571   :  { %2476 = vrot.lane.b32.xlu2 %v5921_v31, %s4064_s6  ;;  %v2170_v31 = vld [vmem:[#allocation3 + $0xbb] sm:$0xff] }
 0x572   :  { %2418 = vrot.lane.b32.xlu1 %v2144_v44, %s4063_s5  ;;  %v2765_v57 = vpop.permute.xlu0 %2764  ;;  %v4035_v44 = vld [vmem:[#allocation3 + $0x7c] sm:$0xff] }
 0x573   :  { %v6264_v48 = vpop.permute.xlu2 %2414 }
 0x574   :  { %v2689_v11 = vpop.permute.xlu1 %2688 }
 0x575   :  { %v3120_v20 = vsel %vm1279_vm5, %v3095_v19, %v2689_v11  ;;  %v2223_v19 = vld [vmem:[#allocation3 + $0xd5] sm:$0xff] }
 0x576   :  { %v3145_v58 = vsel %vm1305_vm6, %v3120_v20, %v2765_v57 }
 0x577   :  { %v3170_v24 = vsel %vm1331_vm7, %v3145_v58, %v2865_v29  ;;  %v2197_v29 = vld [vmem:[#allocation3 + $0xcc] sm:$0xff]  ;;  %v4037_v58 = vld [vmem:[%s6941_s1 + $0x28] sm:$0xff] }
 0x578   :  { %2676 = vrot.lane.b32.xlu0 %v2186_v5, %s4066_s16 }
 0x579   :  { %2594 = vrot.lane.b32.xlu2 %v2170_v31, %s4065_s0 }
 0x57a   :  { %2576 = vrot.lane.b32.xlu1 %v2161_v1, %s4065_s0  ;;  %v2947_v46 = vpop.permute.xlu0 %2946 }
 0x57b   :  { %v6276_v38 = vpop.permute.xlu2 %2572 }
 0x57c   :  { %v2847_v62 = vpop.permute.xlu1 %2846 }
 0x57d   :  { %v3161_v52 = vsel %vm1331_vm7, %v3136_v63, %v2847_v62  ;;  %v2248_v62 = vld [vmem:[#allocation3 + $0xd6] sm:$0xff] }
 0x57e   :  { %v3186_v56 = vsel %vm1357_vm8, %v3161_v52, %v2947_v46  ;;  %v4036_v52 = vld [vmem:[%s6941_s1] sm:$0xff] }
 0x57f   :  { %3959 = vmatmul.msk.f32.gmra.mxu1 %vm1395_vm9, %v3186_v56 }
 0x580   :  { %2770 = vrot.lane.b32.xlu0 %v2196_v7, %s4067_s17 }
 0x581   :  { %2752 = vrot.lane.b32.xlu2 %v4035_v44, %s4067_s17  ;;  %v2084_v44 = vld [vmem:[#allocation3 + $0x60] sm:$0xff] }
 0x582   :  { %2694 = vrot.lane.b32.xlu1 %v2195_v22, %s4066_s16  ;;  %v2315_v36 = vpop.permute.xlu0 %2314 }
 0x583   :  { %v2691_v3 = vpop.permute.xlu2 %2690  ;;  %v3021_v40 = vsel %vm217_vm0, %v2092_v35, %v2315_v36  ;;  %v4038_v36 = vld [vmem:[%s6941_s1 + $0x10] sm:$0xff] }
 0x584   :  { %v2965_v17 = vpop.permute.xlu1 %2964  ;;  %v3046_v45 = vsel %vm1201_vm3, %v3021_v40, %v6264_v48 }
 0x585   :  { %v3195_v50 = vsel %vm1357_vm8, %v3170_v24, %v2965_v17 }
 0x586   :  { %3968 = vmatmul.msk.f32.gmra.mxu2 %vm1395_vm9, %v3195_v50 }
 0x588   :  { %2952 = vrot.lane.b32.xlu0 %v2237_v16, %s4068_s18 }
 0x589   :  { %2870 = vrot.lane.b32.xlu2 %v2221_v27, %s4069_s19  ;;  %v2093_v27 = vld [vmem:[#allocation3 + $0xa8] sm:$0xff] }
 0x58a   :  { %2852 = vrot.lane.b32.xlu1 %v2212_v53, %s4069_s19  ;;  %v2473_v14 = vpop.permute.xlu0 %2472 }
 0x58b   :  { %v2849_v55 = vpop.permute.xlu2 %2848 }
 0x58c   :  { %v2397_v61 = vpop.permute.xlu1 %2396 }
 0x58d   :  { %v3037_v32 = vsel %vm1201_vm3, %v3012_v51, %v2397_v61 }
 0x58e   :  { %v3062_v10 = vsel %vm1227_vm2, %v3037_v32, %v2473_v14 }
 0x58f   :  { %v3087_v2 = vsel %vm1253_vm4, %v3062_v10, %v6276_v38  ;;  %v4046_v10 = vld [vmem:[%s6941_s1 + $0x70] sm:$0xff] }
 0x590   :  { %2420 = vrot.lane.b32.xlu0 %v2145_v39, %s4063_s5 }
 0x591   :  { %2320 = vrot.lane.b32.xlu2 %v2120_v59, %s4062_s15  ;;  %v4041_v59 = vld [vmem:[%s6941_s1 + $0x20] sm:$0xff] }
 0x592   :  { %2970 = vrot.lane.b32.xlu1 %v2246_v54, %s4068_s18  ;;  %v2591_v25 = vpop.permute.xlu0 %2590  ;;  %v4042_v54 = vld [vmem:[%s6941_s1 + $0x18] sm:$0xff] }
 0x593   :  { %v2967_v30 = vpop.permute.xlu2 %2966 }
 0x594   :  { %v2491_v8 = vpop.permute.xlu1 %2490 }
 0x595   :  { %v3071_v13 = vsel %vm1227_vm2, %v3046_v45, %v2491_v8  ;;  %v4044_v45 = vld [vmem:[%s6941_s1 + $0x38] sm:$0xff] }
 0x596   :  { %v3096_v49 = vsel %vm1253_vm4, %v3071_v13, %v2591_v25 }
 0x597   :  { %v3121_v33 = vsel %vm1279_vm5, %v3096_v49, %v2691_v3  ;;  %v4039_v3 = vld [vmem:[%s6941_s1 + $0x8] sm:$0xff] }
 0x598   :  { %2696 = vrot.lane.b32.xlu0 %v2196_v7, %s4066_s16 }
 0x599   :  { %2596 = vrot.lane.b32.xlu2 %v2171_v41, %s4065_s0 }
 0x59a   :  { %2496 = vrot.lane.b32.xlu1 %v2146_v26, %s4064_s6  ;;  %v2749_v22 = vpop.permute.xlu0 %2748 }
 0x59b   :  { %v6301_v5 = vpop.permute.xlu2 %2398 }
 0x59c   :  { %v2673_v37 = vpop.permute.xlu1 %2672 }
 0x59d   :  { %v3112_v57 = vsel %vm1279_vm5, %v3087_v2, %v2673_v37  ;;  %v4043_v37 = vld [vmem:[%s6941_s1 + $0x58] sm:$0xff] }
 0x59e   :  { %v3137_v9 = vsel %vm1305_vm6, %v3112_v57, %v2749_v22  ;;  %v4051_v57 = vld [vmem:[%s6941_s1 + $0x60] sm:$0xff] }
 0x59f   :  { %v3162_v31 = vsel %vm1331_vm7, %v3137_v9, %v2849_v55  ;;  %v4040_v55 = vld [vmem:[%s6941_s1 + $0x40] sm:$0xff] }
 0x5a0   :  { %2972 = vrot.lane.b32.xlu0 %v2247_v34, %s4068_s18  ;;  %v4045_v34 = vld [vmem:[%s6941_s1 + $0x30] sm:$0xff]  ;;  %v4052_v9 = vld [vmem:[%s6941_s1 + $0xa0] sm:$0xff] }
 0x5a1   :  { %2872 = vrot.lane.b32.xlu2 %v2222_v47, %s4069_s19 }
 0x5a2   :  { %2772 = vrot.lane.b32.xlu1 %v2197_v29, %s4067_s17  ;;  %v2867_v23 = vpop.permute.xlu0 %2866 }
 0x5a3   :  { %v6314_v21 = vpop.permute.xlu2 %2492 }
 0x5a4   :  { %v2767_v43 = vpop.permute.xlu1 %2766 }
 0x5a5   :  { %v3146_v39 = vsel %vm1305_vm6, %v3121_v33, %v2767_v43 }
 0x5a6   :  { %v3171_v48 = vsel %vm1331_vm7, %v3146_v39, %v2867_v23  ;;  %v4047_v23 = vld [vmem:[%s6941_s1 + $0x50] sm:$0xff]  ;;  %v4049_v39 = vld [vmem:[%s6941_s1 + $0x88] sm:$0xff] }
 0x5a7   :  { %v3196_v11 = vsel %vm1357_vm8, %v3171_v48, %v2967_v30 }
 0x5a8   :  { %3969 = vmatmul.msk.f32.gmra.mxu2 %vm1395_vm9, %v3196_v11  ;;  %2498 = vrot.lane.b32.xlu0 %v2147_v12, %s4064_s6  ;;  %v4050_v12 = vld [vmem:[%s6941_s1 + $0x68] sm:$0xff] }
 0x5a9   :  { %2422 = vrot.lane.b32.xlu2 %v2146_v26, %s4063_s5 }
 0x5aa   :  { %2322 = vrot.lane.b32.xlu1 %v2121_v4, %s4062_s15  ;;  %v2299_v60 = vpop.permute.xlu0 %2298 }
 0x5ab   :  { %v2675_v28 = vpop.permute.xlu2 %2674  ;;  %v3013_v17 = vsel %vm217_vm0, %v2084_v44, %v2299_v60  ;;  %v4053_v60 = vld [vmem:[%s6941_s1 + $0x80] sm:$0xff] }
 0x5ac   :  { %v2949_v0 = vpop.permute.xlu1 %2948  ;;  %v3038_v16 = vsel %vm1201_vm3, %v3013_v17, %v6301_v5  ;;  %v4059_v17 = vld [vmem:[%s6941_s1 + $0xb0] sm:$0xff] }
 0x5ad   :  { %v3187_v1 = vsel %vm1357_vm8, %v3162_v31, %v2949_v0 }
 0x5ae   :  { %3960 = vmatmul.msk.f32.gmra.mxu1 %vm1395_vm9, %v3187_v1  ;;  %v2085_v1 = vld [vmem:[#allocation3 + $0x68] sm:$0xff] }
 0x5b0   :  { %2774 = vrot.lane.b32.xlu0 %v2198_v15, %s4067_s17 }
 0x5b1   :  { %2698 = vrot.lane.b32.xlu2 %v2197_v29, %s4066_s16 }
 0x5b2   :  { %2598 = vrot.lane.b32.xlu1 %v2172_v18, %s4065_s0  ;;  %v2417_v46 = vpop.permute.xlu0 %2416  ;;  %v4055_v18 = vld [vmem:[%s6941_s1 + $0xb8] sm:$0xff] }
 0x5b3   :  { %v2769_v63 = vpop.permute.xlu2 %2768 }
 0x5b4   :  { %v2317_v38 = vpop.permute.xlu1 %2316 }
 0x5b5   :  { %v3022_v14 = vsel %vm217_vm0, %v2093_v27, %v2317_v38  ;;  %v4057_v38 = vld [vmem:[%s6941_s1 + $0x90] sm:$0xff] }
 0x5b6   :  { %v3047_v25 = vsel %vm1201_vm3, %v3022_v14, %v2417_v46  ;;  %v4056_v46 = vld [vmem:[%s6941_s1 + $0x98] sm:$0xff] }
 0x5b7   :  { %v3072_v26 = vsel %vm1227_vm2, %v3047_v25, %v6314_v21  ;;  %v4048_v21 = vld [vmem:[%s6941_s1 + $0x48] sm:$0xff]  ;;  %v4060_v25 = vld [vmem:[%s6941_s1 + $0xc0] sm:$0xff] }
 0x5b8   :  { %3386 = vperm.xlu0 %4017, %v4036_v52  }
 0x5b9   :  { %2974 = vrot.lane.b32.xlu2 %v2248_v62, %s4068_s18 }
 0x5ba   :  { %2874 = vrot.lane.b32.xlu1 %v2223_v19, %s4069_s19  ;;  %v2575_v20 = vpop.permute.xlu0 %2574 }
 0x5bb   :  { %v2951_v7 = vpop.permute.xlu2 %2950 }
 0x5bc   :  { %v2475_v56 = vpop.permute.xlu1 %2474 }
 0x5bd   :  { %v3063_v53 = vsel %vm1227_vm2, %v3038_v16, %v2475_v56 }
 0x5be   :  { %v3088_v61 = vsel %vm1253_vm4, %v3063_v53, %v2575_v20  ;;  %v2094_v20 = vld [vmem:[#allocation3 + $0xb0] sm:$0xff] }
 0x5bf   :  { %v3113_v6 = vsel %vm1279_vm5, %v3088_v61, %v2675_v28  ;;  %v4054_v28 = vld [vmem:[%s6941_s1 + $0x78] sm:$0xff] }
 0x5c0   :  { %3406 = vperm.xlu0 %4017, %v4037_v58  }
 0x5c1   :  { %3394 = vperm.xlu2 %4019, %v4038_v36  }
 0x5c2   :  { %3390 = vperm.xlu1 %4018, %v4039_v3   ;;  %v2693_v24 = vpop.permute.xlu0 %2692  ;;  %v4058_v3 = vld [vmem:[%s6941_s1 + $0xa8] sm:$0xff] }
 0x5c3   :  { %v6364_v30 = vpop.permute.xlu2 %2318 }
 0x5c4   :  { %v2593_v50 = vpop.permute.xlu1 %2592 }
 0x5c5   :  { %v3097_v40 = vsel %vm1253_vm4, %v3072_v26, %v2593_v50 }
 0x5c6   :  { %v3122_v42 = vsel %vm1279_vm5, %v3097_v40, %v2693_v24 }
 0x5c7   :  { %v3147_v47 = vsel %vm1305_vm6, %v3122_v42, %v2769_v63 }
 0x5c8   :  { %3418 = vperm.xlu0 %4017, %v4040_v55  }
 0x5c9   :  { %3402 = vperm.xlu2 %4019, %v4041_v59  }
 0x5ca   :  { %3398 = vperm.xlu1 %4018, %v4042_v54   ;;  %v2851_v8 = vpop.permute.xlu0 %2850 }
 0x5cb   :  { %v2477_v13 = vpop.permute.xlu2 %2476 }
 0x5cc   :  { %v2751_v41 = vpop.permute.xlu1 %2750 }
 0x5cd   :  { %v3138_v35 = vsel %vm1305_vm6, %v3113_v6, %v2751_v41 }
 0x5ce   :  { %v3163_v22 = vsel %vm1331_vm7, %v3138_v35, %v2851_v8  ;;  %v2095_v35 = vld [vmem:[#allocation3 + $0xb8] sm:$0xff] }
 0x5cf   :  { %v3188_v5 = vsel %vm1357_vm8, %v3163_v22, %v2951_v7  ;;  %v3023_v7 = vsel %vm217_vm0, %v2094_v20, %v6364_v30 }
 0x5d0   :  { %3961 = vmatmul.msk.f32.gmra.mxu1 %vm1395_vm9, %v3188_v5  ;;  %3430 = vperm.xlu0 %4017, %v4043_v37  }
 0x5d1   :  { %3414 = vperm.xlu2 %4019, %v4044_v45  }
 0x5d2   :  { %3410 = vperm.xlu1 %4018, %v4045_v34   ;;  %v2969_v51 = vpop.permute.xlu0 %2968 }
 0x5d3   :  { %v2595_v2 = vpop.permute.xlu2 %2594 }
 0x5d4   :  { %v2869_v29 = vpop.permute.xlu1 %2868 }
 0x5d5   :  { %v3172_v32 = vsel %vm1331_vm7, %v3147_v47, %v2869_v29 }
 0x5d6   :  { %v3197_v49 = vsel %vm1357_vm8, %v3172_v32, %v2969_v51 }
 0x5d7   :  { %3970 = vmatmul.msk.f32.gmra.mxu2 %vm1395_vm9, %v3197_v49 }
 0x5d8   :  { %3442 = vperm.xlu0 %4017, %v4046_v10  }
 0x5d9   :  { %3426 = vperm.xlu2 %4019, %v4047_v23  }
 0x5da   :  { %3422 = vperm.xlu1 %4018, %v4048_v21   ;;  %v2401_v33 = vpop.permute.xlu0 %2400  ;;  %v6461_v21 = vpop.f32.mrf.mxu1 }
 0x5db   :  { %v2753_v4 = vpop.permute.xlu2 %2752 }
 0x5dc   :  { %v2301_v43 = vpop.permute.xlu1 %2300 }
 0x5dd   :  { %v3014_v15 = vsel %vm217_vm0, %v2085_v1, %v2301_v43 }
 0x5de   :  { %v3039_v63 = vsel %vm1201_vm3, %v3014_v15, %v2401_v33  ;;  %v2096_v33 = vld [vmem:[#allocation3 + $0xc0] sm:$0xff] }
 0x5df   :  { %v3064_v56 = vsel %vm1227_vm2, %v3039_v63, %v2477_v13 }
 0x5e0   :  { %3454 = vperm.xlu0 %4017, %v4049_v39  }
 0x5e1   :  { %3438 = vperm.xlu2 %4019, %v4050_v12  }
 0x5e2   :  { %3434 = vperm.xlu1 %4018, %v4051_v57   ;;  %v2495_v48 = vpop.permute.xlu0 %2494 }
 0x5e3   :  { %v2871_v62 = vpop.permute.xlu2 %2870 }
 0x5e4   :  { %v2419_v11 = vpop.permute.xlu1 %2418 }
 0x5e5   :  { %v3048_v44 = vsel %vm1201_vm3, %v3023_v7, %v2419_v11 }
 0x5e6   :  { %v3073_v24 = vsel %vm1227_vm2, %v3048_v44, %v2495_v48  ;;  %v6465_v48 = vpop.f32.mrf.mxu1  ;;  %v6496_v44 = vpop.f32.mrf.mxu2 }
 0x5e7   :  { %v3098_v14 = vsel %vm1253_vm4, %v3073_v24, %v2595_v2 }
 0x5e8   :  { %3466 = vperm.xlu0 %4017, %v4052_v9  }
 0x5e9   :  { %3450 = vperm.xlu2 %4019, %v4053_v60  }
 0x5ea   :  { %3446 = vperm.xlu1 %4018, %v4054_v28   ;;  %v2677_v0 = vpop.permute.xlu0 %2676 }
 0x5eb   :  { %v2321_v16 = vpop.permute.xlu2 %2320 }
 0x5ec   :  { %v2577_v31 = vpop.permute.xlu1 %2576  ;;  %v3024_v40 = vsel %vm217_vm0, %v2095_v35, %v2321_v16 }
 0x5ed   :  { %v3089_v58 = vsel %vm1253_vm4, %v3064_v56, %v2577_v31 }
 0x5ee   :  { %v3114_v36 = vsel %vm1279_vm5, %v3089_v58, %v2677_v0  ;;  %v6470_v28 = vpop.f32.mrf.mxu1 }
 0x5ef   :  { %v3139_v27 = vsel %vm1305_vm6, %v3114_v36, %v2753_v4 }
 0x5f0   :  { %3478 = vperm.xlu0 %4017, %v4055_v18  }
 0x5f1   :  { %3462 = vperm.xlu2 %4019, %v4056_v46  }
 0x5f2   :  { %3458 = vperm.xlu1 %4018, %v4057_v38   ;;  %v2771_v19 = vpop.permute.xlu0 %2770 }
 0x5f3   :  { %v2597_v26 = vpop.permute.xlu2 %2596 }
 0x5f4   :  { %v2695_v52 = vpop.permute.xlu1 %2694 }
 0x5f5   :  { %v3123_v61 = vsel %vm1279_vm5, %v3098_v14, %v2695_v52 }
 0x5f6   :  { %v3148_v54 = vsel %vm1305_vm6, %v3123_v61, %v2771_v19  ;;  %v6476_v46 = vpop.f32.mrf.mxu1 }
 0x5f7   :  { %v3173_v6 = vsel %vm1331_vm7, %v3148_v54, %v2871_v62 }
 0x5f9   :  { %3474 = vperm.xlu2 %4019, %v4059_v17  }
 0x5fa   :  { %3470 = vperm.xlu1 %4018, %v4058_v3   ;;  %v2953_v50 = vpop.permute.xlu0 %2952 }
 0x5fb   :  { %v2873_v45 = vpop.permute.xlu2 %2872 }
 0x5fc   :  { %v2853_v53 = vpop.permute.xlu1 %2852 }
 0x5fd   :  { %v3164_v55 = vsel %vm1331_vm7, %v3139_v27, %v2853_v53 }
 0x5fe   :  { %v3189_v59 = vsel %vm1357_vm8, %v3164_v55, %v2953_v50  ;;  %v6478_v38 = vpop.f32.mrf.mxu1  ;;  %v6512_v55 = vpop.f32.mrf.mxu2 }
 0x5ff   :  { %3962 = vmatmul.msk.f32.gmra.mxu1 %vm1395_vm9, %v3189_v59 }
 0x602   :  { %3482 = vperm.xlu1 %4018, %v4060_v25   ;;  %v2421_v30 = vpop.permute.xlu0 %2420 }
 0x603   :  { %v3049_v37 = vsel %vm1201_vm3, %v3024_v40, %v2421_v30  ;;  %v2423_v10 = vpop.permute.xlu2 %2422 }
 0x604   :  { %v2971_v8 = vpop.permute.xlu1 %2970 }
 0x605   :  { %v3198_v41 = vsel %vm1357_vm8, %v3173_v6, %v2971_v8 }
 0x606   :  { %3971 = vmatmul.msk.f32.gmra.mxu2 %vm1395_vm9, %v3198_v41  ;;  %v6480_v63 = vpop.f32.mrf.mxu1 }
 0x60a   :  { %v2697_v22 = vpop.permute.xlu0 %2696 }
 0x60b   :  { %v2699_v12 = vpop.permute.xlu2 %2698 }
 0x60c   :  { %v2497_v5 = vpop.permute.xlu1 %2496 }
 0x60d   :  { %v3074_v42 = vsel %vm1227_vm2, %v3049_v37, %v2497_v5 }
 0x60e   :  { %v3099_v34 = vsel %vm1253_vm4, %v3074_v42, %v2597_v26  ;;  %v6482_v62 = vpop.f32.mrf.mxu1 }
 0x60f   :  { %v3124_v51 = vsel %vm1279_vm5, %v3099_v34, %v2697_v22  ;;  %v6529_v22 = vpop.f32.mrf.mxu2 }
 0x612   :  { %v2973_v29 = vpop.permute.xlu0 %2972 }
 0x613   :  { %v2975_v1 = vpop.permute.xlu2 %2974 }
 0x614   :  { %v2773_v13 = vpop.permute.xlu1 %2772 }
 0x615   :  { %v3149_v47 = vsel %vm1305_vm6, %v3124_v51, %v2773_v13 }
 0x616   :  { %v3174_v32 = vsel %vm1331_vm7, %v3149_v47, %v2873_v45  ;;  %v6484_v19 = vpop.f32.mrf.mxu1 }
 0x617   :  { %v3199_v49 = vsel %vm1357_vm8, %v3174_v32, %v2973_v29 }
 0x618   :  { %3972 = vmatmul.msk.f32.gmra.mxu2 %vm1395_vm9, %v3199_v49  ;;  %v6543_v49 = vpop.f32.mrf.mxu2 }
 0x61a   :  { %v2499_v2 = vpop.permute.xlu0 %2498 }
 0x61b   :  { %v6490_v56 = vpop.permute.xlu2 %3394 }
 0x61c   :  { %v2323_v23 = vpop.permute.xlu1 %2322  ;;  %v3487_v50 = vmul.f32 %v6490_v56, %v6470_v28 }
 0x61d   :  { %v3025_v43 = vsel %vm217_vm0, %v2096_v33, %v2323_v23 }
 0x61e   :  { %v3050_v39 = vsel %vm1201_vm3, %v3025_v43, %v2423_v10  ;;  %v6488_v20 = vpop.f32.mrf.mxu1  ;;  %v3513_v61 = vsel %vm217_vm0, %v3487_v50, 0.0  ;;  %vm3889_vm3 = vcmask 9216  }
 0x61f   :  { %v3075_v11 = vsel %vm1227_vm2, %v3050_v39, %v2499_v2  ;;  %vm3816_vm2 = vcmask 588800  }
 0x622   :  { %v2775_v60 = vpop.permute.xlu0 %2774 }
 0x623   :  { %v6510_v53 = vpop.permute.xlu2 %3402 }
 0x624   :  { %v2599_v57 = vpop.permute.xlu1 %2598  ;;  %v3489_v8 = vmul.f32 %v6510_v53, %v6478_v38 }
 0x625   :  { %v3100_v4 = vsel %vm1253_vm4, %v3075_v11, %v2599_v57  ;;  %vm3916_vm4 = vcmask 25600  }
 0x626   :  { %v3125_v9 = vsel %vm1279_vm5, %v3100_v4, %v2699_v12  ;;  %v6500_v3 = vpop.f32.mrf.mxu1  ;;  %v3517_v26 = vsel %vm217_vm0, %v3489_v8, 0.0 }
 0x627   :  { %v3150_v0 = vsel %vm1305_vm6, %v3125_v9, %v2775_v60  ;;  %v6560_v60 = vpop.f32.mrf.mxu2 }
 0x62a   :  { %v6492_v7 = vpop.permute.xlu0 %3386 }
 0x62b   :  { %v3485_v36 = vmul.f32 %v6492_v7, %v6461_v21  ;;  %v6531_v5 = vpop.permute.xlu2 %3414 }
 0x62c   :  { %v2875_v31 = vpop.permute.xlu1 %2874  ;;  %v3492_v47 = vmul.f32 %v6531_v5, %v6484_v19 }
 0x62d   :  { %v3175_v15 = vsel %vm1331_vm7, %v3150_v0, %v2875_v31  ;;  %v3510_v16 = vsel %vm217_vm0, %v3485_v36, 0.0 }
 0x62e   :  { %v3200_v18 = vsel %vm1357_vm8, %v3175_v15, %v2975_v1  ;;  %v6516_v54 = vpop.f32.mrf.mxu1  ;;  %v3523_v10 = vsel %vm217_vm0, %v3492_v47, 0.0 }
 0x62f   :  { %3973 = vmatmul.msk.f32.gmra.mxu2 %vm1395_vm9, %v3200_v18 }
 0x632   :  { %v6518_v25 = vpop.permute.xlu0 %3406 }
 0x633   :  { %v3490_v35 = vmul.f32 %v6518_v25, %v6480_v63  ;;  %v6550_v43 = vpop.permute.xlu2 %3426 }
 0x634   :  { %v6486_v52 = vpop.permute.xlu1 %3390  ;;  %v3495_v9 = vmul.f32 %v6550_v43, %v6516_v54 }
 0x635   :  { %v3486_v58 = vmul.f32 %v6486_v52, %v6465_v48  ;;  %v3519_v45 = vsel %vm217_vm0, %v3490_v35, 0.0 }
 0x636   :  { %v6533_v42 = vpop.f32.mrf.mxu1  ;;  %v3529_v15 = vsel %vm217_vm0, %v3495_v9, 0.0 }
 0x637   :  { %v3511_v24 = vsel %vm217_vm0, %v3486_v58, 0.0 }
 0x638   :  { %v3512_v14 = vadd.f32 %v3511_v24, %v3510_v16 }
 0x63a   :  { %v3514_v30 = vadd.f32 %v3513_v61, %v3512_v14  ;;  %v6537_v51 = vpop.permute.xlu0 %3418  ;;  %v6577_v14 = vpop.f32.mrf.mxu2 }
 0x63b   :  { %v3493_v23 = vmul.f32 %v6537_v51, %v6488_v20  ;;  %v6571_v36 = vpop.permute.xlu2 %3438 }
 0x63c   :  { %v6502_v17 = vpop.permute.xlu1 %3398 }
 0x63d   :  { %v3488_v27 = vmul.f32 %v6502_v17, %v6476_v46  ;;  %v3525_v12 = vsel %vm217_vm0, %v3493_v23, 0.0 }
 0x63f   :  { %v3515_v59 = vsel %vm217_vm0, %v3488_v27, 0.0 }
 0x640   :  { %v3516_v6 = vadd.f32 %v3515_v59, %v3514_v30 }
 0x642   :  { %v3518_v37 = vadd.f32 %v3517_v26, %v3516_v6  ;;  %v6556_v11 = vpop.permute.xlu0 %3430 }
 0x643   :  { %v3496_v18 = vmul.f32 %v6556_v11, %v6533_v42 }
 0x644   :  { %v6522_v41 = vpop.permute.xlu1 %3410  ;;  %v3520_v13 = vadd.f32 %v3519_v45, %v3518_v37  ;;  %v6589_v45 = vpop.f32.mrf.mxu2 }
 0x645   :  { %v3491_v40 = vmul.f32 %v6522_v41, %v6482_v62  ;;  %v3531_v16 = vsel %vm217_vm0, %v3496_v18, 0.0 }
 0x647   :  { %v3521_v34 = vsel %vm217_vm0, %v3491_v40, 0.0 }
 0x648   :  { %v3522_v29 = vadd.f32 %v3521_v34, %v3520_v13  ;;  %v6591_v34 = vpop.permute.xlu2 %3450 }
 0x649   :  { %v3501_v47 = vmul.f32 %v6591_v34, %v6529_v22 }
 0x64a   :  { %v3524_v2 = vadd.f32 %v3523_v10, %v3522_v29  ;;  %v6579_v61 = vpop.permute.xlu0 %3442 }
 0x64b   :  { %v3499_v6 = vmul.f32 %v6579_v61, %v6496_v44 }
 0x64c   :  { %v6541_v32 = vpop.permute.xlu1 %3422  ;;  %v3526_v4 = vadd.f32 %v3525_v12, %v3524_v2 }
 0x64d   :  { %v3494_v33 = vmul.f32 %v6541_v32, %v6500_v3  ;;  %v6552_v39 = vpop.f32.mrf.mxu1  ;;  %v3537_v40 = vsel %vm217_vm0, %v3499_v6, 0.0 }
 0x64f   :  { %v3527_v57 = vsel %vm217_vm0, %v3494_v33, 0.0  ;;  %v3541_v33 = vsel %vm217_vm0, %v3501_v47, 0.0 }
 0x650   :  { %v3528_v0 = vadd.f32 %v3527_v57, %v3526_v4 }
 0x652   :  { %v3530_v24 = vadd.f32 %v3529_v15, %v3528_v0  ;;  %v6596_v10 = vpop.permute.xlu0 %3454  ;;  %v6608_v15 = vpop.permute.xlu2 %3462 }
 0x653   :  { %v3502_v2 = vmul.f32 %v6596_v10, %v6543_v49 }
 0x654   :  { %v6562_v31 = vpop.permute.xlu1 %3434  ;;  %v3532_v59 = vadd.f32 %v3531_v16, %v3530_v24 }
 0x655   :  { %v3497_v58 = vmul.f32 %v6562_v31, %v6552_v39  ;;  %v3543_v9 = vsel %vm217_vm0, %v3502_v2, 0.0 }
 0x657   :  { %v3533_v27 = vsel %vm217_vm0, %v3497_v58, 0.0  ;;  %v3504_v58 = vmul.f32 %v6608_v15, %v6577_v14 }
 0x658   :  { %v3534_v8 = vadd.f32 %v3533_v27, %v3532_v59 }
 0x659   :  { %v3547_v59 = vsel %vm217_vm0, %v3504_v58, 0.0 }
 0x65a   :  { %v6601_v12 = vpop.f32.mrf.mxu2  ;;  %v6627_v47 = vpop.permute.xlu2 %3474 }
 0x65b   :  { %7048 = vst [vmem:[#allocation35_spill] sm:$0xff] %v6627_v47 }
 0x65c   :  { %v6584_v26 = vpop.permute.xlu1 %3446 }
 0x65d   :  { %v3500_v37 = vmul.f32 %v6584_v26, %v6512_v55 }
 0x65f   :  { %v3539_v29 = vsel %vm217_vm0, %v3500_v37, 0.0 }
 0x664   :  { %v6603_v57 = vpop.permute.xlu1 %3458 }
 0x665   :  { %v3503_v0 = vmul.f32 %v6603_v57, %v6560_v60 }
 0x667   :  { %v3545_v24 = vsel %vm217_vm0, %v3503_v0, 0.0 }
 0x67c   :  { %v6564_v1 = vpop.f32.mrf.mxu1 }
 0x67d   :  { %v3498_v50 = vmul.f32 %v6571_v36, %v6564_v1 }
 0x67f   :  { %v3535_v30 = vsel %vm217_vm0, %v3498_v50, 0.0  ;;  %v6613_v50 = vpop.permute.xlu0 %3466 }
 0x680   :  { %v3536_v35 = vadd.f32 %v3535_v30, %v3534_v8  ;;  %v3505_v30 = vmul.f32 %v6613_v50, %v6589_v45  ;;  %v6620_v8 = vpop.permute.xlu1 %3470 }
 0x682   :  { %v3538_v13 = vadd.f32 %v3537_v40, %v3536_v35  ;;  %v3549_v35 = vsel %vm217_vm0, %v3505_v30, 0.0  ;;  %v3506_v40 = vmul.f32 %v6620_v8, %v6601_v12 }
 0x684   :  { %v3540_v23 = vadd.f32 %v3539_v29, %v3538_v13 }
 0x686   :  { %v3542_v4 = vadd.f32 %v3541_v33, %v3540_v23  ;;  %v3551_v23 = vsel %vm217_vm0, %v3506_v40, 0.0 }
 0x687   :  { %v6629_v29 = vpop.permute.xlu0 %3478 }
 0x688   :  { %v3544_v18 = vadd.f32 %v3543_v9, %v3542_v4  ;;  %7049 = vst [vmem:[#allocation4_spill] sm:$0xff] %v6629_v29 }
 0x689   :  { %v6615_v16 = vpop.f32.mrf.mxu2 }
 0x68a   :  { %v3546_v27 = vadd.f32 %v3545_v24, %v3544_v18  ;;  %v3507_v33 = vmul.f32 %v6627_v47, %v6615_v16  ;;  %v6638_v18 = vpop.permute.xlu1 %3482 }
 0x68c   :  { %v3548_v6 = vadd.f32 %v3547_v59, %v3546_v27  ;;  %v3553_v9 = vsel %vm217_vm0, %v3507_v33, 0.0 }
 0x68e   :  { %v3550_v37 = vadd.f32 %v3549_v35, %v3548_v6 }
 0x690   :  { %v3552_v4 = vadd.f32 %v3551_v23, %v3550_v37 }
 0x692   :  { %v3554_v58 = vadd.f32 %v3553_v9, %v3552_v4 }
 0x69b   :  { %v6625_v13 = vpop.f32.mrf.mxu2 }
 0x69c   :  { %v3508_v2 = vmul.f32 %v6629_v29, %v6625_v13 }
 0x69e   :  { %v3555_v0 = vsel %vm217_vm0, %v3508_v2, 0.0 }
 0x69f   :  { %v3556_v59 = vadd.f32 %v3555_v0, %v3554_v58 }
 0x6b2   :  { %v6640_v24 = vpop.f32.mrf.mxu2 }
 0x6b3   :  { %v3509_v27 = vmul.f32 %v6638_v18, %v6640_v24 }
 0x6b5   :  { %v3557_v30 = vsel %vm217_vm0, %v3509_v27, 0.0 }
 0x6b6   :  { %v3558_v6 = vadd.f32 %v3557_v30, %v3556_v59 }
 0x6b8   :  { %v3559_v35 = vrot.slane %v3558_v6, 4 }
 0x6ba   :  { %v3560_v40 = vadd.f32 %v3559_v35, %v3558_v6 }
 0x6bc   :  { %v3561_v29 = vrot.slane %v3560_v40, 2 }
 0x6be   :  { %v3562_v37 = vadd.f32 %v3561_v29, %v3560_v40 }
 0x6c0   :  { %v3563_v23 = vrot.slane %v3562_v37, 1 }
 0x6c2   :  { %v3564_v33 = vadd.f32 %v3563_v23, %v3562_v37 }
 0x6c4   :  { %v6645_v47 = vmul.f32 0.03125, %v3564_v33 }
 0x6c6   :  { %v6649_v2 = vsub.f32 %v6461_v21, %v6645_v47  ;;  %v6653_v4 = vsub.f32 %v6465_v48, %v6645_v47  ;;  %v6657_v9 = vsub.f32 %v6470_v28, %v6645_v47  ;;  %v6663_v29 = vsub.f32 %v6476_v46, %v6645_v47 }
 0x6c7   :  { %v6669_v21 = vsub.f32 %v6478_v38, %v6645_v47  ;;  %v6675_v28 = vsub.f32 %v6480_v63, %v6645_v47  ;;  %v6681_v59 = vsub.f32 %v6482_v62, %v6645_v47  ;;  %v6695_v62 = vsub.f32 %v6488_v20, %v6645_v47 }
 0x6c8   :  { %v3591_v0 = vmul.f32 %v6649_v2, %v6492_v7  ;;  %v3592_v58 = vmul.f32 %v6653_v4, %v6486_v52  ;;  %v3593_v48 = vmul.f32 %v6657_v9, %v6490_v56  ;;  %v3594_v7 = vmul.f32 %v6663_v29, %v6502_v17 }
 0x6c9   :  { %v3595_v38 = vmul.f32 %v6669_v21, %v6510_v53  ;;  %v6688_v56 = vsub.f32 %v6484_v19, %v6645_v47  ;;  %v3596_v63 = vmul.f32 %v6675_v28, %v6518_v25  ;;  %v3597_v53 = vmul.f32 %v6681_v59, %v6522_v41 }
 0x6ca   :  { %v3616_v27 = vmul.f32 %v3591_v0, %v3591_v0  ;;  %v3617_v46 = vmul.f32 %v3592_v58, %v3592_v58  ;;  %v3618_v52 = vmul.f32 %v3593_v48, %v3593_v48  ;;  %v3619_v6 = vmul.f32 %v3594_v7, %v3594_v7 }
 0x6cb   :  { %v3620_v40 = vmul.f32 %v3595_v38, %v3595_v38  ;;  %v6702_v19 = vsub.f32 %v6500_v3, %v6645_v47  ;;  %v3598_v25 = vmul.f32 %v6688_v56, %v6531_v5  ;;  %v3621_v33 = vmul.f32 %v3596_v63, %v3596_v63 }
 0x6cc   :  { %v3641_v30 = vsel %vm217_vm0, %v3616_v27, 0.0  ;;  %v3642_v17 = vsel %vm217_vm0, %v3617_v46, 0.0  ;;  %v3644_v37 = vsel %vm217_vm0, %v3618_v52, 0.0  ;;  %v3646_v0 = vsel %vm217_vm0, %v3619_v6, 0.0 }
 0x6cd   :  { %v3643_v35 = vadd.f32 %v3642_v17, %v3641_v30  ;;  %v6709_v20 = vsub.f32 %v6516_v54, %v6645_v47  ;;  %v3599_v41 = vmul.f32 %v6695_v62, %v6537_v51  ;;  %v3622_v48 = vmul.f32 %v3597_v53, %v3597_v53 }
 0x6ce   :  { %v3648_v27 = vsel %vm217_vm0, %v3620_v40, 0.0  ;;  %v6716_v3 = vsub.f32 %v6533_v42, %v6645_v47  ;;  %v3600_v5 = vmul.f32 %v6702_v19, %v6541_v32  ;;  %v3623_v46 = vmul.f32 %v3598_v25, %v3598_v25 }
 0x6cf   :  { %v3645_v23 = vadd.f32 %v3644_v37, %v3643_v35  ;;  %v3650_v38 = vsel %vm217_vm0, %v3621_v33, 0.0  ;;  %v6723_v54 = vsub.f32 %v6552_v39, %v6645_v47  ;;  %v3601_v51 = vmul.f32 %v6709_v20, %v6550_v43 }
 0x6d0   :  { %v3624_v30 = vmul.f32 %v3599_v41, %v3599_v41  ;;  %v3652_v63 = vsel %vm217_vm0, %v3622_v48, 0.0  ;;  %v6730_v42 = vsub.f32 %v6564_v1, %v6645_v47  ;;  %v3602_v32 = vmul.f32 %v6716_v3, %v6556_v11 }
 0x6d1   :  { %v3647_v58 = vadd.f32 %v3646_v0, %v3645_v23  ;;  %v3625_v17 = vmul.f32 %v3600_v5, %v3600_v5  ;;  %v3654_v35 = vsel %vm217_vm0, %v3623_v46, 0.0  ;;  %v6737_v39 = vsub.f32 %v6496_v44, %v6645_v47 }
 0x6d2   :  { %v3603_v43 = vmul.f32 %v6723_v54, %v6562_v31  ;;  %v3626_v40 = vmul.f32 %v3601_v51, %v3601_v51  ;;  %v3656_v37 = vsel %vm217_vm0, %v3624_v30, 0.0  ;;  %v6744_v1 = vsub.f32 %v6512_v55, %v6645_v47 }
 0x6d3   :  { %v3649_v7 = vadd.f32 %v3648_v27, %v3647_v58  ;;  %v3604_v11 = vmul.f32 %v6730_v42, %v6571_v36  ;;  %v3627_v25 = vmul.f32 %v3602_v32, %v3602_v32  ;;  %v3658_v33 = vsel %vm217_vm0, %v3625_v17, 0.0 }
 0x6d4   :  { %v6751_v44 = vsub.f32 %v6529_v22, %v6645_v47  ;;  %v3605_v31 = vmul.f32 %v6737_v39, %v6579_v61  ;;  %v3628_v58 = vmul.f32 %v3603_v43, %v3603_v43  ;;  %v3660_v41 = vsel %vm217_vm0, %v3626_v40, 0.0 }
 0x6d5   :  { %v3651_v52 = vadd.f32 %v3650_v38, %v3649_v7  ;;  %v6758_v55 = vsub.f32 %v6543_v49, %v6645_v47  ;;  %v3606_v36 = vmul.f32 %v6744_v1, %v6584_v26  ;;  %v3629_v27 = vmul.f32 %v3604_v11, %v3604_v11 }
 0x6d6   :  { %v3662_v7 = vsel %vm217_vm0, %v3627_v25, 0.0  ;;  %v6765_v22 = vsub.f32 %v6560_v60, %v6645_v47  ;;  %v3607_v61 = vmul.f32 %v6751_v44, %v6591_v34  ;;  %v3630_v46 = vmul.f32 %v3605_v31, %v3605_v31 }
 0x6d7   :  { %v3653_v6 = vadd.f32 %v3652_v63, %v3651_v52  ;;  %v3664_v38 = vsel %vm217_vm0, %v3628_v58, 0.0  ;;  %v6772_v49 = vsub.f32 %v6577_v14, %v6645_v47  ;;  %v3608_v26 = vmul.f32 %v6758_v55, %v6596_v10 }
 0x6d8   :  { %v3631_v51 = vmul.f32 %v3606_v36, %v3606_v36  ;;  %v3666_v30 = vsel %vm217_vm0, %v3629_v27, 0.0  ;;  %v6779_v60 = vsub.f32 %v6589_v45, %v6645_v47  ;;  %v3609_v34 = vmul.f32 %v6765_v22, %v6603_v57 }
 0x6d9   :  { %v3655_v53 = vadd.f32 %v3654_v35, %v3653_v6  ;;  %v3632_v6 = vmul.f32 %v3607_v61, %v3607_v61  ;;  %v3668_v32 = vsel %vm217_vm0, %v3630_v46, 0.0  ;;  %v6786_v14 = vsub.f32 %v6601_v12, %v6645_v47 }
 0x6da   :  { %v3610_v10 = vmul.f32 %v6772_v49, %v6608_v15  ;;  %v3633_v35 = vmul.f32 %v3608_v26, %v3608_v26  ;;  %v3588_v45 = vsub.f32 %v6615_v16, %v6645_v47  ;;  %v3611_v57 = vmul.f32 %v6779_v60, %v6613_v50 }
 0x6db   :  { %v3657_v23 = vadd.f32 %v3656_v37, %v3655_v53  ;;  %v3670_v53 = vsel %vm217_vm0, %v3631_v51, 0.0  ;;  %v3634_v40 = vmul.f32 %v3609_v34, %v3609_v34  ;;  %v3672_v37 = vsel %vm217_vm0, %v3632_v6, 0.0 }
 0x6dc   :  { %v3589_v12 = vsub.f32 %v6625_v13, %v6645_v47  ;;  %v3612_v15 = vmul.f32 %v6786_v14, %v6620_v8  ;;  %v3635_v11 = vmul.f32 %v3610_v10, %v3610_v10  ;;  %v3674_v25 = vsel %vm217_vm0, %v3633_v35, 0.0 }
 0x6dd   :  { %v3659_v0 = vadd.f32 %v3658_v33, %v3657_v23  ;;  %v3590_v16 = vsub.f32 %v6640_v24, %v6645_v47  ;;  %v3636_v50 = vmul.f32 %v3611_v57, %v3611_v57  ;;  %v3676_v58 = vsel %vm217_vm0, %v3634_v40, 0.0 }
 0x6de   :  { %v3637_v27 = vmul.f32 %v3612_v15, %v3612_v15  ;;  %v3678_v13 = vsel %vm217_vm0, %v3635_v11, 0.0 }
 0x6df   :  { %v3661_v48 = vadd.f32 %v3660_v41, %v3659_v0  ;;  %v7050_v0 = vld [vmem:[#allocation35_spill] sm:$0xff]  ;;  %v3615_v8 = vmul.f32 %v3590_v16, %v6638_v18  ;;  %v3680_v61 = vsel %vm217_vm0, %v3636_v50, 0.0 }
 0x6e0   :  { %v3613_v31 = vmul.f32 %v3588_v45, %v7050_v0  ;;  %v3682_v47 = vsel %vm217_vm0, %v3637_v27, 0.0 }
 0x6e1   :  { %v3663_v5 = vadd.f32 %v3662_v7, %v3661_v48  ;;  %v7051_v48 = vld [vmem:[#allocation4_spill] sm:$0xff] }
 0x6e2   :  { %v3614_v36 = vmul.f32 %v3589_v12, %v7051_v48 }
 0x6e3   :  { %v3665_v52 = vadd.f32 %v3664_v38, %v3663_v5  ;;  %v3638_v5 = vmul.f32 %v3613_v31, %v3613_v31 }
 0x6e4   :  { %v3639_v38 = vmul.f32 %v3614_v36, %v3614_v36 }
 0x6e5   :  { %v3667_v63 = vadd.f32 %v3666_v30, %v3665_v52  ;;  %v3640_v52 = vmul.f32 %v3615_v8, %v3615_v8  ;;  %v3684_v26 = vsel %vm217_vm0, %v3638_v5, 0.0 }
 0x6e6   :  { %v3686_v30 = vsel %vm217_vm0, %v3639_v38, 0.0 }
 0x6e7   :  { %v3669_v17 = vadd.f32 %v3668_v32, %v3667_v63  ;;  %v3688_v34 = vsel %vm217_vm0, %v3640_v52, 0.0 }
 0x6e9   :  { %v3671_v43 = vadd.f32 %v3670_v53, %v3669_v17 }
 0x6eb   :  { %v3673_v23 = vadd.f32 %v3672_v37, %v3671_v43 }
 0x6ed   :  { %v3675_v33 = vadd.f32 %v3674_v25, %v3673_v23 }
 0x6ef   :  { %v3677_v41 = vadd.f32 %v3676_v58, %v3675_v33  ;;  %v6816_v33 = vld [vmem:[%s6940_s3 + $0xc2] ss:$0 sm:$0xff]  ;;  %v6826_v58 = vld [vmem:[%s6940_s3 + $0xc3] ss:$0 sm:$0xff] }
 0x6f1   :  { %v3679_v7 = vadd.f32 %v3678_v13, %v3677_v41 }
 0x6f3   :  { %v3681_v46 = vadd.f32 %v3680_v61, %v3679_v7 }
 0x6f5   :  { %v3683_v24 = vadd.f32 %v3682_v47, %v3681_v46 }
 0x6f7   :  { %v3685_v51 = vadd.f32 %v3684_v26, %v3683_v24 }
 0x6f9   :  { %v3687_v63 = vadd.f32 %v3686_v30, %v3685_v51  ;;  %v3810_v51 = vld [vmem:[%s6942_s2] sm:$0xf] }
 0x6fa   :  { %3812 = vst [vmem:[#allocation1] ss:$4 sm:$0xff] %v3810_v51 }
 0x6fb   :  { %v3689_v6 = vadd.f32 %v3688_v34, %v3687_v63 }
 0x6fd   :  { %v3690_v32 = vrot.slane %v3689_v6, 4 }
 0x6ff   :  { %v3691_v18 = vadd.f32 %v3690_v32, %v3689_v6 }
 0x701   :  { %v3692_v17 = vrot.slane %v3691_v18, 2 }
 0x703   :  { %v3693_v10 = vadd.f32 %v3692_v17, %v3691_v18 }
 0x705   :  { %v3694_v35 = vrot.slane %v3693_v10, 1 }
 0x707   :  { %v3695_v53 = vadd.f32 %v3694_v35, %v3693_v10 }
 0x709   :  { %v3696_v43 = vmul.f32 0.03125, %v3695_v53 }
 0x70b   :  { %v3697_v57 = vadd.f32 1e-05, %v3696_v43 }
 0x70d   :  { %4027 = vrsqrt.f32 %v3697_v57  ;;  %vm3704_vm14 = vweird.f32 %v3697_v57 }
 0x713   :  { %v4028_v40 = vpop.eup %4027 }
 0x714   :  { %v3699_v37 = vmul.f32 %v4028_v40, %v3697_v57  ;;  %vm3705_vm13 = vweird.f32 %v4028_v40 }
 0x715   :  { %vm3706_vm15 = vmor %vm3704_vm14, %vm3705_vm13 }
 0x716   :  { %v3700_v23 = vmul.f32 %v4028_v40, %v3699_v37 }
 0x718   :  { %v3701_v15 = vmul.f32 0.5, %v3700_v23 }
 0x71a   :  { %v3702_v11 = vsub.f32 1.5, %v3701_v15 }
 0x71c   :  { %v3703_v25 = vmul.f32 %v4028_v40, %v3702_v11 }
 0x71e   :  { %v6818_v0 = vsel %vm3706_vm15, %v4028_v40, %v3703_v25 }
 0x71f   :  { %v3732_v31 = vmul.f32 %v6818_v0, %v3590_v16  ;;  %v3723_v50 = vmul.f32 %v6818_v0, %v6744_v1  ;;  %v3722_v41 = vmul.f32 %v6818_v0, %v6737_v39  ;;  %v3731_v48 = vmul.f32 %v6818_v0, %v3589_v12 }
 0x720   :  { %v3721_v36 = vmul.f32 %v6818_v0, %v6730_v42  ;;  %v3730_v27 = vmul.f32 %v6818_v0, %v3588_v45  ;;  %v3720_v16 = vmul.f32 %v6818_v0, %v6723_v54  ;;  %v3729_v1 = vmul.f32 %v6818_v0, %v6786_v14 }
 0x721   :  { %v3749_v13 = vmul.f32 %v6816_v33, %v3723_v50  ;;  %v3758_v7 = vmul.f32 %v6816_v33, %v3732_v31  ;;  %v3748_v8 = vmul.f32 %v6816_v33, %v3722_v41  ;;  %v3757_v39 = vmul.f32 %v6816_v33, %v3731_v48 }
 0x722   :  { %v3747_v12 = vmul.f32 %v6816_v33, %v3721_v36  ;;  %v3756_v42 = vmul.f32 %v6816_v33, %v3730_v27  ;;  %v3746_v45 = vmul.f32 %v6816_v33, %v3720_v16  ;;  %v3755_v5 = vmul.f32 %v6816_v33, %v3729_v1 }
 0x723   :  { %v3775_v54 = vadd.f32 %v6826_v58, %v3749_v13  ;;  %v3784_v14 = vadd.f32 %v6826_v58, %v3758_v7  ;;  %v3774_v61 = vadd.f32 %v6826_v58, %v3748_v8  ;;  %v3783_v46 = vadd.f32 %v6826_v58, %v3757_v39 }
 0x724   :  { %v3773_v38 = vadd.f32 %v6826_v58, %v3747_v12  ;;  %v3782_v47 = vadd.f32 %v6826_v58, %v3756_v42  ;;  %v3772_v26 = vadd.f32 %v6826_v58, %v3746_v45  ;;  %v3781_v6 = vadd.f32 %v6826_v58, %v3755_v5 }
 0x725   :  { %v3800_v24 = vmax.f32 %v3775_v54, 0.0  ;;  %v3809_v52 = vmax.f32 %v3784_v14, 0.0  ;;  %v3799_v30 = vmax.f32 %v3774_v61, 0.0  ;;  %v3808_v63 = vmax.f32 %v3783_v46, 0.0 }
 0x726   :  { %v3798_v34 = vmax.f32 %v3773_v38, 0.0  ;;  %v3807_v32 = vmax.f32 %v3782_v47, 0.0  ;;  %v3719_v18 = vmul.f32 %v6818_v0, %v6716_v3  ;;  %v3728_v17 = vmul.f32 %v6818_v0, %v6779_v60 }
 0x727   :  { %3819 = vmatpush.msrb.mxu2 %v3800_v24  ;;  %3846 = vmatpush.msrb.mxu3 %v3809_v52  ;;  %v3718_v10 = vmul.f32 %v6818_v0, %v6709_v20  ;;  %v3727_v35 = vmul.f32 %v6818_v0, %v6772_v49  ;;  %v3717_v53 = vmul.f32 %v6818_v0, %v6702_v19  ;;  %v3797_v3 = vmax.f32 %v3772_v26, 0.0 }
 0x728   :  { %v3726_v43 = vmul.f32 %v6818_v0, %v6765_v22  ;;  %v3716_v57 = vmul.f32 %v6818_v0, %v6695_v62  ;;  %v3745_v60 = vmul.f32 %v6816_v33, %v3719_v18  ;;  %v3754_v40 = vmul.f32 %v6816_v33, %v3728_v17 }
 0x729   :  { %3820 = vmatpush.msrb.mxu2 %v3799_v30  ;;  %3847 = vmatpush.msrb.mxu3 %v3808_v63  ;;  %v3744_v20 = vmul.f32 %v6816_v33, %v3718_v10  ;;  %v3753_v49 = vmul.f32 %v6816_v33, %v3727_v35  ;;  %v3743_v37 = vmul.f32 %v6816_v33, %v3717_v53  ;;  %v3806_v62 = vmax.f32 %v3781_v6, 0.0  ;;  %v3814_v63 = vld.sshfl [vmem:[#allocation1 + $0x8] sm:$0xff pattern:$0x73625140] }
 0x72a   :  { %v3752_v19 = vmul.f32 %v6816_v33, %v3726_v43  ;;  %v3742_v22 = vmul.f32 %v6816_v33, %v3716_v57  ;;  %v3771_v23 = vadd.f32 %v6826_v58, %v3745_v60  ;;  %v3780_v15 = vadd.f32 %v6826_v58, %v3754_v40  ;;  %v3813_v40 = vld.sshfl [vmem:[#allocation1] sm:$0xff pattern:$0x73625140] }
 0x72b   :  { %3821 = vmatpush.msrb.mxu2 %v3798_v34  ;;  %3848 = vmatpush.msrb.mxu3 %v3807_v32  ;;  %v3770_v11 = vadd.f32 %v6826_v58, %v3744_v20  ;;  %v3779_v25 = vadd.f32 %v6826_v58, %v3753_v49  ;;  %v3769_v31 = vadd.f32 %v6826_v58, %v3743_v37  ;;  %v3860_v20 = vld [vmem:[%s6940_s3 + $0xd0] sm:$0x3] }
 0x72c   :  { %v3796_v50 = vmax.f32 %v3771_v23, 0.0  ;;  %v3805_v41 = vmax.f32 %v3780_v15, 0.0  ;;  %v3778_v48 = vadd.f32 %v6826_v58, %v3752_v19  ;;  %v3725_v36 = vmul.f32 %v6818_v0, %v6758_v55  ;;  %v4024_v19 = vld [vmem:[%s6940_s3 + $0xd8] ss:$0 sm:$0xff] }
 0x72d   :  { %3822 = vmatpush.msrb.mxu2 %v3797_v3  ;;  %3849 = vmatpush.msrb.mxu3 %v3806_v62  ;;  %v3795_v27 = vmax.f32 %v3770_v11, 0.0  ;;  %v3804_v16 = vmax.f32 %v3779_v25, 0.0  ;;  %v3768_v1 = vadd.f32 %v6826_v58, %v3742_v22  ;;  %v3794_v13 = vmax.f32 %v3769_v31, 0.0 }
 0x72e   :  { %v3751_v7 = vmul.f32 %v6816_v33, %v3725_v36  ;;  %v3715_v8 = vmul.f32 %v6818_v0, %v6688_v56  ;;  %v3724_v39 = vmul.f32 %v6818_v0, %v6751_v44  ;;  %v3714_v12 = vmul.f32 %v6818_v0, %v6681_v59 }
 0x72f   :  { %3823 = vmatpush.msrb.mxu2 %v3796_v50  ;;  %3850 = vmatpush.msrb.mxu3 %v3805_v41  ;;  %v3713_v55 = vmul.f32 %v6818_v0, %v6675_v28  ;;  %v3712_v42 = vmul.f32 %v6818_v0, %v6669_v21  ;;  %v3711_v45 = vmul.f32 %v6818_v0, %v6663_v29  ;;  %v3803_v5 = vmax.f32 %v3778_v48, 0.0 }
 0x730   :  { %v3777_v56 = vadd.f32 %v6826_v58, %v3751_v7  ;;  %v3741_v54 = vmul.f32 %v6816_v33, %v3715_v8  ;;  %v3750_v44 = vmul.f32 %v6816_v33, %v3724_v39  ;;  %v3793_v14 = vmax.f32 %v3768_v1, 0.0 }
 0x731   :  { %3824 = vmatpush.msrb.mxu2 %v3795_v27  ;;  %3851 = vmatpush.msrb.mxu3 %v3804_v16  ;;  %v3740_v59 = vmul.f32 %v6816_v33, %v3714_v12  ;;  %v3739_v28 = vmul.f32 %v6816_v33, %v3713_v55  ;;  %v3738_v61 = vmul.f32 %v6816_v33, %v3712_v42 }
 0x732   :  { %v3802_v21 = vmax.f32 %v3777_v56, 0.0  ;;  %v3767_v29 = vadd.f32 %v6826_v58, %v3741_v54  ;;  %v3776_v46 = vadd.f32 %v6826_v58, %v3750_v44  ;;  %v3710_v38 = vmul.f32 %v6818_v0, %v6657_v9 }
 0x733   :  { %3825 = vmatpush.msrb.mxu2 %v3794_v13  ;;  %3852 = vmatpush.msrb.mxu3 %v3803_v5  ;;  %v3766_v47 = vadd.f32 %v6826_v58, %v3740_v59  ;;  %v3737_v24 = vmul.f32 %v6816_v33, %v3711_v45  ;;  %v3765_v51 = vadd.f32 %v6826_v58, %v3739_v28 }
 0x734   :  { %v3792_v52 = vmax.f32 %v3767_v29, 0.0  ;;  %v3801_v26 = vmax.f32 %v3776_v46, 0.0  ;;  %v3709_v30 = vmul.f32 %v6818_v0, %v6653_v4  ;;  %v3764_v9 = vadd.f32 %v6826_v58, %v3738_v61 }
 0x735   :  { %3826 = vmatpush.msrb.mxu2 %v3793_v14  ;;  %3853 = vmatpush.msrb.mxu3 %v3802_v21  ;;  %v3791_v34 = vmax.f32 %v3766_v47, 0.0  ;;  %v3736_v6 = vmul.f32 %v6816_v33, %v3710_v38  ;;  %v3708_v32 = vmul.f32 %v6818_v0, %v6649_v2  ;;  %v3790_v18 = vmax.f32 %v3765_v51, 0.0 }
 0x736   :  { %v3763_v17 = vadd.f32 %v6826_v58, %v3737_v24  ;;  %v3735_v10 = vmul.f32 %v6816_v33, %v3709_v30  ;;  %v3789_v4 = vmax.f32 %v3764_v9, 0.0 }
 0x737   :  { %3827 = vmatpush.msrb.mxu2 %v3792_v52  ;;  %3854 = vmatpush.msrb.mxu3 %v3801_v26  ;;  %v3762_v35 = vadd.f32 %v6826_v58, %v3736_v6  ;;  %v3734_v53 = vmul.f32 %v6816_v33, %v3708_v32  ;;  %v3859_v33 = vld [vmem:[%s6940_s3 + $0xc8] sm:$0xff]  ;;  %s4073_s3 = smov 1  }
 0x738   :  { %3974 = vmatmul.msk.f32.vlgmr.msrb.gmra.mxu3 %vm3816_vm2, %v3814_v63  ;;  %v3788_v43 = vmax.f32 %v3763_v17, 0.0  ;;  %v3761_v57 = vadd.f32 %v6826_v58, %v3735_v10 }
 0x739   :  { %3828 = vmatpush.msrb.mxu2 %v3791_v34  ;;  %v3787_v3 = vmax.f32 %v3762_v35, 0.0  ;;  %v3760_v2 = vadd.f32 %v6826_v58, %v3734_v53  ;;  %3975 = vmatpush.msk.msra.mxu3 %vm1471_vm1, %v3860_v20  ;;  %vm3914_vm1 = vcmask 23552  }
 0x73a   :  { %v3786_v0 = vmax.f32 %v3761_v57, 0.0 }
 0x73b   :  { %3829 = vmatpush.msrb.mxu2 %v3790_v18  ;;  %v3785_v60 = vmax.f32 %v3760_v2, 0.0  ;;  %3884 = vmatpush.msra.mxu3 %v3859_v33 }
 0x73d   :  { %3830 = vmatpush.msrb.mxu2 %v3789_v4 }
 0x73f   :  { %3831 = vmatpush.msrb.mxu2 %v3788_v43 }
 0x741   :  { %3832 = vmatpush.msrb.mxu2 %v3787_v3 }
 0x743   :  { %3833 = vmatpush.msrb.mxu2 %v3786_v0 }
 0x745   :  { %3834 = vmatpush.msrb.mxu2 %v3785_v60 }
 0x746   :  { %3835 = vmatmul.f32.vlgmr.msrb.gmra.mxu2 %v3813_v40 }
 0x7bb   :  { %v3856_v49 = vpop.f32.mrf.mxu3 }
 0x7c9   :  { %v3836_v58 = vpop.f32.mrf.mxu2 }
 0x7ca   :  { %v3857_v37 = vadd.f32 %v3856_v49, %v3836_v58 }
 0x7cc   :  { %3976 = vmatmul.msk.f32.vlgmr.msra.gmra.mxu3 %vm217_vm0, %v3857_v37  ;;  %vm3912_vm0 = vcmask 7168  }
 0x84f   :  { %v3886_v22 = vpop.f32.mrf.mxu3 }
 0x850   :  { %v3887_v62 = vadd.f32 %v4024_v19, %v3886_v22 }
 0x852   :  { %v3890_v23 = vsel %vm3889_vm3, %v3887_v62, -inf }
 0x853   :  { %3891 = vmax.xlane.f32.xlu2 %v3890_v23 }
 0x8c6   :  { %v3892_v15 = vpop.xlane.xlu2 %3891 }
 0x8c7   :  { %v3893_v11 = vsub.f32 %v3887_v62, %v3892_v15 }
 0x8c9   :  { %v3894_v25 = vmul.f32 1.442695, %v3893_v11 }
 0x8cb   :  { %4029 = vpow2.f32 %v3894_v25 }
 0x8d1   :  { %v4030_v31 = vpop.eup %4029 }
 0x8d2   :  { %v3896_v50 = vsel %vm3889_vm3, %v4030_v31, 0.0 }
 0x8d3   :  { %3897 = vadd.xlane.f32.xlu0 %v3896_v50 }
 0x946   :  { %v3898_v41 = vpop.xlane.xlu0 %3897 }
 0x947   :  { %4031 = vrcp.f32 %v3898_v41 }
 0x948   :  { %4033 = vlog2.f32 %v3898_v41 }
 0x94d   :  { %v4032_v48 = vpop.eup %4031 }
 0x94e   :  { %v3903_v36 = vmul.f32 %v4032_v48, %v4030_v31  ;;  %v4034_v27 = vpop.eup %4033 }
 0x94f   :  { %v3900_v16 = vmul.f32 0.6931472, %v4034_v27 }
 0x950   :  { %3905 = vrot.lane.b32.xlu1 %v3903_v36, %s4072_s27 }
 0x951   :  { %v3901_v1 = vsub.f32 %v3893_v11, %v3900_v16 }
 0x958   :  { %3909 = vrot.lane.b32.xlu1 %v3901_v1, %s4073_s3 }
 0x9c2   :  { %v3906_v13 = vpop.permute.xlu1 %3905 }
 0x9ca   :  { %v3910_v7 = vpop.permute.xlu1 %3909 }
 0x9cb   :  { %v3913_v8 = vsel %vm3912_vm0, %v3906_v13, %v3910_v7 }
 0x9cc   :  { %v3915_v39 = vsel %vm3914_vm1, %v3913_v8, %v3898_v41 }
 0x9cd   :  { %3917 = vst.msk [vmem:[%s6943_s4] sm:$0x3] %vm3916_vm4, %v3915_v39 }

</bundles_post_ra>
